<compile_context>
chip_gen: v7x
topology: tpu7x:2x2x1
jax: 0.10.0
libtpu: 0.0.40
codegen_flags: <defaults>
</compile_context>

<pallas_src>
import jax
import jax.numpy as jnp
from jax.experimental import pallas as pl
from jax.experimental.pallas import tpu as pltpu


def _vmem_capacity_bytes():
    """Physical VMEM of the attached TPU (conservative default if unknown)."""
    try:
        return int(pltpu.get_tpu_info().vmem_capacity_bytes)
    except Exception:
        return 64 * 1024 * 1024          # v7x-sized fallback (smallest generation)


# --------------------------------------------------------------------------- #
# Fused Conv3x3(pad=1) + bias + ReLU + MaxPool 2x2/2   (one image per step)
# --------------------------------------------------------------------------- #
def conv3x3_relu_pool_kernel(x_ref, w_ref, b_ref, o_ref, patch_ref):
    """x_ref    : (H+2, W+2, Cin)        zero-padded image (auto-pipelined block)
       w_ref    : (Kpad, Cout)           im2col conv weight, bf16, K padded
       b_ref    : (1, Cout)              conv bias, f32
       o_ref    : (1, H//2, (W//2)*Cout) pooled output, lane-dense, bf16
       patch_ref: (H*W, Kpad)            bf16 im2col scratch
    """
    Hp, Wp, Cin = x_ref.shape
    H, W = Hp - 2, Wp - 2
    Cout = w_ref.shape[1]
    Kpad = patch_ref.shape[1]

    # im2col: 9 shifted taps -> one (H*W, Kpad) bf16 patch -> single MXU matmul.
    col = 0
    for dy in range(3):
        for dx in range(3):
            tap = x_ref[dy:dy + H, dx:dx + W, :].reshape(H * W, Cin)
            patch_ref[:, col:col + Cin] = tap.astype(patch_ref.dtype)
            col += Cin
    if col < Kpad:
        # Zero the K-padding columns: they hit zero weight rows, but
        # uninitialized VMEM could hold NaNs and NaN*0 != 0.
        patch_ref[:, col:] = jnp.zeros((H * W, Kpad - col), patch_ref.dtype)

    acc = jnp.dot(patch_ref[...], w_ref[...], preferred_element_type=jnp.float32)
    acc = jnp.maximum(acc + b_ref[...], 0.0)                  # bias + ReLU

    # 2x2 max-pool, stride 2 (rows of acc are (y, x)-ordered).
    acc = acc.reshape(H // 2, 2, W, Cout)
    acc = jnp.max(acc, axis=1)
    acc = acc.reshape(H // 2, W // 2, 2, Cout)
    acc = jnp.max(acc, axis=2)                                # (H//2, W//2, Cout)

    o_ref[0] = acc.reshape(H // 2, (W // 2) * Cout).astype(o_ref.dtype)


def conv_relu_pool(x_nhwc, w_im2col, b):
    N, H, W, Cin = x_nhwc.shape
    Kpad, Cout = w_im2col.shape
    assert H % 2 == 0 and W % 2 == 0

    # TODO(synk): absorb the 1-pixel zero pad into the kernel (edge-masked DMA)
    # to avoid this padded-copy HBM round trip.
    xp = jnp.pad(x_nhwc, ((0, 0), (1, 1), (1, 1), (0, 0)))

    return pl.pallas_call(
        conv3x3_relu_pool_kernel,
        out_shape=jax.ShapeDtypeStruct((N, H // 2, (W // 2) * Cout), jnp.bfloat16),
        grid_spec=pltpu.PrefetchScalarGridSpec(
            num_scalar_prefetch=0,
            grid=(N,),
            in_specs=[
                # Whole padded image per step; Pallas double-buffers the block,
                # overlapping its DMA with the previous image's compute.
                pl.BlockSpec((None, H + 2, W + 2, Cin), lambda n: (n, 0, 0, 0)),
                pl.BlockSpec((Kpad, Cout), lambda n: (0, 0)),   # resident weight
                pl.BlockSpec((1, Cout), lambda n: (0, 0)),      # resident bias
            ],
            out_specs=pl.BlockSpec((1, H // 2, (W // 2) * Cout),
                                   lambda n: (n, 0, 0)),
            scratch_shapes=[pltpu.VMEM((H * W, Kpad), jnp.bfloat16)],
        ),
        compiler_params=pltpu.CompilerParams(
            dimension_semantics=("parallel",),
            vmem_limit_bytes=48 * 1024 * 1024,
        ),
    )(xp, w_im2col, b)


# --------------------------------------------------------------------------- #
# Fused fc1 + ReLU + (Dropout=identity) + fc2, K-streamed, hidden-split
# --------------------------------------------------------------------------- #
def fc1_relu_fc2_kernel(x_ref, w1_ref, b1_ref, w2_ref, o_ref, h_acc):
    k = pl.program_id(1)

    @pl.when(k == 0)
    def _init():
        h_acc[...] = jnp.zeros_like(h_acc)

    # Stream K-tiles of the (huge) bf16 fc1 weight; accumulate hidden in f32.
    h_acc[...] += jnp.dot(x_ref[...], w1_ref[...],
                          preferred_element_type=jnp.float32)

    @pl.when(k == pl.num_programs(1) - 1)
    def _finalize():
        h = jnp.maximum(h_acc[...] + b1_ref[...], 0.0)
        # TODO(synk): nn.Dropout() train-mode masking not implemented
        # (inference / identity semantics, matching model.eval()).
        y = jnp.dot(h.astype(jnp.bfloat16), w2_ref[...],
                    preferred_element_type=jnp.float32)
        o_ref[0] = y.astype(o_ref.dtype)


def fc1_relu_fc2(x_bf16, w1, b1, w2, b2, *, block_k=None):
    M, D = x_bf16.shape
    Hdim = w1.shape[1]
    C = w2.shape[1]

    vmem = _vmem_capacity_bytes()
    big_vmem = vmem >= 100 * 1024 * 1024        # v5e/v6e (128 MiB); v7x has 64 MiB
    if block_k is None:
        block_k = 2048 if big_vmem else 1024    # bigger K-tiles amortize step cost
    tk = min(block_k, D)
    assert D % tk == 0
    num_k = D // tk

    # Split the hidden dim across TensorCores (v7x megacore) when each tile
    # stays lane-aligned (multiple of 128); otherwise a single tile.
    num_h = 2 if (Hdim % 256 == 0) else 1
    th = Hdim // num_h

    partials = pl.pallas_call(
        fc1_relu_fc2_kernel,
        out_shape=jax.ShapeDtypeStruct((num_h, M, C), jnp.float32),
        grid_spec=pltpu.PrefetchScalarGridSpec(
            num_scalar_prefetch=0,
            grid=(num_h, num_k),
            in_specs=[
                pl.BlockSpec((M, tk), lambda h, k: (0, k)),
                pl.BlockSpec((tk, th), lambda h, k: (k, h)),   # streamed fc1 weight
                pl.BlockSpec((1, th), lambda h, k: (0, h)),
                pl.BlockSpec((th, C), lambda h, k: (h, 0)),
            ],
            out_specs=pl.BlockSpec((1, M, C), lambda h, k: (h, 0, 0)),
            scratch_shapes=[pltpu.VMEM((M, th), jnp.float32)],
        ),
        compiler_params=pltpu.CompilerParams(
            dimension_semantics=("parallel", "arbitrary"),
            vmem_limit_bytes=(96 if big_vmem else 48) * 1024 * 1024,
        ),
    )(x_bf16, w1, b1, w2)

    # Tiny (num_h, M, C) combine + bias, done once outside the kernel so the
    # hidden tiles stay independent (parallel-safe on the megacore split).
    return jnp.sum(partials, axis=0) + b2


# --------------------------------------------------------------------------- #
# Parameter prep (one-time) and forward pass
# --------------------------------------------------------------------------- #
def prepare_params(params, feat_h, feat_w):
    """One-time re-layout: K-padded bf16 im2col conv weight, bf16 fc weights,
    and fc1 rows permuted so the kernel consumes the NHWC-flattened feature
    map directly (no per-forward NHWC->NCHW transpose)."""
    conv_w = params["conv_w"]                       # (3, 3, Cin, Cout) HWIO
    Cin, Cout = conv_w.shape[2], conv_w.shape[3]
    k = 9 * Cin
    kpad = ((k + 31) // 32) * 32                    # sublane-align the K dim
    w_im2col = jnp.zeros((kpad, Cout), jnp.bfloat16)
    w_im2col = w_im2col.at[:k].set(conv_w.reshape(k, Cout).astype(jnp.bfloat16))

    hidden = params["fc1_w"].shape[1]
    D = Cout * feat_h * feat_w
    # PyTorch flattens NCHW (c, h, w); our features are flattened (h, w, c).
    perm = jnp.arange(D).reshape(Cout, feat_h, feat_w).transpose(1, 2, 0).reshape(D)
    fc1_w_hwc = params["fc1_w"][perm].astype(jnp.bfloat16)

    return {
        "conv_w": w_im2col,
        "conv_b": params["conv_b"].reshape(1, Cout).astype(jnp.float32),
        "fc1_w": fc1_w_hwc,
        "fc1_b": params["fc1_b"].reshape(1, hidden).astype(jnp.float32),
        "fc2_w": params["fc2_w"].astype(jnp.bfloat16),
        "fc2_b": params["fc2_b"].reshape(1, -1).astype(jnp.float32),
    }


@jax.jit
def simple_model_forward(x_nchw, prep):
    """Pallas forward pass matching SimpleModel.forward (eval-mode dropout)."""
    N = x_nchw.shape[0]
    x_nhwc = jnp.transpose(x_nchw, (0, 2, 3, 1))
    feat = conv_relu_pool(x_nhwc, prep["conv_w"], prep["conv_b"])   # bf16, NHWC flat
    flat = feat.reshape(N, -1)                      # zero-copy lane-dense flatten
    return fc1_relu_fc2(flat, prep["fc1_w"], prep["fc1_b"],
                        prep["fc2_w"], prep["fc2_b"])


# --------------------------------------------------------------------------- #
# Main
# --------------------------------------------------------------------------- #
if __name__ == "__main__":
    # Small shapes consistent with the module structure
    # (original uses 256x256 input / 4096 hidden; scaled down here).
    N, Cin, H, W = 2, 3, 16, 16
    Cout = 64
    hidden = 32
    num_classes = 10
    D = Cout * (H // 2) * (W // 2)

    key = jax.random.PRNGKey(0)
    ks = jax.random.split(key, 7)
    x = jax.random.normal(ks[0], (N, Cin, H, W), jnp.float32)
    params = {
        "conv_w": jax.random.normal(ks[1], (3, 3, Cin, Cout), jnp.float32) * 0.1,
        "conv_b": jax.random.normal(ks[2], (Cout,), jnp.float32) * 0.1,
        "fc1_w": jax.random.normal(ks[3], (D, hidden), jnp.float32) * 0.02,
        "fc1_b": jax.random.normal(ks[4], (hidden,), jnp.float32) * 0.02,
        "fc2_w": jax.random.normal(ks[5], (hidden, num_classes), jnp.float32) * 0.05,
        "fc2_b": jax.random.normal(ks[6], (num_classes,), jnp.float32) * 0.05,
    }

    prep = prepare_params(params, H // 2, W // 2)
    out = jax.block_until_ready(simple_model_forward(x, prep))

    # Pure-JAX reference (f32 params, default precision).
    x_nhwc = jnp.transpose(x, (0, 2, 3, 1))
    ref = jax.lax.conv_general_dilated(
        x_nhwc, params["conv_w"], (1, 1), "SAME",
        dimension_numbers=("NHWC", "HWIO", "NHWC")) + params["conv_b"]
    ref = jnp.maximum(ref, 0.0)
    ref = jax.lax.reduce_window(ref, -jnp.inf, jax.lax.max,
                                (1, 2, 2, 1), (1, 2, 2, 1), "VALID")
    ref = jnp.transpose(ref, (0, 3, 1, 2)).reshape(N, D)   # NCHW (C-major) flatten
    ref = jnp.maximum(jnp.dot(ref, params["fc1_w"]) + params["fc1_b"], 0.0)
    ref = jnp.dot(ref, params["fc2_w"]) + params["fc2_b"]

    assert out.shape == (N, num_classes)
    max_err = jnp.max(jnp.abs(out - ref))
    assert jnp.allclose(out, ref, rtol=5e-2, atol=5e-2), (
        f"mismatch: max abs diff = {max_err}")

    print("KERNEL_OK")
</pallas_src>

<mosaic_0001>
module attributes {stable_mosaic.version = 11 : i64} {
  func.func @conv3x3_relu_pool_kernel(%arg0: i32, %arg1: memref<1x18x18x3xf32, #tpu.memory_space<vmem>>, %arg2: memref<32x64xbf16, #tpu.memory_space<vmem>>, %arg3: memref<1x64xf32, #tpu.memory_space<vmem>>, %arg4: memref<1x8x512xbf16, #tpu.memory_space<vmem>>, %arg5: memref<256x32xbf16, #tpu.memory_space<vmem>>) attributes {dimension_semantics = [#tpu.dimension_semantics<parallel>], iteration_bounds = array<i64: 2>, scalar_prefetch = 0 : i64, scratch_operands = 1 : i64, tpu.core_type = #tpu.core_type<tc>, window_params = [{transform_indices = @transform_0, window_bounds = array<i64: 1, 18, 18, 3>}, {pipeline_mode = #tpu.pipeline_mode<synchronous>, transform_indices = @transform_1, window_bounds = array<i64: 32, 64>}, {pipeline_mode = #tpu.pipeline_mode<synchronous>, transform_indices = @transform_2, window_bounds = array<i64: 1, 64>}, {transform_indices = @transform_3, window_bounds = array<i64: 1, 8, 512>}]} {
    %c0 = arith.constant 0 : index
    %c0_0 = arith.constant 0 : index
    %c0_1 = arith.constant 0 : index
    %c0_2 = arith.constant 0 : index
    %0 = vector.load %arg1[%c0, %c0_0, %c0_1, %c0_2] : memref<1x18x18x3xf32, #tpu.memory_space<vmem>>, vector<1x16x16x3xf32>
    %1 = vector.shape_cast %0 : vector<1x16x16x3xf32> to vector<16x16x3xf32>
    %2 = vector.shape_cast %1 : vector<16x16x3xf32> to vector<256x3xf32>
    %3 = arith.truncf %2 : vector<256x3xf32> to vector<256x3xbf16>
    %c0_3 = arith.constant 0 : index
    %c0_4 = arith.constant 0 : index
    %4 = vector.load %arg5[%c0_3, %c0_4] : memref<256x32xbf16, #tpu.memory_space<vmem>>, vector<256x3xbf16>
    tpu.vector_store %arg5[%c0_3, %c0_4], %3 {strides = array<i32>} : memref<256x32xbf16, #tpu.memory_space<vmem>>, vector<256x3xbf16>,
    %c0_5 = arith.constant 0 : index
    %c0_6 = arith.constant 0 : index
    %c1 = arith.constant 1 : index
    %c0_7 = arith.constant 0 : index
    %5 = vector.load %arg1[%c0_5, %c0_6, %c1, %c0_7] : memref<1x18x18x3xf32, #tpu.memory_space<vmem>>, vector<1x16x16x3xf32>
    %6 = vector.shape_cast %5 : vector<1x16x16x3xf32> to vector<16x16x3xf32>
    %7 = vector.shape_cast %6 : vector<16x16x3xf32> to vector<256x3xf32>
    %8 = arith.truncf %7 : vector<256x3xf32> to vector<256x3xbf16>
    %c0_8 = arith.constant 0 : index
    %c3 = arith.constant 3 : index
    %9 = vector.load %arg5[%c0_8, %c3] : memref<256x32xbf16, #tpu.memory_space<vmem>>, vector<256x3xbf16>
    tpu.vector_store %arg5[%c0_8, %c3], %8 {strides = array<i32>} : memref<256x32xbf16, #tpu.memory_space<vmem>>, vector<256x3xbf16>,
    %c0_9 = arith.constant 0 : index
    %c0_10 = arith.constant 0 : index
    %c2 = arith.constant 2 : index
    %c0_11 = arith.constant 0 : index
    %10 = vector.load %arg1[%c0_9, %c0_10, %c2, %c0_11] : memref<1x18x18x3xf32, #tpu.memory_space<vmem>>, vector<1x16x16x3xf32>
    %11 = vector.shape_cast %10 : vector<1x16x16x3xf32> to vector<16x16x3xf32>
    %12 = vector.shape_cast %11 : vector<16x16x3xf32> to vector<256x3xf32>
    %13 = arith.truncf %12 : vector<256x3xf32> to vector<256x3xbf16>
    %c0_12 = arith.constant 0 : index
    %c6 = arith.constant 6 : index
    %14 = vector.load %arg5[%c0_12, %c6] : memref<256x32xbf16, #tpu.memory_space<vmem>>, vector<256x3xbf16>
    tpu.vector_store %arg5[%c0_12, %c6], %13 {strides = array<i32>} : memref<256x32xbf16, #tpu.memory_space<vmem>>, vector<256x3xbf16>,
    %c0_13 = arith.constant 0 : index
    %c1_14 = arith.constant 1 : index
    %c0_15 = arith.constant 0 : index
    %c0_16 = arith.constant 0 : index
    %15 = vector.load %arg1[%c0_13, %c1_14, %c0_15, %c0_16] : memref<1x18x18x3xf32, #tpu.memory_space<vmem>>, vector<1x16x16x3xf32>
    %16 = vector.shape_cast %15 : vector<1x16x16x3xf32> to vector<16x16x3xf32>
    %17 = vector.shape_cast %16 : vector<16x16x3xf32> to vector<256x3xf32>
    %18 = arith.truncf %17 : vector<256x3xf32> to vector<256x3xbf16>
    %c0_17 = arith.constant 0 : index
    %c9 = arith.constant 9 : index
    %19 = vector.load %arg5[%c0_17, %c9] : memref<256x32xbf16, #tpu.memory_space<vmem>>, vector<256x3xbf16>
    tpu.vector_store %arg5[%c0_17, %c9], %18 {strides = array<i32>} : memref<256x32xbf16, #tpu.memory_space<vmem>>, vector<256x3xbf16>,
    %c0_18 = arith.constant 0 : index
    %c1_19 = arith.constant 1 : index
    %c1_20 = arith.constant 1 : index
    %c0_21 = arith.constant 0 : index
    %20 = vector.load %arg1[%c0_18, %c1_19, %c1_20, %c0_21] : memref<1x18x18x3xf32, #tpu.memory_space<vmem>>, vector<1x16x16x3xf32>
    %21 = vector.shape_cast %20 : vector<1x16x16x3xf32> to vector<16x16x3xf32>
    %22 = vector.shape_cast %21 : vector<16x16x3xf32> to vector<256x3xf32>
    %23 = arith.truncf %22 : vector<256x3xf32> to vector<256x3xbf16>
    %c0_22 = arith.constant 0 : index
    %c12 = arith.constant 12 : index
    %24 = vector.load %arg5[%c0_22, %c12] : memref<256x32xbf16, #tpu.memory_space<vmem>>, vector<256x3xbf16>
    tpu.vector_store %arg5[%c0_22, %c12], %23 {strides = array<i32>} : memref<256x32xbf16, #tpu.memory_space<vmem>>, vector<256x3xbf16>,
    %c0_23 = arith.constant 0 : index
    %c1_24 = arith.constant 1 : index
    %c2_25 = arith.constant 2 : index
    %c0_26 = arith.constant 0 : index
    %25 = vector.load %arg1[%c0_23, %c1_24, %c2_25, %c0_26] : memref<1x18x18x3xf32, #tpu.memory_space<vmem>>, vector<1x16x16x3xf32>
    %26 = vector.shape_cast %25 : vector<1x16x16x3xf32> to vector<16x16x3xf32>
    %27 = vector.shape_cast %26 : vector<16x16x3xf32> to vector<256x3xf32>
    %28 = arith.truncf %27 : vector<256x3xf32> to vector<256x3xbf16>
    %c0_27 = arith.constant 0 : index
    %c15 = arith.constant 15 : index
    %29 = vector.load %arg5[%c0_27, %c15] : memref<256x32xbf16, #tpu.memory_space<vmem>>, vector<256x3xbf16>
    tpu.vector_store %arg5[%c0_27, %c15], %28 {strides = array<i32>} : memref<256x32xbf16, #tpu.memory_space<vmem>>, vector<256x3xbf16>,
    %c0_28 = arith.constant 0 : index
    %c2_29 = arith.constant 2 : index
    %c0_30 = arith.constant 0 : index
    %c0_31 = arith.constant 0 : index
    %30 = vector.load %arg1[%c0_28, %c2_29, %c0_30, %c0_31] : memref<1x18x18x3xf32, #tpu.memory_space<vmem>>, vector<1x16x16x3xf32>
    %31 = vector.shape_cast %30 : vector<1x16x16x3xf32> to vector<16x16x3xf32>
    %32 = vector.shape_cast %31 : vector<16x16x3xf32> to vector<256x3xf32>
    %33 = arith.truncf %32 : vector<256x3xf32> to vector<256x3xbf16>
    %c0_32 = arith.constant 0 : index
    %c18 = arith.constant 18 : index
    %34 = vector.load %arg5[%c0_32, %c18] : memref<256x32xbf16, #tpu.memory_space<vmem>>, vector<256x3xbf16>
    tpu.vector_store %arg5[%c0_32, %c18], %33 {strides = array<i32>} : memref<256x32xbf16, #tpu.memory_space<vmem>>, vector<256x3xbf16>,
    %c0_33 = arith.constant 0 : index
    %c2_34 = arith.constant 2 : index
    %c1_35 = arith.constant 1 : index
    %c0_36 = arith.constant 0 : index
    %35 = vector.load %arg1[%c0_33, %c2_34, %c1_35, %c0_36] : memref<1x18x18x3xf32, #tpu.memory_space<vmem>>, vector<1x16x16x3xf32>
    %36 = vector.shape_cast %35 : vector<1x16x16x3xf32> to vector<16x16x3xf32>
    %37 = vector.shape_cast %36 : vector<16x16x3xf32> to vector<256x3xf32>
    %38 = arith.truncf %37 : vector<256x3xf32> to vector<256x3xbf16>
    %c0_37 = arith.constant 0 : index
    %c21 = arith.constant 21 : index
    %39 = vector.load %arg5[%c0_37, %c21] : memref<256x32xbf16, #tpu.memory_space<vmem>>, vector<256x3xbf16>
    tpu.vector_store %arg5[%c0_37, %c21], %38 {strides = array<i32>} : memref<256x32xbf16, #tpu.memory_space<vmem>>, vector<256x3xbf16>,
    %c0_38 = arith.constant 0 : index
    %c2_39 = arith.constant 2 : index
    %c2_40 = arith.constant 2 : index
    %c0_41 = arith.constant 0 : index
    %40 = vector.load %arg1[%c0_38, %c2_39, %c2_40, %c0_41] : memref<1x18x18x3xf32, #tpu.memory_space<vmem>>, vector<1x16x16x3xf32>
    %41 = vector.shape_cast %40 : vector<1x16x16x3xf32> to vector<16x16x3xf32>
    %42 = vector.shape_cast %41 : vector<16x16x3xf32> to vector<256x3xf32>
    %43 = arith.truncf %42 : vector<256x3xf32> to vector<256x3xbf16>
    %c0_42 = arith.constant 0 : index
    %c24 = arith.constant 24 : index
    %44 = vector.load %arg5[%c0_42, %c24] : memref<256x32xbf16, #tpu.memory_space<vmem>>, vector<256x3xbf16>
    tpu.vector_store %arg5[%c0_42, %c24], %43 {strides = array<i32>} : memref<256x32xbf16, #tpu.memory_space<vmem>>, vector<256x3xbf16>,
    %cst = arith.constant 0.000000e+00 : bf16
    %45 = vector.broadcast %cst : bf16 to vector<256x5xbf16>
    %c0_43 = arith.constant 0 : index
    %c27 = arith.constant 27 : index
    %46 = vector.load %arg5[%c0_43, %c27] : memref<256x32xbf16, #tpu.memory_space<vmem>>, vector<256x5xbf16>
    tpu.vector_store %arg5[%c0_43, %c27], %45 {strides = array<i32>} : memref<256x32xbf16, #tpu.memory_space<vmem>>, vector<256x5xbf16>,
    %c0_44 = arith.constant 0 : index
    %c0_45 = arith.constant 0 : index
    %47 = vector.load %arg5[%c0_44, %c0_45] : memref<256x32xbf16, #tpu.memory_space<vmem>>, vector<256x32xbf16>
    %c0_46 = arith.constant 0 : index
    %c0_47 = arith.constant 0 : index
    %48 = vector.load %arg2[%c0_46, %c0_47] : memref<32x64xbf16, #tpu.memory_space<vmem>>, vector<32x64xbf16>
    %cst_48 = arith.constant dense<0.000000e+00> : vector<256x64xf32>
    %49 = tpu.matmul %47, %48, %cst_48 {dimension_numbers = #tpu.dot_dimension_numbers<[1], [0], [0], [1], [0, 0, 1, 1], [], []>} : vector<256x32xbf16>, vector<32x64xbf16>, vector<256x64xf32> -> vector<256x64xf32>
    %c0_49 = arith.constant 0 : index
    %c0_50 = arith.constant 0 : index
    %50 = vector.load %arg3[%c0_49, %c0_50] : memref<1x64xf32, #tpu.memory_space<vmem>>, vector<1x64xf32>
    %51 = vector.broadcast %50 : vector<1x64xf32> to vector<256x64xf32>
    %52 = arith.addf %49, %51 : vector<256x64xf32>
    %cst_51 = arith.constant 0.000000e+00 : f32
    %53 = vector.broadcast %cst_51 : f32 to vector<256x64xf32>
    %54 = arith.maximumf %52, %53 : vector<256x64xf32>
    %55 = vector.shape_cast %54 : vector<256x64xf32> to vector<8x2x16x64xf32>
    %cst_52 = arith.constant dense<0xFF800000> : vector<8x16x64xf32>
    %56 = vector.multi_reduction <maximumf>, %55, %cst_52 [1] : vector<8x2x16x64xf32> to vector<8x16x64xf32>
    %57 = vector.shape_cast %56 : vector<8x16x64xf32> to vector<8x8x2x64xf32>
    %cst_53 = arith.constant dense<0xFF800000> : vector<8x8x64xf32>
    %58 = vector.multi_reduction <maximumf>, %57, %cst_53 [2] : vector<8x8x2x64xf32> to vector<8x8x64xf32>
    %59 = vector.shape_cast %58 : vector<8x8x64xf32> to vector<8x512xf32>
    %60 = arith.truncf %59 : vector<8x512xf32> to vector<8x512xbf16>
    %c0_54 = arith.constant 0 : index
    %c0_55 = arith.constant 0 : index
    %c0_56 = arith.constant 0 : index
    %61 = vector.load %arg4[%c0_54, %c0_55, %c0_56] : memref<1x8x512xbf16, #tpu.memory_space<vmem>>, vector<1x8x512xbf16>
    %62 = vector.shape_cast %61 : vector<1x8x512xbf16> to vector<8x512xbf16>
    %63 = vector.shape_cast %60 : vector<8x512xbf16> to vector<1x8x512xbf16>
    tpu.vector_store %arg4[%c0_54, %c0_55, %c0_56], %63 {strides = array<i32>} : memref<1x8x512xbf16, #tpu.memory_space<vmem>>, vector<1x8x512xbf16>,
    return
  }
  func.func @transform_0(%arg0: i32) -> (i32, i32, i32, i32) {
    %c0_i32 = arith.constant 0 : i32
    %c0_i32_0 = arith.constant 0 : i32
    %c0_i32_1 = arith.constant 0 : i32
    %c0_i32_2 = arith.constant 0 : i32
    return %arg0, %c0_i32, %c0_i32_0, %c0_i32_1 : i32, i32, i32, i32
  }
  func.func @transform_1(%arg0: i32) -> (i32, i32) {
    %c0_i32 = arith.constant 0 : i32
    %c0_i32_0 = arith.constant 0 : i32
    %c0_i32_1 = arith.constant 0 : i32
    return %c0_i32, %c0_i32_0 : i32, i32
  }
  func.func @transform_2(%arg0: i32) -> (i32, i32) {
    %c0_i32 = arith.constant 0 : i32
    %c0_i32_0 = arith.constant 0 : i32
    %c0_i32_1 = arith.constant 0 : i32
    return %c0_i32, %c0_i32_0 : i32, i32
  }
  func.func @transform_3(%arg0: i32) -> (i32, i32, i32) {
    %c0_i32 = arith.constant 0 : i32
    %c0_i32_0 = arith.constant 0 : i32
    %c0_i32_1 = arith.constant 0 : i32
    return %arg0, %c0_i32, %c0_i32_0 : i32, i32, i32
  }
}

module attributes {stable_mosaic.version = 11 : i64} {
  func.func @fc1_relu_fc2_kernel(%arg0: i32, %arg1: i32, %arg2: memref<2x1024xbf16, #tpu.memory_space<vmem>>, %arg3: memref<1024x32xbf16, #tpu.memory_space<vmem>>, %arg4: memref<1x32xf32, #tpu.memory_space<vmem>>, %arg5: memref<32x10xbf16, #tpu.memory_space<vmem>>, %arg6: memref<1x2x10xf32, #tpu.memory_space<vmem>>, %arg7: memref<2x32xf32, #tpu.memory_space<vmem>>) attributes {dimension_semantics = [#tpu.dimension_semantics<parallel>, #tpu.dimension_semantics<arbitrary>], iteration_bounds = array<i64: 1, 4>, scalar_prefetch = 0 : i64, scratch_operands = 1 : i64, tpu.core_type = #tpu.core_type<tc>, window_params = [{transform_indices = @transform_0, window_bounds = array<i64: 2, 1024>}, {transform_indices = @transform_1, window_bounds = array<i64: 1024, 32>}, {transform_indices = @transform_2, window_bounds = array<i64: 1, 32>}, {transform_indices = @transform_3, window_bounds = array<i64: 32, 10>}, {transform_indices = @transform_4, window_bounds = array<i64: 1, 2, 10>}]} {
    %c0_i32 = arith.constant 0 : i32
    %0 = arith.cmpi eq, %arg1, %c0_i32 : i32
    %1 = arith.extui %0 : i1 to i32
    %c0_i32_0 = arith.constant 0 : i32
    %2 = arith.cmpi ne, %1, %c0_i32_0 : i32
    scf.if %2 {
      %cst_9 = arith.constant 0.000000e+00 : f32
      %12 = vector.broadcast %cst_9 : f32 to vector<2x32xf32>
      %c0_10 = arith.constant 0 : index
      %c0_11 = arith.constant 0 : index
      %13 = vector.load %arg7[%c0_10, %c0_11] : memref<2x32xf32, #tpu.memory_space<vmem>>, vector<2x32xf32>
      tpu.vector_store %arg7[%c0_10, %c0_11], %12 {strides = array<i32>} : memref<2x32xf32, #tpu.memory_space<vmem>>, vector<2x32xf32>,
    } else {
    }
    %c0 = arith.constant 0 : index
    %c0_1 = arith.constant 0 : index
    %3 = vector.load %arg7[%c0, %c0_1] : memref<2x32xf32, #tpu.memory_space<vmem>>, vector<2x32xf32>
    %c0_2 = arith.constant 0 : index
    %c0_3 = arith.constant 0 : index
    %4 = vector.load %arg2[%c0_2, %c0_3] : memref<2x1024xbf16, #tpu.memory_space<vmem>>, vector<2x1024xbf16>
    %c0_4 = arith.constant 0 : index
    %c0_5 = arith.constant 0 : index
    %5 = vector.load %arg3[%c0_4, %c0_5] : memref<1024x32xbf16, #tpu.memory_space<vmem>>, vector<1024x32xbf16>
    %cst = arith.constant dense<0.000000e+00> : vector<2x32xf32>
    %6 = tpu.matmul %4, %5, %cst {dimension_numbers = #tpu.dot_dimension_numbers<[1], [0], [0], [1], [0, 0, 1, 1], [], []>} : vector<2x1024xbf16>, vector<1024x32xbf16>, vector<2x32xf32> -> vector<2x32xf32>
    %7 = arith.addf %3, %6 : vector<2x32xf32>
    %c0_6 = arith.constant 0 : index
    %c0_7 = arith.constant 0 : index
    %8 = vector.load %arg7[%c0_6, %c0_7] : memref<2x32xf32, #tpu.memory_space<vmem>>, vector<2x32xf32>
    tpu.vector_store %arg7[%c0_6, %c0_7], %7 {strides = array<i32>} : memref<2x32xf32, #tpu.memory_space<vmem>>, vector<2x32xf32>,
    %c3_i32 = arith.constant 3 : i32
    %9 = arith.cmpi eq, %arg1, %c3_i32 : i32
    %10 = arith.extui %9 : i1 to i32
    %c0_i32_8 = arith.constant 0 : i32
    %11 = arith.cmpi ne, %10, %c0_i32_8 : i32
    scf.if %11 {
      %c0_9 = arith.constant 0 : index
      %c0_10 = arith.constant 0 : index
      %12 = vector.load %arg7[%c0_9, %c0_10] : memref<2x32xf32, #tpu.memory_space<vmem>>, vector<2x32xf32>
      %c0_11 = arith.constant 0 : index
      %c0_12 = arith.constant 0 : index
      %13 = vector.load %arg4[%c0_11, %c0_12] : memref<1x32xf32, #tpu.memory_space<vmem>>, vector<1x32xf32>
      %14 = vector.broadcast %13 : vector<1x32xf32> to vector<2x32xf32>
      %15 = arith.addf %12, %14 : vector<2x32xf32>
      %cst_13 = arith.constant 0.000000e+00 : f32
      %16 = vector.broadcast %cst_13 : f32 to vector<2x32xf32>
      %17 = arith.maximumf %15, %16 : vector<2x32xf32>
      %18 = arith.truncf %17 : vector<2x32xf32> to vector<2x32xbf16>
      %c0_14 = arith.constant 0 : index
      %c0_15 = arith.constant 0 : index
      %19 = vector.load %arg5[%c0_14, %c0_15] : memref<32x10xbf16, #tpu.memory_space<vmem>>, vector<32x10xbf16>
      %cst_16 = arith.constant dense<0.000000e+00> : vector<2x10xf32>
      %20 = tpu.matmul %18, %19, %cst_16 {dimension_numbers = #tpu.dot_dimension_numbers<[1], [0], [0], [1], [0, 0, 1, 1], [], []>} : vector<2x32xbf16>, vector<32x10xbf16>, vector<2x10xf32> -> vector<2x10xf32>
      %c0_17 = arith.constant 0 : index
      %c0_18 = arith.constant 0 : index
      %c0_19 = arith.constant 0 : index
      %21 = vector.load %arg6[%c0_17, %c0_18, %c0_19] : memref<1x2x10xf32, #tpu.memory_space<vmem>>, vector<1x2x10xf32>
      %22 = vector.shape_cast %21 : vector<1x2x10xf32> to vector<2x10xf32>
      %23 = vector.shape_cast %20 : vector<2x10xf32> to vector<1x2x10xf32>
      tpu.vector_store %arg6[%c0_17, %c0_18, %c0_19], %23 {strides = array<i32>} : memref<1x2x10xf32, #tpu.memory_space<vmem>>, vector<1x2x10xf32>,
    } else {
    }
    return
  }
  func.func @transform_0(%arg0: i32, %arg1: i32) -> (i32, i32) {
    %c0_i32 = arith.constant 0 : i32
    %c0_i32_0 = arith.constant 0 : i32
    return %c0_i32, %arg1 : i32, i32
  }
  func.func @transform_1(%arg0: i32, %arg1: i32) -> (i32, i32) {
    %c0_i32 = arith.constant 0 : i32
    return %arg1, %arg0 : i32, i32
  }
  func.func @transform_2(%arg0: i32, %arg1: i32) -> (i32, i32) {
    %c0_i32 = arith.constant 0 : i32
    %c0_i32_0 = arith.constant 0 : i32
    return %c0_i32, %arg0 : i32, i32
  }
  func.func @transform_3(%arg0: i32, %arg1: i32) -> (i32, i32) {
    %c0_i32 = arith.constant 0 : i32
    %c0_i32_0 = arith.constant 0 : i32
    return %arg0, %c0_i32 : i32, i32
  }
  func.func @transform_4(%arg0: i32, %arg1: i32) -> (i32, i32, i32) {
    %c0_i32 = arith.constant 0 : i32
    %c0_i32_0 = arith.constant 0 : i32
    %c0_i32_1 = arith.constant 0 : i32
    return %arg0, %c0_i32, %c0_i32_0 : i32, i32, i32
  }
}

</mosaic_0001>

<bundles_post_ra>
// kernel: simple_model_forward.3
= control target key start
LH: loop header
LB: loop body
LE: loop exit
PB: predicated region body
PF: predicated region fallthrough
CT: control target
= control target key end

     0   :  { %s1522_s15 = smov 0   ;;  %s1524_s16 = smov 0   ;;  %s1660_s0 = inlined_call_operand.vmem [shape: bf16[2,4096], index: 0, kind: input, shape index: {}]   ;;  %s1661_s1 = inlined_call_operand.vmem [shape: bf16[4096,32], index: 1, kind: input, shape index: {}]   ;;  %s1662_s2 = inlined_call_operand.vmem [shape: f32[1,32], index: 2, kind: input, shape index: {}]   ;;  %s1663_s3 = inlined_call_operand.vmem [shape: bf16[32,10], index: 3, kind: input, shape index: {}]   ;;  %s1664_s4 = inlined_call_operand.vmem [shape: f32[1,2,10], index: 4, kind: output, shape index: {}]  }
   0x1   :  { %s1526_s17 = smov 0  }
   0x2 LB: > { %s23_s18 = sadd.s32 1, %s1487_s16  ;;  %p1198_p0 = scmp.ge.s32.totalorder %s1491_s17, 1  ;;  %s1491_s17 = sphi %s1526_s17, %s14_s17   ;;  %s1487_s16 = sphi %s1524_s16, %s1666_s16   ;;  %s1483_s15 = sphi %s1522_s15, %s1665_s15  }
   0x3   : > { %p24_p1 = scmp.ge.s32.totalorder %s23_s18, 4  ;;  %p209_p2 = scmp.lt.s32.totalorder %s1491_s17, 5 }
   0x5   : > { %s1668_s18 = smov (%p24_p1, %s23_s18), 0  ;;  %p210_p3 = pnand %p1198_p0, %p209_p2 }
   0x6   : > { %s1199_s19 = sshll.u32 (!%p210_p3), %s1483_s15, 3  ;;  %s1200_s20 = sshll.u32 (!%p210_p3), %s1483_s15, 7 }
   0x7   : > { %213 = sbr.rel (%p210_p3) target bundleno = 539 (0x21b), region = 36  ;;  %p250_p4 = scmp.lt.s32.totalorder (!%p210_p3), %s1199_s19, 31 }
   0x8   : > { %p255_p5 = scmp.lt.s32.totalorder (!%p210_p3), %s1200_s20, 511  ;;  %p1202_p6 = scmp.ne.s32.totalorder (!%p210_p3), %s1483_s15, 0 }
   0xe   : > { %s1670_s19 = smov (!%p250_p4, %s1199_s19), 31  ;;  %s1672_s20 = smov (!%p255_p5, %s1200_s20), 511 }
   0xf   : > { %s252_s23 = scalar_lea.vmem %s1660_s0, %s1670_s19  ;;  %s1201_s24 = sshll.u32 %s1672_s20, 2  ;;  %vm281_vm0 = vcmask (!%p1202_p6), 254976   ;;  %v1493_v0 = vmov (!%p1202_p6), 0.0  }
  0x10   : > { %s1553_s27 = scalar_lea.vmem %s1661_s1, %s1201_s24  ;;  %280 = sbr.rel (%p1202_p6) target bundleno = 23 (0x17), region = 40  ;;  %282 = vst.msk [vmem:[#allocation2] sm:$0x3] (!%p1202_p6), %vm281_vm0, %v1493_v0 }
  0x17 PF: > { %v1402_v1 = vld [vmem:[%s1553_s27 + $0x40] sm:$0xff]   ;;  %v1406_v5 = vld [vmem:[%s1553_s27 + $0x48] sm:$0xff]   ;;  %v1410_v9 = vld [vmem:[%s1553_s27 + $0x50] sm:$0xff]   ;;  %v418_v29 = vlaneseq  ;;  %v1494_v37 = vmov 1966171168   ;;  %vm1016_vm1 = vcmask 254976  }
  0x18   : > { %v1403_v2 = vld [vmem:[%s1553_s27 + $0xc0] sm:$0xff]   ;;  %1275 = vmatprep.subr.bf16.mxu0 %v1402_v1  ;;  %v1407_v6 = vld [vmem:[%s1553_s27 + $0xc8] sm:$0xff]   ;;  %v1411_v10 = vld [vmem:[%s1553_s27 + $0xd0] sm:$0xff]   ;;  %v416_v38 = vunpack.c.l.s4 %v1494_v37  ;;  %p1267_p7 = scmp.ne.s32.totalorder %s1483_s15, 3 }
  0x19   : > { %v1404_v3 = vld [vmem:[%s1553_s27] sm:$0xff]   ;;  %1297 = vmatprep.subr.bf16.mxu1 %v1403_v2  ;;  %v1408_v7 = vld [vmem:[%s1553_s27 + $0x8] sm:$0xff]   ;;  %v1412_v11 = vld [vmem:[%s1553_s27 + $0x10] sm:$0xff]   ;;  %v419_v34 = vshrl.u32 %v418_v29, 7  ;;  %vm1496_vm2 = vmmov (!%p1267_p7), 0   ;;  %vm1049_vm3 = vcmask (!%p1267_p7), 261120  }
  0x1a   : > { %v1405_v4 = vld [vmem:[%s1553_s27 + $0x80] sm:$0xff]   ;;  %1276 = vmatpush3.bf16.msra.mxu0 %v1404_v3  ;;  %v1409_v8 = vld [vmem:[%s1553_s27 + $0x88] sm:$0xff]   ;;  %v1413_v12 = vld [vmem:[%s1553_s27 + $0x90] sm:$0xff]   ;;  %v417_v41 = vunpack.c.0.s8 %v416_v38  ;;  %vm1093_vm4 = vcmask (!%p1267_p7), 74752  }
  0x1b   : > { %1298 = vmatpush3.bf16.msra.mxu1 %v1405_v4  ;;  %1277 = vmatprep.subr.bf16.mxu0 %v1406_v5  ;;  %v1414_v13 = vld [vmem:[%s1553_s27 + $0x58] sm:$0xff]   ;;  %v1418_v17 = vld [vmem:[%s1553_s27 + $0x60] sm:$0xff]   ;;  %v1422_v21 = vld [vmem:[%s1553_s27 + $0x68] sm:$0xff]  }
  0x1c   : > { %1299 = vmatprep.subr.bf16.mxu1 %v1407_v6  ;;  %v1415_v14 = vld [vmem:[%s1553_s27 + $0xd8] sm:$0xff]   ;;  %v1419_v18 = vld [vmem:[%s1553_s27 + $0xe0] sm:$0xff]   ;;  %v1423_v22 = vld [vmem:[%s1553_s27 + $0xe8] sm:$0xff]   ;;  %v1595_v42 = vsub.s32 %v417_v41, %v419_v34 }
  0x1d   : > { %v1416_v15 = vld [vmem:[%s1553_s27 + $0x18] sm:$0xff]   ;;  %v1420_v19 = vld [vmem:[%s1553_s27 + $0x20] sm:$0xff]   ;;  %v1424_v23 = vld [vmem:[%s1553_s27 + $0x28] sm:$0xff]  }
  0x1e   : > { %1278 = vmatpush3.bf16.msra.mxu0 %v1408_v7  ;;  %v1417_v16 = vld [vmem:[%s1553_s27 + $0x98] sm:$0xff]   ;;  %v1421_v20 = vld [vmem:[%s1553_s27 + $0xa0] sm:$0xff]   ;;  %v1425_v24 = vld [vmem:[%s1553_s27 + $0xa8] sm:$0xff]  }
  0x1f   : > { %1300 = vmatpush3.bf16.msra.mxu1 %v1409_v8  ;;  %1279 = vmatprep.subr.bf16.mxu0 %v1410_v9  ;;  %v1426_v25 = vld [vmem:[%s1553_s27 + $0x70] sm:$0xff]   ;;  %v1430_v30 = vld [vmem:[%s1553_s27 + $0x78] sm:$0xff]   ;;  %v284_v35 = vld [vmem:[%s252_s23] sm:$0xff] }
  0x20   : > { %1301 = vmatprep.subr.bf16.mxu1 %v1411_v10  ;;  %v1427_v26 = vld [vmem:[%s1553_s27 + $0xf0] sm:$0xff]   ;;  %v1431_v31 = vld [vmem:[%s1553_s27 + $0xf8] sm:$0xff]   ;;  %v1435_v36 = vld [vmem:[%s1553_s27 + $0x140] sm:$0xff]   ;;  %v414_v40 = vcombine.high %v284_v35, %v284_v35  ;;  %v421_v43 = vrot.slane %v284_v35, %v1595_v42 }
  0x21   : > { %v1428_v27 = vld [vmem:[%s1553_s27 + $0x30] sm:$0xff]   ;;  %v1432_v32 = vld [vmem:[%s1553_s27 + $0x38] sm:$0xff]   ;;  %v1436_v39 = vld [vmem:[%s1553_s27 + $0x1c0] sm:$0xff]  }
  0x22   : > { %1280 = vmatpush3.bf16.msra.mxu0 %v1412_v11  ;;  %v1429_v28 = vld [vmem:[%s1553_s27 + $0xb0] sm:$0xff]   ;;  %v1433_v33 = vld [vmem:[%s1553_s27 + $0xb8] sm:$0xff]   ;;  %v1599_v44 = vrot.slane %v414_v40, %v1595_v42  ;;  %v429_v45 = vcombine.high %v421_v43, %v421_v43  ;;  %v437_v46 = vrot.slane %v421_v43, %v1595_v42  ;;  %v1437_v49 = vld [vmem:[%s1553_s27 + $0x100] sm:$0xff]  }
  0x23   : > { %1302 = vmatpush3.bf16.msra.mxu1 %v1413_v12  ;;  %1281 = vmatprep.subr.bf16.mxu0 %v1414_v13  ;;  %v1439_v52 = vld [vmem:[%s1553_s27 + $0x148] sm:$0xff]   ;;  %v1438_v54 = vld [vmem:[%s1553_s27 + $0x180] sm:$0xff]   ;;  %v1443_v58 = vld [vmem:[%s1553_s27 + $0x150] sm:$0xff]  }
  0x24   : > { %1303 = vmatprep.subr.bf16.mxu1 %v1415_v14  ;;  %v430_v47 = vcombine.high %v1599_v44, %v1599_v44  ;;  %v451_v48 = vrot.slane %v429_v45, %v1595_v42  ;;  %v459_v51 = vcombine.high %v437_v46, %v437_v46  ;;  %v1440_v55 = vld [vmem:[%s1553_s27 + $0x1c8] sm:$0xff]   ;;  %v1444_v60 = vld [vmem:[%s1553_s27 + $0x1d0] sm:$0xff]   ;;  %v1447_v62 = vld [vmem:[%s1553_s27 + $0x158] sm:$0xff]  }
  0x25   : > { %v1441_v57 = vld [vmem:[%s1553_s27 + $0x108] sm:$0xff]   ;;  %v1445_v61 = vld [vmem:[%s1553_s27 + $0x110] sm:$0xff]   ;;  %v1448_v0 = vld [vmem:[%s1553_s27 + $0x1d8] sm:$0xff]  }
  0x26   : > { %1282 = vmatpush3.bf16.msra.mxu0 %v1416_v15  ;;  %v458_v50 = vrot.slane %v430_v47, %v1595_v42  ;;  %887 = vmatprep.mubr.bf16.mxu0 %v451_v48  ;;  %v461_v53 = vcombine.high %v451_v48, %v451_v48  ;;  %v1442_v59 = vld [vmem:[%s1553_s27 + $0x188] sm:$0xff]   ;;  %v1446_v63 = vld [vmem:[%s1553_s27 + $0x190] sm:$0xff]   ;;  %v1449_v1 = vld [vmem:[%s1553_s27 + $0x118] sm:$0xff]   ;;  %v1495_v47 = vmov (!%p1267_p7), 0.0  }
  0x27   : > { %1304 = vmatpush3.bf16.msra.mxu1 %v1417_v16  ;;  %1283 = vmatprep.subr.bf16.mxu0 %v1418_v17  ;;  %v1451_v2 = vld [vmem:[%s1553_s27 + $0x160] sm:$0xff]   ;;  %v1450_v3 = vld [vmem:[%s1553_s27 + $0x198] sm:$0xff]   ;;  %v1455_v6 = vld [vmem:[%s1553_s27 + $0x168] sm:$0xff]  }
  0x28   : > { %1305 = vmatprep.subr.bf16.mxu1 %v1419_v18  ;;  %v462_v56 = vcombine.high %v458_v50, %v458_v50  ;;  %927 = vmatprep.mubr.bf16.mxu1 %v461_v53  ;;  %v1452_v4 = vld [vmem:[%s1553_s27 + $0x1e0] sm:$0xff]   ;;  %v1456_v8 = vld [vmem:[%s1553_s27 + $0x1e8] sm:$0xff]   ;;  %v1459_v10 = vld [vmem:[%s1553_s27 + $0x170] sm:$0xff]   ;;  %v444_v18 = vrot.slane %v1599_v44, %v1595_v42 }
  0x29   : > { %v1453_v5 = vld [vmem:[%s1553_s27 + $0x120] sm:$0xff]   ;;  %v1457_v9 = vld [vmem:[%s1553_s27 + $0x128] sm:$0xff]   ;;  %v1460_v12 = vld [vmem:[%s1553_s27 + $0x1f0] sm:$0xff]  }
  0x2a   : > { %1284 = vmatpush3.bf16.msra.mxu0 %v1420_v19  ;;  %v1454_v7 = vld [vmem:[%s1553_s27 + $0x1a0] sm:$0xff]   ;;  %v1458_v11 = vld [vmem:[%s1553_s27 + $0x1a8] sm:$0xff]   ;;  %v1461_v13 = vld [vmem:[%s1553_s27 + $0x130] sm:$0xff]  }
  0x2b   : > { %1306 = vmatpush3.bf16.msra.mxu1 %v1421_v20  ;;  %1285 = vmatprep.subr.bf16.mxu0 %v1422_v21  ;;  %v1463_v14 = vld [vmem:[%s1553_s27 + $0x178] sm:$0xff]   ;;  %v1462_v15 = vld [vmem:[%s1553_s27 + $0x1b0] sm:$0xff]   ;;  %v460_v20 = vcombine.high %v444_v18, %v444_v18  ;;  %v283_v42 = vld [vmem:[#allocation2] sm:$0x3] }
  0x2c   : > { %1307 = vmatprep.subr.bf16.mxu1 %v1423_v22  ;;  %v1464_v16 = vld [vmem:[%s1553_s27 + $0x1f8] sm:$0xff]   ;;  %v1468_v48 = vld [vmem:[%s1663_s3 + $0x8] sm:$0xff] (!%p1267_p7)  }
  0x2d   : > { %v1465_v17 = vld [vmem:[%s1553_s27 + $0x138] sm:$0xff]  }
  0x2e   : > { %1286 = vmatpush3.bf16.msra.mxu0 %v1424_v23  ;;  %v1466_v19 = vld [vmem:[%s1553_s27 + $0x1b8] sm:$0xff]  }
  0x2f   : > { %1308 = vmatpush3.bf16.msra.mxu1 %v1425_v24  ;;  %1287 = vmatprep.subr.bf16.mxu0 %v1426_v25 }
  0x30   : > { %1309 = vmatprep.subr.bf16.mxu1 %v1427_v26 }
  0x32   : > { %1288 = vmatpush3.bf16.msra.mxu0 %v1428_v27 }
  0x33   : > { %1310 = vmatpush3.bf16.msra.mxu1 %v1429_v28  ;;  %1289 = vmatprep.subr.bf16.mxu0 %v1430_v30 }
  0x34   : > { %1311 = vmatprep.subr.bf16.mxu1 %v1431_v31 }
  0x36   : > { %1290 = vmatpush3.bf16.msra.mxu0 %v1432_v32 }
  0x37   : > { %1312 = vmatpush3.bf16.msra.mxu1 %v1433_v33  ;;  %1319 = vmatprep.subr.bf16.mxu0 %v1435_v36 }
  0x38   : > { %1341 = vmatprep.subr.bf16.mxu1 %v1436_v39 }
  0x39   : > { %888 = vmatmul.mubr.bf16.vlgmr.msra.gmra.mrb[0].mxu0 %v437_v46  ;;  %v1467_v46 = vld [vmem:[%s1663_s3] sm:$0xff] (!%p1267_p7)  }
  0x3a   : > { %1320 = vmatpush3.bf16.msra.mxu0 %v1437_v49  ;;  %928 = vmatmul.mubr.bf16.vlgmr.msra.gmra.mrb[0].mxu1 %v459_v51 }
  0x3b   : > { %1321 = vmatprep.subr.bf16.mxu0 %v1439_v52  ;;  %1342 = vmatpush3.bf16.msra.mxu1 %v1438_v54 }
  0x3c   : > { %967 = vmatprep.mubr.bf16.mxu0 %v458_v50  ;;  %1343 = vmatprep.subr.bf16.mxu1 %v1440_v55  ;;  %v1268_v50 = vld [vmem:[%s1662_s2] ss:$0 sm:$0xff] (!%p1267_p7) }
  0x3d   : > { %1007 = vmatprep.mubr.bf16.mxu1 %v462_v56 }
  0x3e   : > { %1322 = vmatpush3.bf16.msra.mxu0 %v1441_v57 }
  0x3f   : > { %1323 = vmatprep.subr.bf16.mxu0 %v1443_v58  ;;  %1344 = vmatpush3.bf16.msra.mxu1 %v1442_v59 }
  0x40   : > { %1345 = vmatprep.subr.bf16.mxu1 %v1444_v60 }
  0x42   : > { %1324 = vmatpush3.bf16.msra.mxu0 %v1445_v61 }
  0x43   : > { %1325 = vmatprep.subr.bf16.mxu0 %v1447_v62  ;;  %1346 = vmatpush3.bf16.msra.mxu1 %v1446_v63 }
  0x44   : > { %1347 = vmatprep.subr.bf16.mxu1 %v1448_v0 }
  0x46   : > { %1326 = vmatpush3.bf16.msra.mxu0 %v1449_v1 }
  0x47   : > { %1327 = vmatprep.subr.bf16.mxu0 %v1451_v2  ;;  %1348 = vmatpush3.bf16.msra.mxu1 %v1450_v3 }
  0x48   : > { %1349 = vmatprep.subr.bf16.mxu1 %v1452_v4 }
  0x4a   : > { %1328 = vmatpush3.bf16.msra.mxu0 %v1453_v5 }
  0x4b   : > { %1329 = vmatprep.subr.bf16.mxu0 %v1455_v6  ;;  %1350 = vmatpush3.bf16.msra.mxu1 %v1454_v7 }
  0x4c   : > { %1351 = vmatprep.subr.bf16.mxu1 %v1456_v8 }
  0x4e   : > { %1330 = vmatpush3.bf16.msra.mxu0 %v1457_v9 }
  0x4f   : > { %1331 = vmatprep.subr.bf16.mxu0 %v1459_v10  ;;  %1352 = vmatpush3.bf16.msra.mxu1 %v1458_v11 }
  0x50   : > { %1353 = vmatprep.subr.bf16.mxu1 %v1460_v12 }
  0x52   : > { %1332 = vmatpush3.bf16.msra.mxu0 %v1461_v13 }
  0x53   : > { %1333 = vmatprep.subr.bf16.mxu0 %v1463_v14  ;;  %1354 = vmatpush3.bf16.msra.mxu1 %v1462_v15 }
  0x54   : > { %1355 = vmatprep.subr.bf16.mxu1 %v1464_v16 }
  0x56   : > { %1334 = vmatpush3.bf16.msra.mxu0 %v1465_v17 }
  0x57   : > { %1356 = vmatpush3.bf16.msra.mxu1 %v1466_v19  ;;  %1366 = vmatprep.subr.bf16.mxu0 (!%p1267_p7), %v1495_v47 }
  0x59   : > { %968 = vmatmul.mubr.bf16.vlgmr.msra.gmra.mrb[4].mxu0 %v444_v18 }
  0x5a   : > { %1008 = vmatmul.mubr.bf16.vlgmr.msra.gmra.mrb[4].mxu1 %v460_v20  ;;  %1367 = vmatpush3.bf16.msra.mxu0 (!%p1267_p7), %v1467_v46 }
  0x5b   : > { %1370 = vmatprep.mubr.msk.bf16.mxu0 (!%p1267_p7), %vm1496_vm2, %v1495_v47  ;;  %1368 = vmatprep.subr.bf16.mxu0 (!%p1267_p7), %v1495_v47 }
  0x5e   : > { %1369 = vmatpush3.bf16.msra.mxu0 (!%p1267_p7), %v1468_v48 }
 0x10c   : > { %v1291_v21 = vpop.f32.mrb[0].mxu0 }
 0x10d   : > { %v1292_v22 = vpop.f32.mrb[1].mxu0  ;;  %v1313_v23 = vpop.f32.mrb[0].mxu1 }
 0x10e   : > { %v1293_v24 = vadd.f32 %v1292_v22, %v1291_v21  ;;  %v1294_v25 = vpop.f32.mrb[2].mxu0  ;;  %v1314_v26 = vpop.f32.mrb[1].mxu1 }
 0x10f   : > { %v1295_v27 = vpop.f32.mrb[3].mxu0  ;;  %v1315_v28 = vadd.f32 %v1314_v26, %v1313_v23  ;;  %v1316_v29 = vpop.f32.mrb[2].mxu1 }
 0x110   : > { %v1317_v30 = vpop.f32.mrb[3].mxu1 }
 0x111   : > { %v930_v31 = vadd.f32 %v1315_v28, %v1293_v24 }
 0x12c   : > { %v1335_v32 = vpop.f32.mrb[4].mxu0 }
 0x12d   : > { %v1336_v33 = vpop.f32.mrb[5].mxu0  ;;  %v1357_v34 = vpop.f32.mrb[4].mxu1 }
 0x12e   : > { %v1337_v35 = vadd.f32 %v1336_v33, %v1335_v32  ;;  %v1338_v36 = vpop.f32.mrb[6].mxu0  ;;  %v1358_v37 = vpop.f32.mrb[5].mxu1 }
 0x12f   : > { %v1339_v38 = vpop.f32.mrb[7].mxu0  ;;  %v1359_v40 = vadd.f32 %v1358_v37, %v1357_v34  ;;  %v1360_v41 = vpop.f32.mrb[6].mxu1 }
 0x130   : > { %v970_v39 = vadd.f32 %v1337_v35, %v930_v31  ;;  %v1361_v43 = vpop.f32.mrb[7].mxu1  ;;  %1021 = sbr.rel (%p1267_p7) target bundleno = 539 (0x21b), region = 44 }
 0x132   : > { %v1010_v44 = vadd.f32 %v1359_v40, %v970_v39 }
 0x134   : > { %v1015_v45 = vadd.f32 %v1010_v44, %v283_v42 }
 0x136   : > { %1017 = vst.msk [vmem:[#allocation2] sm:$0x3] %vm1016_vm1, %v1015_v45 }
 0x13d   : > { %v1022_v49 = vld [vmem:[#allocation2] sm:$0x3] }
 0x13e   : > { %v1030_v51 = vadd.f32 %v1268_v50, %v1022_v49 }
 0x140   : > { %v1031_v52 = vmax.f32 %v1030_v51, 0.0 }
 0x142   : > { %v1032_v53 = vpack.c.bf16 %v1031_v52, %v1031_v52 }
 0x144   : > { %1371 = vmatmul.mubr.msk.bf16.vlgmr.msra.gmra.mrb[0].mxu0 %vm1049_vm3, %v1032_v53 }
 0x217   : > { %v1087_v54 = vpop.f32.mrb[0].mxu0 }
 0x218   : > { %1094 = vst.msk [vmem:[%s1664_s4] sm:$0x3] %vm1093_vm4, %v1087_v54  ;;  %v1372_v55 = vpop.f32.mrb[1].mxu0 }
 0x219   : > { %v1090_v56 = vpop.f32.mrb[2].mxu0 }
 0x21a   : > { %v1373_v57 = vpop.f32.mrb[3].mxu0 }
 0x21b PF: > { %s14_s17 = sadd.s32 1, %s1491_s17   ;;  %s1665_s15 = smov %s1487_s16 }
 0x21c   : > { %p11_p8 = scmp.ge.s32.totalorder %s14_s17, 6   ;;  %s1666_s16 = smov %s1668_s18 }
 0x21e   :  { %13 = sbr.rel (!%p11_p8) target bundleno = 2 (0x2), region = 83 }

// kernel: simple_model_forward.2
= control target key start
LH: loop header
LB: loop body
LE: loop exit
PB: predicated region body
PF: predicated region fallthrough
CT: control target
= control target key end

     0   :  { %s3141_s12 = smov 0   ;;  %s4063_s0 = inlined_call_operand.vmem [shape: f32[2,18,18,3], index: 0, kind: input, shape index: {}]   ;;  %s4064_s1 = inlined_call_operand.vmem [shape: bf16[32,64], index: 1, kind: input, shape index: {}]   ;;  %s4065_s2 = inlined_call_operand.vmem [shape: f32[1,64], index: 2, kind: input, shape index: {}]   ;;  %s4066_s3 = inlined_call_operand.vmem [shape: bf16[2,8,512], index: 3, kind: output, shape index: {}]  }
   0x1 LB: > { %s2783_s13 = sadd.s32 4294967295, %s3107_s12   ;;  %p2787_p0 = scmp.ge.s32.totalorder %s3107_s12, 1  ;;  %s3107_s12 = sphi %s3141_s12, %s13_s12  }
   0x2   : > { %p137_p1 = scmp.lt.s32.totalorder %s3107_s12, 3 }
   0x4   : > { %p138_p2 = pnand %p2787_p0, %p137_p1 }
   0x5   : > { %p161_p3 = scmp.lt.s32.totalorder (!%p138_p2), %s2783_s13, 1  ;;  %s3109_s18 = smov (!%p138_p2), 3   ;;  %vm220_vm0 = vcmask (!%p138_p2), 23552   ;;  %vm349_vm1 = vcmask (!%p138_p2), 48152   ;;  %vm478_vm2 = vcmask (!%p138_p2), 72752   ;;  %vm608_vm3 = vcmask (!%p138_p2), 97352  }
   0x6   : > { %141 = sbr.rel (%p138_p2) target bundleno = 793 (0x319), region = 32  ;;  %s3110_s19 = smov (!%p138_p2), 6   ;;  %vm737_vm4 = vcmask (!%p138_p2), 121952   ;;  %vm866_vm5 = vcmask (!%p138_p2), 146552   ;;  %vm996_vm6 = vcmask (!%p138_p2), 171152   ;;  %vm1125_vm7 = vcmask (!%p138_p2), 195752  }
   0x7   : > { %s3111_s20 = smov (!%p138_p2), 9   ;;  %s3112_s21 = smov (!%p138_p2), 12   ;;  %vm1254_vm8 = vcmask (!%p138_p2), 220352   ;;  %vm1271_vm9 = vcmask (!%p138_p2), 261336   ;;  %vm1327_vm10 = vcmask (!%p138_p2), 261120   ;;  %vm1569_vm11 = vcmask (!%p138_p2), 523264  }
   0x8   : > { %s3113_s22 = smov (!%p138_p2), 15   ;;  %s3114_s23 = smov (!%p138_p2), 18   ;;  %vm1970_vm12 = vcmask (!%p138_p2), 517120   ;;  %vm2483_vm13 = vcmask (!%p138_p2), 1041409   ;;  %vm2485_vm14 = vcmask (!%p138_p2), 1042434   ;;  %vm2487_vm15 = vcmask (!%p138_p2), 1043459  }
   0x9   : > { %s3115_s24 = smov (!%p138_p2), 21   ;;  %s3116_s25 = smov (!%p138_p2), 24  }
   0xa   : > { %s3120_s7 = smov (!%p138_p2), 64  }
   0xd   : > { %s4068_s13 = smov (!%p161_p3, %s2783_s13), 1 }
   0xe   : > { %s3067_s14 = smul.u32 432, %s4068_s13  ;;  %s3006_s8 = sshll.u32 %s4068_s13, 4 }
   0xf   : > { %s170_s11 = scalar_lea.vmem %s4066_s3, %s3006_s8 }
  0x10   : > { %s3155_s17 = scalar_lea.vmem %s4063_s0, %s3067_s14 }
  0x11   : > { %v239_v0 = vld [vmem:[%s3155_s17 + $0x19] sm:$0xff]  ;;  %v240_v1 = vld [vmem:[%s3155_s17 + $0x21] sm:$0xff]  ;;  %v238_v4 = vld [vmem:[%s3155_s17 + $0x9] sm:$0xff] }
  0x12   : > { %v237_v2 = vld [vmem:[%s3155_s17 + $0x1] sm:$0xff]  ;;  %v3160_v3 = vpack.c.bf16 %v240_v1, %v239_v0  ;;  %v255_v5 = vld [vmem:[%s3155_s17 + $0xd9] sm:$0xff]  ;;  %v254_v9 = vld [vmem:[%s3155_s17 + $0xc9] sm:$0xff] }
  0x13   : > { %v256_v6 = vld [vmem:[%s3155_s17 + $0xe1] sm:$0xff]  ;;  %v269_v7 = vpack.c.bf16 %v238_v4, %v237_v2  ;;  %v383_v13 = vld [vmem:[%s3155_s17 + $0xca] sm:$0xff]  ;;  %v2807_v16 = vld [vmem:[%s3155_s17 + $0xd8] sm:$0xff] }
  0x14   : > { %v253_v8 = vld [vmem:[%s3155_s17 + $0xc1] sm:$0xff]  ;;  %303 = vrot.lane.b32.xlu1 %v3160_v3, %s3109_s18  ;;  %v3169_v10 = vpack.c.bf16 %v256_v6, %v255_v5  ;;  %v367_v15 = vld [vmem:[%s3155_s17 + $0xa] sm:$0xff]  ;;  %v2791_v19 = vld [vmem:[%s3155_s17 + $0x18] sm:$0xff] }
  0x15   : > { %301 = vrot.lane.b32.xlu0 %v269_v7, %s3109_s18  ;;  %v277_v11 = vpack.c.bf16 %v254_v9, %v253_v8  ;;  %v382_v12 = vld [vmem:[%s3155_s17 + $0xc2] sm:$0xff]  ;;  %v2809_v21 = vld [vmem:[%s3155_s17 + $0xf0] sm:$0xff]  ;;  %v2810_v24 = vld [vmem:[%s3155_s17 + $0xf8] sm:$0xff] }
  0x16   : > { %v366_v14 = vld [vmem:[%s3155_s17 + $0x2] sm:$0xff]  ;;  %v406_v22 = vpack.c.bf16 %v383_v13, %v382_v12  ;;  %v2793_v25 = vld [vmem:[%s3155_s17 + $0x30] sm:$0xff]  ;;  %v2794_v26 = vld [vmem:[%s3155_s17 + $0x38] sm:$0xff]  ;;  %v3189_v30 = vpack.c.bf16 %v2810_v24, %v2809_v21 }
  0x17   : > { %v2808_v17 = vld [vmem:[%s3155_s17 + $0xe0] sm:$0xff]  ;;  %v398_v27 = vpack.c.bf16 %v367_v15, %v366_v14  ;;  %v3191_v31 = vpack.c.bf16 %v2794_v26, %v2793_v25  ;;  %v2905_v34 = vld [vmem:[%s3155_s17 + $0x108] sm:$0xff]  ;;  %v2906_v36 = vld [vmem:[%s3155_s17 + $0x110] sm:$0xff] }
  0x18   : > { %v536_v18 = vpack.c.bf16 %v2808_v17, %v2807_v16  ;;  %v2792_v20 = vld [vmem:[%s3155_s17 + $0x20] sm:$0xff]  ;;  %319 = vrot.lane.b32.xlu1 %v3169_v10, %s3109_s18  ;;  %231 = vst.msk [vmem:[#allocation2 + $0x50] sm:$0xff] %vm220_vm0, %v3189_v30  ;;  %v2889_v37 = vld [vmem:[%s3155_s17 + $0x48] sm:$0xff]  ;;  %v2890_v38 = vld [vmem:[%s3155_s17 + $0x50] sm:$0xff]  ;;  %v3209_v40 = vpack.c.bf16 %v2906_v36, %v2905_v34 }
  0x19   : > { %v528_v23 = vpack.c.bf16 %v2792_v20, %v2791_v19  ;;  %317 = vrot.lane.b32.xlu0 %v277_v11, %s3109_s18  ;;  %v384_v28 = vld [vmem:[%s3155_s17 + $0xda] sm:$0xff]  ;;  %v385_v29 = vld [vmem:[%s3155_s17 + $0xe2] sm:$0xff]  ;;  %223 = vst.msk [vmem:[#allocation2 + $0x10] sm:$0xff] %vm220_vm0, %v3191_v31  ;;  %v3211_v41 = vpack.c.bf16 %v2890_v38, %v2889_v37  ;;  %v2841_v59 = vld [vmem:[%s3155_s17 + $0xf1] sm:$0xff] }
  0x1a   : > { %230 = vst.msk [vmem:[#allocation2 + $0x48] sm:$0xff] %vm220_vm0, %v536_v18  ;;  %v368_v32 = vld [vmem:[%s3155_s17 + $0x1a] sm:$0xff]  ;;  %v369_v33 = vld [vmem:[%s3155_s17 + $0x22] sm:$0xff]  ;;  %v3203_v35 = vpack.c.bf16 %v385_v29, %v384_v28  ;;  %232 = vst.msk [vmem:[#allocation2 + $0x58] sm:$0xff] %vm220_vm0, %v3209_v40 }
  0x1b   : > { %222 = vst.msk [vmem:[#allocation2 + $0x8] sm:$0xff] %vm220_vm0, %v528_v23  ;;  %v399_v39 = vpack.c.bf16 %v369_v33, %v368_v32  ;;  %v2813_v42 = vld [vmem:[%s3155_s17 + $0x120] sm:$0xff]  ;;  %224 = vst.msk [vmem:[#allocation2 + $0x18] sm:$0xff] %vm220_vm0, %v3211_v41  ;;  %v2814_v43 = vld [vmem:[%s3155_s17 + $0x128] sm:$0xff] }
  0x1c   : > { %446 = vrot.lane.b32.xlu1 %v406_v22, %s3110_s19  ;;  %v2797_v44 = vld [vmem:[%s3155_s17 + $0x60] sm:$0xff]  ;;  %v2798_v45 = vld [vmem:[%s3155_s17 + $0x68] sm:$0xff]  ;;  %v3224_v46 = vpack.c.bf16 %v2814_v43, %v2813_v42  ;;  %v2909_v48 = vld [vmem:[%s3155_s17 + $0x138] sm:$0xff] }
  0x1d   : > { %430 = vrot.lane.b32.xlu0 %v398_v27, %s3110_s19  ;;  %v3226_v47 = vpack.c.bf16 %v2798_v45, %v2797_v44  ;;  %v2910_v49 = vld [vmem:[%s3155_s17 + $0x140] sm:$0xff]  ;;  %v2893_v50 = vld [vmem:[%s3155_s17 + $0x78] sm:$0xff]  ;;  %v173_v55 = vld [vmem:[%s3155_s17 + $0x8] sm:$0xff] }
  0x1e   : > { %233 = vst.msk [vmem:[#allocation2 + $0x60] sm:$0xff] %vm220_vm0, %v3224_v46  ;;  %v2894_v51 = vld [vmem:[%s3155_s17 + $0x80] sm:$0xff]  ;;  %v3238_v52 = vpack.c.bf16 %v2910_v49, %v2909_v48  ;;  %v189_v58 = vld [vmem:[%s3155_s17 + $0xc8] sm:$0xff]  ;;  %v2817_v62 = vld [vmem:[%s3155_s17 + $0x150] sm:$0xff] }
  0x1f   : > { %225 = vst.msk [vmem:[#allocation2 + $0x20] sm:$0xff] %vm220_vm0, %v3226_v47  ;;  %v3240_v53 = vpack.c.bf16 %v2894_v51, %v2893_v50  ;;  %v172_v54 = vld [vmem:[%s3155_s17] sm:$0xff]  ;;  %v2818_v63 = vld [vmem:[%s3155_s17 + $0x158] sm:$0xff]  ;;  %v2801_v0 = vld [vmem:[%s3155_s17 + $0x90] sm:$0xff] }
  0x20   : > { %448 = vrot.lane.b32.xlu1 %v3203_v35, %s3110_s19  ;;  %v204_v56 = vpack.c.bf16 %v173_v55, %v172_v54  ;;  %v188_v57 = vld [vmem:[%s3155_s17 + $0xc0] sm:$0xff]  ;;  %234 = vst.msk [vmem:[#allocation2 + $0x68] sm:$0xff] %vm220_vm0, %v3238_v52  ;;  %v2825_v1 = vld [vmem:[%s3155_s17 + $0x31] sm:$0xff]  ;;  %v3266_v4 = vpack.c.bf16 %v2818_v63, %v2817_v62  ;;  %v2913_v14 = vld [vmem:[%s3155_s17 + $0x168] sm:$0xff] }
  0x21   : > { %432 = vrot.lane.b32.xlu0 %v399_v39, %s3110_s19  ;;  %226 = vst.msk [vmem:[#allocation2 + $0x28] sm:$0xff] %vm220_vm0, %v3240_v53  ;;  %v2842_v60 = vld [vmem:[%s3155_s17 + $0xf9] sm:$0xff]  ;;  %v3255_v61 = vpack.c.bf16 %v189_v58, %v188_v57  ;;  %v2914_v15 = vld [vmem:[%s3155_s17 + $0x170] sm:$0xff]  ;;  %v2897_v16 = vld [vmem:[%s3155_s17 + $0xa8] sm:$0xff] }
  0x22   : > { %221 = vst.msk [vmem:[#allocation2] sm:$0xff] %vm220_vm0, %v204_v56  ;;  %v2826_v2 = vld [vmem:[%s3155_s17 + $0x39] sm:$0xff]  ;;  %v666_v7 = vpack.c.bf16 %v2842_v60, %v2841_v59  ;;  %235 = vst.msk [vmem:[#allocation2 + $0x70] sm:$0xff] %vm220_vm0, %v3266_v4  ;;  %v3297_v17 = vpack.c.bf16 %v2914_v15, %v2913_v14  ;;  %v2937_v20 = vld [vmem:[%s3155_s17 + $0x109] sm:$0xff] }
  0x23   : > { %229 = vst.msk [vmem:[#allocation2 + $0x40] sm:$0xff] %vm220_vm0, %v3255_v61  ;;  %v2802_v5 = vld [vmem:[%s3155_s17 + $0x98] sm:$0xff]  ;;  %v658_v8 = vpack.c.bf16 %v2826_v2, %v2825_v1  ;;  %v2921_v22 = vld [vmem:[%s3155_s17 + $0x49] sm:$0xff]  ;;  %v2845_v32 = vld [vmem:[%s3155_s17 + $0x121] sm:$0xff] }
  0x24   : > { %576 = vrot.lane.b32.xlu1 %v536_v18, %s3111_s20  ;;  %v3269_v6 = vpack.c.bf16 %v2802_v5, %v2801_v0  ;;  %v2873_v9 = vld [vmem:[%s3155_s17 + $0xf2] sm:$0xff]  ;;  %v2858_v12 = vld [vmem:[%s3155_s17 + $0x3a] sm:$0xff]  ;;  %236 = vst.msk [vmem:[#allocation2 + $0x78] sm:$0xff] %vm220_vm0, %v3297_v17  ;;  %v2969_v26 = vld [vmem:[%s3155_s17 + $0x10a] sm:$0xff] }
  0x25   : > { %560 = vrot.lane.b32.xlu0 %v528_v23, %s3111_s20  ;;  %v2857_v11 = vld [vmem:[%s3155_s17 + $0x32] sm:$0xff]  ;;  %v2953_v28 = vld [vmem:[%s3155_s17 + $0x4a] sm:$0xff]  ;;  %v2829_v34 = vld [vmem:[%s3155_s17 + $0x61] sm:$0xff] }
  0x26   : > { %227 = vst.msk [vmem:[#allocation2 + $0x30] sm:$0xff] %vm220_vm0, %v3269_v6  ;;  %v787_v13 = vpack.c.bf16 %v2858_v12, %v2857_v11  ;;  %v2898_v18 = vld [vmem:[%s3155_s17 + $0xb0] sm:$0xff]  ;;  %v2877_v38 = vld [vmem:[%s3155_s17 + $0x122] sm:$0xff]  ;;  %v2941_v44 = vld [vmem:[%s3155_s17 + $0x139] sm:$0xff] }
  0x27   : > { %v3302_v19 = vpack.c.bf16 %v2898_v18, %v2897_v16  ;;  %v2938_v21 = vld [vmem:[%s3155_s17 + $0x111] sm:$0xff]  ;;  %v2846_v33 = vld [vmem:[%s3155_s17 + $0x129] sm:$0xff]  ;;  %v2942_v45 = vld [vmem:[%s3155_s17 + $0x141] sm:$0xff] }
  0x28   : > { %578 = vrot.lane.b32.xlu1 %v3189_v30, %s3111_s20  ;;  %v2922_v23 = vld [vmem:[%s3155_s17 + $0x51] sm:$0xff]  ;;  %v1054_v24 = vpack.c.bf16 %v2938_v21, %v2937_v20  ;;  %v668_v36 = vpack.c.bf16 %v2846_v33, %v2845_v32  ;;  %v2925_v48 = vld [vmem:[%s3155_s17 + $0x79] sm:$0xff]  ;;  %v2926_v49 = vld [vmem:[%s3155_s17 + $0x81] sm:$0xff]  ;;  %v3371_v50 = vpack.c.bf16 %v2942_v45, %v2941_v44 }
  0x29   : > { %562 = vrot.lane.b32.xlu0 %v3191_v31, %s3111_s20  ;;  %228 = vst.msk [vmem:[#allocation2 + $0x38] sm:$0xff] %vm220_vm0, %v3302_v19  ;;  %v1046_v25 = vpack.c.bf16 %v2922_v23, %v2921_v22  ;;  %v2970_v27 = vld [vmem:[%s3155_s17 + $0x112] sm:$0xff]  ;;  %v2973_v56 = vld [vmem:[%s3155_s17 + $0x13a] sm:$0xff]  ;;  %v2974_v57 = vld [vmem:[%s3155_s17 + $0x142] sm:$0xff]  ;;  %vm2489_vm0 = vcmask 1044484  }
  0x2a   : > { %v2954_v29 = vld [vmem:[%s3155_s17 + $0x52] sm:$0xff]  ;;  %v2957_v59 = vld [vmem:[%s3155_s17 + $0x7a] sm:$0xff]  ;;  %v2958_v60 = vld [vmem:[%s3155_s17 + $0x82] sm:$0xff]  ;;  %v3393_v63 = vpack.c.bf16 %v2974_v57, %v2973_v56 }
  0x2b   : > { %v3396_v0 = vpack.c.bf16 %v2958_v60, %v2957_v59  ;;  %v2849_v15 = vld [vmem:[%s3155_s17 + $0x151] sm:$0xff]  ;;  %v2850_v16 = vld [vmem:[%s3155_s17 + $0x159] sm:$0xff] }
  0x2c   : > { %705 = vrot.lane.b32.xlu1 %v3169_v10, %s3112_s21  ;;  %v2874_v10 = vld [vmem:[%s3155_s17 + $0xfa] sm:$0xff]  ;;  %v3440_v21 = vpack.c.bf16 %v2850_v16, %v2849_v15  ;;  %v2962_v56 = vld [vmem:[%s3155_s17 + $0xb2] sm:$0xff] }
  0x2d   : > { %689 = vrot.lane.b32.xlu0 %v3160_v3, %s3112_s21  ;;  %v795_v3 = vpack.c.bf16 %v2874_v10, %v2873_v9  ;;  %v2834_v20 = vld [vmem:[%s3155_s17 + $0x99] sm:$0xff] }
  0x30   : > { %707 = vrot.lane.b32.xlu1 %v666_v7, %s3112_s21 }
  0x31   : > { %691 = vrot.lane.b32.xlu0 %v658_v8, %s3112_s21 }
  0x34   : > { %834 = vrot.lane.b32.xlu1 %v3203_v35, %s3113_s22  ;;  %v2830_v35 = vld [vmem:[%s3155_s17 + $0x69] sm:$0xff] }
  0x35   : > { %818 = vrot.lane.b32.xlu0 %v399_v39, %s3113_s22  ;;  %v660_v37 = vpack.c.bf16 %v2830_v35, %v2829_v34  ;;  %v2878_v39 = vld [vmem:[%s3155_s17 + $0x12a] sm:$0xff] }
  0x36   : > { %v797_v42 = vpack.c.bf16 %v2878_v39, %v2877_v38  ;;  %v3117_v39 = vmov 0  }
  0x38   : > { %836 = vrot.lane.b32.xlu1 %v795_v3, %s3113_s22 }
  0x39   : > { %820 = vrot.lane.b32.xlu0 %v787_v13, %s3113_s22 }
  0x3c   : > { %964 = vrot.lane.b32.xlu1 %v3189_v30, %s3114_s23  ;;  %v1183_v30 = vpack.c.bf16 %v2970_v27, %v2969_v26  ;;  %v2882_v26 = vld [vmem:[%s3155_s17 + $0x15a] sm:$0xff] }
  0x3d   : > { %948 = vrot.lane.b32.xlu0 %v3191_v31, %s3114_s23  ;;  %v1175_v31 = vpack.c.bf16 %v2954_v29, %v2953_v28  ;;  %v2865_v28 = vld [vmem:[%s3155_s17 + $0x92] sm:$0xff]  ;;  %v2866_v29 = vld [vmem:[%s3155_s17 + $0x9a] sm:$0xff] }
  0x3e   : > { %v3464_v32 = vpack.c.bf16 %v2866_v29, %v2865_v28  ;;  %v2885_v28 = vld [vmem:[%s3155_s17 + $0x182] sm:$0xff]  ;;  %v2886_v29 = vld [vmem:[%s3155_s17 + $0x18a] sm:$0xff] }
  0x40   : > { %966 = vrot.lane.b32.xlu1 %v3209_v40, %s3114_s23 }
  0x41   : > { %950 = vrot.lane.b32.xlu0 %v3211_v41, %s3114_s23 }
  0x44   : > { %1093 = vrot.lane.b32.xlu1 %v666_v7, %s3115_s24 }
  0x45   : > { %1077 = vrot.lane.b32.xlu0 %v658_v8, %s3115_s24 }
  0x48   : > { %1095 = vrot.lane.b32.xlu1 %v1054_v24, %s3115_s24 }
  0x49   : > { %1079 = vrot.lane.b32.xlu0 %v1046_v25, %s3115_s24 }
  0x4c   : > { %1222 = vrot.lane.b32.xlu1 %v795_v3, %s3116_s25 }
  0x4d   : > { %1206 = vrot.lane.b32.xlu0 %v787_v13, %s3116_s25 }
  0x50   : > { %321 = vrot.lane.b32.xlu1 %v666_v7, %s3109_s18 }
  0x51   : > { %305 = vrot.lane.b32.xlu0 %v658_v8, %s3109_s18 }
  0x54   : > { %1224 = vrot.lane.b32.xlu1 %v1183_v30, %s3116_s25 }
  0x55   : > { %1208 = vrot.lane.b32.xlu0 %v1175_v31, %s3116_s25 }
  0x58   : > { %323 = vrot.lane.b32.xlu1 %v1054_v24, %s3109_s18 }
  0x59   : > { %307 = vrot.lane.b32.xlu0 %v1046_v25, %s3109_s18 }
  0x5c   : > { %450 = vrot.lane.b32.xlu1 %v795_v3, %s3110_s19 }
  0x5d   : > { %434 = vrot.lane.b32.xlu0 %v787_v13, %s3110_s19 }
  0x60   : > { %452 = vrot.lane.b32.xlu1 %v1183_v30, %s3110_s19 }
  0x61   : > { %436 = vrot.lane.b32.xlu0 %v1175_v31, %s3110_s19 }
  0x64   : > { %580 = vrot.lane.b32.xlu1 %v3209_v40, %s3111_s20  ;;  %v2861_v40 = vld [vmem:[%s3155_s17 + $0x62] sm:$0xff] }
  0x65   : > { %564 = vrot.lane.b32.xlu0 %v3211_v41, %s3111_s20  ;;  %v2862_v41 = vld [vmem:[%s3155_s17 + $0x6a] sm:$0xff] }
  0x66   : > { %v789_v43 = vpack.c.bf16 %v2862_v41, %v2861_v40  ;;  %v2929_v41 = vld [vmem:[%s3155_s17 + $0xa9] sm:$0xff] }
  0x68   : > { %582 = vrot.lane.b32.xlu1 %v3224_v46, %s3111_s20 }
  0x69   : > { %566 = vrot.lane.b32.xlu0 %v3226_v47, %s3111_s20 }
  0x6c   : > { %709 = vrot.lane.b32.xlu1 %v1054_v24, %s3112_s21 }
  0x6d   : > { %693 = vrot.lane.b32.xlu0 %v1046_v25, %s3112_s21  ;;  %v2881_v25 = vld [vmem:[%s3155_s17 + $0x152] sm:$0xff] }
  0x70   : > { %711 = vrot.lane.b32.xlu1 %v668_v36, %s3112_s21 }
  0x71   : > { %695 = vrot.lane.b32.xlu0 %v660_v37, %s3112_s21 }
  0x74   : > { %838 = vrot.lane.b32.xlu1 %v1183_v30, %s3113_s22 }
  0x75   : > { %822 = vrot.lane.b32.xlu0 %v1175_v31, %s3113_s22  ;;  %v3460_v31 = vpack.c.bf16 %v2882_v26, %v2881_v25 }
  0x78   : > { %840 = vrot.lane.b32.xlu1 %v797_v42, %s3113_s22 }
  0x79   : > { %824 = vrot.lane.b32.xlu0 %v789_v43, %s3113_s22 }
  0x7c   : > { %968 = vrot.lane.b32.xlu1 %v3224_v46, %s3114_s23  ;;  %v3374_v46 = vpack.c.bf16 %v2926_v49, %v2925_v48 }
  0x7d   : > { %952 = vrot.lane.b32.xlu0 %v3226_v47, %s3114_s23 }
  0x80   : > { %970 = vrot.lane.b32.xlu1 %v3238_v52, %s3114_s23 }
  0x81   : > { %954 = vrot.lane.b32.xlu0 %v3240_v53, %s3114_s23 }
  0x84   : > { %1097 = vrot.lane.b32.xlu1 %v668_v36, %s3115_s24 }
  0x85   : > { %1081 = vrot.lane.b32.xlu0 %v660_v37, %s3115_s24 }
  0x86   : > { %v304_v47 = vpop.permute.xlu1 %303 }
  0x87   : > { %351 = vst.msk [vmem:[#allocation2 + $0x8] sm:$0xff] %vm349_vm1, %v304_v47  ;;  %v302_v51 = vpop.permute.xlu0 %301  ;;  %v2977_v47 = vld [vmem:[%s3155_s17 + $0x16a] sm:$0xff] }
  0x88   : > { %350 = vst.msk [vmem:[#allocation2] sm:$0xff] %vm349_vm1, %v302_v51  ;;  %1099 = vrot.lane.b32.xlu1 %v3371_v50, %s3115_s24  ;;  %v2978_v51 = vld [vmem:[%s3155_s17 + $0x172] sm:$0xff] }
  0x89   : > { %1083 = vrot.lane.b32.xlu0 %v3374_v46, %s3115_s24  ;;  %v3529_v59 = vpack.c.bf16 %v2978_v51, %v2977_v47  ;;  %v2934_v47 = vld [vmem:[%s3155_s17 + $0xe1] sm:$0xff] }
  0x8a   : > { %v320_v54 = vpop.permute.xlu1 %319 }
  0x8b   : > { %359 = vst.msk [vmem:[#allocation2 + $0x48] sm:$0xff] %vm349_vm1, %v320_v54  ;;  %v318_v55 = vpop.permute.xlu0 %317 }
  0x8c   : > { %358 = vst.msk [vmem:[#allocation2 + $0x40] sm:$0xff] %vm349_vm1, %v318_v55  ;;  %1226 = vrot.lane.b32.xlu1 %v797_v42, %s3116_s25  ;;  %v2961_v55 = vld [vmem:[%s3155_s17 + $0xaa] sm:$0xff] }
  0x8d   : > { %1210 = vrot.lane.b32.xlu0 %v789_v43, %s3116_s25  ;;  %v3533_v60 = vpack.c.bf16 %v2962_v56, %v2961_v55 }
  0x8e   : > { %v447_v58 = vpop.permute.xlu1 %446 }
  0x8f   : > { %487 = vst.msk [vmem:[#allocation2 + $0x40] sm:$0xff] %vm478_vm2, %v447_v58  ;;  %v431_v62 = vpop.permute.xlu0 %430  ;;  %v3098_v58 = vld [vmem:[%s4064_s1] sm:$0xff]  }
  0x90   : > { %479 = vst.msk [vmem:[#allocation2] sm:$0xff] %vm478_vm2, %v431_v62  ;;  %325 = vrot.lane.b32.xlu1 %v668_v36, %s3109_s18  ;;  %3027 = vmatprep.subr.bf16.mxu0 %v3098_v58 }
  0x91   : > { %309 = vrot.lane.b32.xlu0 %v660_v37, %s3109_s18  ;;  %3063 = vmatprep.subr.bf16.mxu1 %v3098_v58 }
  0x92   : > { %v449_v1 = vpop.permute.xlu1 %448  ;;  %3028 = vmatpush3.bf16.msra.mxu0 %v3098_v58  ;;  %3065 = vmatpush3.bf16.msra.mxu1 %v3098_v58 }
  0x93   : > { %488 = vst.msk [vmem:[#allocation2 + $0x48] sm:$0xff] %vm478_vm2, %v449_v1  ;;  %v433_v2 = vpop.permute.xlu0 %432 }
  0x94   : > { %480 = vst.msk [vmem:[#allocation2 + $0x8] sm:$0xff] %vm478_vm2, %v433_v2  ;;  %1228 = vrot.lane.b32.xlu1 %v3393_v63, %s3116_s25 }
  0x95   : > { %1212 = vrot.lane.b32.xlu0 %v3396_v0, %s3116_s25 }
  0x96   : > { %v577_v5 = vpop.permute.xlu1 %576 }
  0x97   : > { %617 = vst.msk [vmem:[#allocation2 + $0x40] sm:$0xff] %vm608_vm3, %v577_v5  ;;  %v561_v7 = vpop.permute.xlu0 %560 }
  0x98   : > { %609 = vst.msk [vmem:[#allocation2] sm:$0xff] %vm608_vm3, %v561_v7  ;;  %327 = vrot.lane.b32.xlu1 %v3371_v50, %s3109_s18 }
  0x99   : > { %311 = vrot.lane.b32.xlu0 %v3374_v46, %s3109_s18 }
  0x9a   : > { %v579_v8 = vpop.permute.xlu1 %578 }
  0x9b   : > { %618 = vst.msk [vmem:[#allocation2 + $0x48] sm:$0xff] %vm608_vm3, %v579_v8  ;;  %v563_v9 = vpop.permute.xlu0 %562 }
  0x9c   : > { %610 = vst.msk [vmem:[#allocation2 + $0x8] sm:$0xff] %vm608_vm3, %v563_v9  ;;  %454 = vrot.lane.b32.xlu1 %v797_v42, %s3110_s19  ;;  %v2930_v42 = vld [vmem:[%s3155_s17 + $0xb1] sm:$0xff] }
  0x9d   : > { %438 = vrot.lane.b32.xlu0 %v789_v43, %s3110_s19  ;;  %v3500_v45 = vpack.c.bf16 %v2930_v42, %v2929_v41  ;;  %v2902_v41 = vld [vmem:[%s3155_s17 + $0xe0] sm:$0xff] }
  0x9e   : > { %v706_v10 = vpop.permute.xlu1 %705 }
  0x9f   : > { %746 = vst.msk [vmem:[#allocation2 + $0x40] sm:$0xff] %vm737_vm4, %v706_v10  ;;  %v690_v11 = vpop.permute.xlu0 %689 }
  0xa0   : > { %738 = vst.msk [vmem:[#allocation2] sm:$0xff] %vm737_vm4, %v690_v11  ;;  %456 = vrot.lane.b32.xlu1 %v3393_v63, %s3110_s19 }
  0xa1   : > { %440 = vrot.lane.b32.xlu0 %v3396_v0, %s3110_s19 }
  0xa2   : > { %v708_v12 = vpop.permute.xlu1 %707 }
  0xa3   : > { %747 = vst.msk [vmem:[#allocation2 + $0x48] sm:$0xff] %vm737_vm4, %v708_v12  ;;  %v692_v3 = vpop.permute.xlu0 %691 }
  0xa4   : > { %739 = vst.msk [vmem:[#allocation2 + $0x8] sm:$0xff] %vm737_vm4, %v692_v3  ;;  %584 = vrot.lane.b32.xlu1 %v3238_v52, %s3111_s20  ;;  %v2833_v52 = vld [vmem:[%s3155_s17 + $0x91] sm:$0xff] }
  0xa5   : > { %568 = vrot.lane.b32.xlu0 %v3240_v53, %s3111_s20  ;;  %v3444_v22 = vpack.c.bf16 %v2834_v20, %v2833_v52 }
  0xa6   : > { %v835_v13 = vpop.permute.xlu1 %834 }
  0xa7   : > { %875 = vst.msk [vmem:[#allocation2 + $0x40] sm:$0xff] %vm866_vm5, %v835_v13  ;;  %v819_v14 = vpop.permute.xlu0 %818  ;;  %v2821_v13 = vld [vmem:[%s3155_s17 + $0x180] sm:$0xff] }
  0xa8   : > { %867 = vst.msk [vmem:[#allocation2] sm:$0xff] %vm866_vm5, %v819_v14  ;;  %586 = vrot.lane.b32.xlu1 %v3266_v4, %s3111_s20  ;;  %v2822_v14 = vld [vmem:[%s3155_s17 + $0x188] sm:$0xff] }
  0xa9   : > { %570 = vrot.lane.b32.xlu0 %v3269_v6, %s3111_s20 }
  0xaa   : > { %v837_v18 = vpop.permute.xlu1 %836 }
  0xab   : > { %876 = vst.msk [vmem:[#allocation2 + $0x48] sm:$0xff] %vm866_vm5, %v837_v18  ;;  %v821_v53 = vpop.permute.xlu0 %820  ;;  %v543_v18 = vpack.c.bf16 %v2822_v14, %v2821_v13 }
  0xac   : > { %868 = vst.msk [vmem:[#allocation2 + $0x8] sm:$0xff] %vm866_vm5, %v821_v53  ;;  %713 = vrot.lane.b32.xlu1 %v3371_v50, %s3112_s21  ;;  %v2853_v53 = vld [vmem:[%s3155_s17 + $0x181] sm:$0xff] }
  0xad   : > { %697 = vrot.lane.b32.xlu0 %v3374_v46, %s3112_s21 }
  0xae   : > { %v965_v23 = vpop.permute.xlu1 %964 }
  0xaf   : > { %1005 = vst.msk [vmem:[#allocation2 + $0x40] sm:$0xff] %vm996_vm6, %v965_v23  ;;  %v949_v24 = vpop.permute.xlu0 %948  ;;  %v2838_v23 = vld [vmem:[%s3155_s17 + $0xc9] sm:$0xff] }
  0xb0   : > { %997 = vst.msk [vmem:[#allocation2] sm:$0xff] %vm996_vm6, %v949_v24  ;;  %715 = vrot.lane.b32.xlu1 %v3440_v21, %s3112_s21 }
  0xb1   : > { %699 = vrot.lane.b32.xlu0 %v3444_v22, %s3112_s21 }
  0xb2   : > { %v967_v27 = vpop.permute.xlu1 %966 }
  0xb3   : > { %1006 = vst.msk [vmem:[#allocation2 + $0x48] sm:$0xff] %vm996_vm6, %v967_v27  ;;  %v951_v30 = vpop.permute.xlu0 %950 }
  0xb4   : > { %998 = vst.msk [vmem:[#allocation2 + $0x8] sm:$0xff] %vm996_vm6, %v951_v30  ;;  %842 = vrot.lane.b32.xlu1 %v3393_v63, %s3113_s22 }
  0xb5   : > { %826 = vrot.lane.b32.xlu0 %v3396_v0, %s3113_s22  ;;  %v3099_v0 = vld [vmem:[%s4064_s1 + $0x8] sm:$0xff]  }
  0xb6   : > { %v1094_v33 = vpop.permute.xlu1 %1093  ;;  %3029 = vmatprep.subr.bf16.mxu0 %v3099_v0  ;;  %3064 = vmatprep.subr.bf16.mxu1 %v3099_v0 }
  0xb7   : > { %1134 = vst.msk [vmem:[#allocation2 + $0x40] sm:$0xff] %vm1125_vm7, %v1094_v33  ;;  %v1078_v34 = vpop.permute.xlu0 %1077  ;;  %3030 = vmatpush3.bf16.msra.mxu0 %v3099_v0  ;;  %3066 = vmatpush3.bf16.msra.mxu1 %v3099_v0  ;;  %v2965_v0 = vld [vmem:[%s3155_s17 + $0xda] sm:$0xff] }
  0xb8   : > { %1126 = vst.msk [vmem:[#allocation2] sm:$0xff] %vm1125_vm7, %v1078_v34  ;;  %844 = vrot.lane.b32.xlu1 %v3460_v31, %s3113_s22  ;;  %v801_v34 = vpack.c.bf16 %v2886_v29, %v2885_v28 }
  0xb9   : > { %828 = vrot.lane.b32.xlu0 %v3464_v32, %s3113_s22 }
  0xba   : > { %v1096_v35 = vpop.permute.xlu1 %1095 }
  0xbb   : > { %1135 = vst.msk [vmem:[#allocation2 + $0x48] sm:$0xff] %vm1125_vm7, %v1096_v35  ;;  %v1080_v36 = vpop.permute.xlu0 %1079 }
  0xbc   : > { %1127 = vst.msk [vmem:[#allocation2 + $0x8] sm:$0xff] %vm1125_vm7, %v1080_v36  ;;  %972 = vrot.lane.b32.xlu1 %v3266_v4, %s3114_s23  ;;  %v2945_v4 = vld [vmem:[%s3155_s17 + $0x169] sm:$0xff] }
  0xbd   : > { %956 = vrot.lane.b32.xlu0 %v3269_v6, %s3114_s23  ;;  %v2946_v6 = vld [vmem:[%s3155_s17 + $0x171] sm:$0xff] }
  0xbe   : > { %v1223_v37 = vpop.permute.xlu1 %1222  ;;  %v3496_v44 = vpack.c.bf16 %v2946_v6, %v2945_v4  ;;  %v2918_v4 = vld [vmem:[%s3155_s17 + $0x1a0] sm:$0xff] }
  0xbf   : > { %1263 = vst.msk [vmem:[#allocation2 + $0x40] sm:$0xff] %vm1254_vm8, %v1223_v37  ;;  %v1207_v38 = vpop.permute.xlu0 %1206 }
  0xc0   : > { %1280 = vst.msk [vmem:[#allocation2 + $0x40] sm:$0xff] %vm1271_vm9, %v3117_v39  ;;  %974 = vrot.lane.b32.xlu1 %v3297_v17, %s3114_s23 }
  0xc1   : > { %1255 = vst.msk [vmem:[#allocation2] sm:$0xff] %vm1254_vm8, %v1207_v38  ;;  %958 = vrot.lane.b32.xlu0 %v3302_v19, %s3114_s23  ;;  %v2917_v38 = vld [vmem:[%s3155_s17 + $0x198] sm:$0xff] }
  0xc2   : > { %1272 = vst.msk [vmem:[#allocation2] sm:$0xff] %vm1271_vm9, %v3117_v39  ;;  %v322_v40 = vpop.permute.xlu1 %321 }
  0xc3   : > { %360 = vst.msk [vmem:[#allocation2 + $0x50] sm:$0xff] %vm349_vm1, %v322_v40  ;;  %v306_v43 = vpop.permute.xlu0 %305  ;;  %v2901_v40 = vld [vmem:[%s3155_s17 + $0xd8] sm:$0xff] }
  0xc4   : > { %352 = vst.msk [vmem:[#allocation2 + $0x10] sm:$0xff] %vm349_vm1, %v306_v43  ;;  %1101 = vrot.lane.b32.xlu1 %v3440_v21, %s3115_s24  ;;  %v931_v43 = vpack.c.bf16 %v2918_v4, %v2917_v38 }
  0xc5   : > { %1085 = vrot.lane.b32.xlu0 %v3444_v22, %s3115_s24 }
  0xc6   : > { %v1225_v48 = vpop.permute.xlu1 %1224 }
  0xc7   : > { %1264 = vst.msk [vmem:[#allocation2 + $0x48] sm:$0xff] %vm1254_vm8, %v1225_v48  ;;  %v1209_v49 = vpop.permute.xlu0 %1208  ;;  %v1296_v7 = vld [vmem:[#allocation2 + $0x40] sm:$0xff] }
  0xc8   : > { %1281 = vst.msk [vmem:[#allocation2 + $0x48] sm:$0xff] %vm1271_vm9, %v3117_v39  ;;  %1103 = vrot.lane.b32.xlu1 %v3496_v44, %s3115_s24  ;;  %3047 = vmatprep.mubr.msk.bf16.mxu1 %vm1327_vm10, %v1296_v7 }
  0xc9   : > { %1256 = vst.msk [vmem:[#allocation2 + $0x8] sm:$0xff] %vm1254_vm8, %v1209_v49  ;;  %1087 = vrot.lane.b32.xlu0 %v3500_v45, %s3115_s24  ;;  %v1288_v5 = vld [vmem:[#allocation2] sm:$0xff] }
  0xca   : > { %1273 = vst.msk [vmem:[#allocation2 + $0x8] sm:$0xff] %vm1271_vm9, %v3117_v39  ;;  %v324_v50 = vpop.permute.xlu1 %323  ;;  %3031 = vmatprep.mubr.msk.bf16.mxu0 %vm1327_vm10, %v1288_v5  ;;  %v2949_v49 = vld [vmem:[%s3155_s17 + $0x199] sm:$0xff] }
  0xcb   : > { %361 = vst.msk [vmem:[#allocation2 + $0x58] sm:$0xff] %vm349_vm1, %v324_v50  ;;  %v308_v46 = vpop.permute.xlu0 %307  ;;  %v2950_v50 = vld [vmem:[%s3155_s17 + $0x1a1] sm:$0xff] }
  0xcc   : > { %353 = vst.msk [vmem:[#allocation2 + $0x18] sm:$0xff] %vm349_vm1, %v308_v46  ;;  %1230 = vrot.lane.b32.xlu1 %v3460_v31, %s3116_s25  ;;  %v2933_v46 = vld [vmem:[%s3155_s17 + $0xd9] sm:$0xff] }
  0xcd   : > { %1214 = vrot.lane.b32.xlu0 %v3464_v32, %s3116_s25  ;;  %v1052_v55 = vpack.c.bf16 %v2934_v47, %v2933_v46 }
  0xce   : > { %v451_v54 = vpop.permute.xlu1 %450 }
  0xcf   : > { %489 = vst.msk [vmem:[#allocation2 + $0x50] sm:$0xff] %vm478_vm2, %v451_v54  ;;  %v435_v57 = vpop.permute.xlu0 %434  ;;  %v1297_v9 = vld [vmem:[#allocation2 + $0x48] sm:$0xff]  ;;  %v1060_v54 = vpack.c.bf16 %v2950_v50, %v2949_v49 }
  0xd0   : > { %481 = vst.msk [vmem:[#allocation2 + $0x10] sm:$0xff] %vm478_vm2, %v435_v57  ;;  %329 = vrot.lane.b32.xlu1 %v3440_v21, %s3109_s18  ;;  %3048 = vmatmul.mubr.msk.bf16.vlgmr.msra.gmra.mrb[0].mxu1 %vm1327_vm10, %v1297_v9  ;;  %v2854_v21 = vld [vmem:[%s3155_s17 + $0x189] sm:$0xff] }
  0xd1   : > { %313 = vrot.lane.b32.xlu0 %v3444_v22, %s3109_s18  ;;  %v1289_v8 = vld [vmem:[#allocation2 + $0x8] sm:$0xff]  ;;  %v672_v24 = vpack.c.bf16 %v2854_v21, %v2853_v53 }
  0xd2   : > { %v453_v62 = vpop.permute.xlu1 %452  ;;  %3032 = vmatmul.mubr.msk.bf16.vlgmr.msra.gmra.mrb[0].mxu0 %vm1327_vm10, %v1289_v8 }
  0xd3   : > { %490 = vst.msk [vmem:[#allocation2 + $0x58] sm:$0xff] %vm478_vm2, %v453_v62  ;;  %v437_v63 = vpop.permute.xlu0 %436  ;;  %v2982_v62 = vld [vmem:[%s3155_s17 + $0x1a2] sm:$0xff] }
  0xd4   : > { %482 = vst.msk [vmem:[#allocation2 + $0x18] sm:$0xff] %vm478_vm2, %v437_v63  ;;  %1232 = vrot.lane.b32.xlu1 %v3529_v59, %s3116_s25 }
  0xd5   : > { %1216 = vrot.lane.b32.xlu0 %v3533_v60, %s3116_s25 }
  0xd6   : > { %v581_v1 = vpop.permute.xlu1 %580 }
  0xd7   : > { %619 = vst.msk [vmem:[#allocation2 + $0x50] sm:$0xff] %vm608_vm3, %v581_v1  ;;  %v565_v2 = vpop.permute.xlu0 %564  ;;  %v2966_v1 = vld [vmem:[%s3155_s17 + $0xe2] sm:$0xff] }
  0xd8   : > { %611 = vst.msk [vmem:[#allocation2 + $0x10] sm:$0xff] %vm608_vm3, %v565_v2  ;;  %331 = vrot.lane.b32.xlu1 %v3496_v44, %s3109_s18  ;;  %v1181_v7 = vpack.c.bf16 %v2966_v1, %v2965_v0 }
  0xd9   : > { %315 = vrot.lane.b32.xlu0 %v3500_v45, %s3109_s18 }
  0xda   : > { %v583_v10 = vpop.permute.xlu1 %582 }
  0xdb   : > { %620 = vst.msk [vmem:[#allocation2 + $0x58] sm:$0xff] %vm608_vm3, %v583_v10  ;;  %v567_v11 = vpop.permute.xlu0 %566 }
  0xdc   : > { %612 = vst.msk [vmem:[#allocation2 + $0x18] sm:$0xff] %vm608_vm3, %v567_v11  ;;  %458 = vrot.lane.b32.xlu1 %v3460_v31, %s3110_s19  ;;  %v2869_v31 = vld [vmem:[%s3155_s17 + $0xc2] sm:$0xff] }
  0xdd   : > { %442 = vrot.lane.b32.xlu0 %v3464_v32, %s3110_s19  ;;  %v2870_v32 = vld [vmem:[%s3155_s17 + $0xca] sm:$0xff] }
  0xde   : > { %v710_v12 = vpop.permute.xlu1 %709  ;;  %v793_v35 = vpack.c.bf16 %v2870_v32, %v2869_v31 }
  0xdf   : > { %748 = vst.msk [vmem:[#allocation2 + $0x50] sm:$0xff] %vm737_vm4, %v710_v12  ;;  %v694_v3 = vpop.permute.xlu0 %693 }
  0xe0   : > { %740 = vst.msk [vmem:[#allocation2 + $0x10] sm:$0xff] %vm737_vm4, %v694_v3  ;;  %460 = vrot.lane.b32.xlu1 %v3529_v59, %s3110_s19 }
  0xe1   : > { %444 = vrot.lane.b32.xlu0 %v3533_v60, %s3110_s19 }
  0xe2   : > { %v712_v15 = vpop.permute.xlu1 %711 }
  0xe3   : > { %749 = vst.msk [vmem:[#allocation2 + $0x58] sm:$0xff] %vm737_vm4, %v712_v15  ;;  %v696_v16 = vpop.permute.xlu0 %695 }
  0xe4   : > { %741 = vst.msk [vmem:[#allocation2 + $0x18] sm:$0xff] %vm737_vm4, %v696_v16  ;;  %588 = vrot.lane.b32.xlu1 %v3297_v17, %s3111_s20  ;;  %v2837_v17 = vld [vmem:[%s3155_s17 + $0xc1] sm:$0xff] }
  0xe5   : > { %572 = vrot.lane.b32.xlu0 %v3302_v19, %s3111_s20  ;;  %v664_v25 = vpack.c.bf16 %v2838_v23, %v2837_v17 }
  0xe6   : > { %v839_v52 = vpop.permute.xlu1 %838 }
  0xe7   : > { %877 = vst.msk [vmem:[#allocation2 + $0x50] sm:$0xff] %vm866_vm5, %v839_v52  ;;  %v823_v20 = vpop.permute.xlu0 %822 }
  0xe8   : > { %869 = vst.msk [vmem:[#allocation2 + $0x10] sm:$0xff] %vm866_vm5, %v823_v20  ;;  %590 = vrot.lane.b32.xlu1 %v543_v18, %s3111_s20 }
  0xe9   : > { %574 = vrot.lane.b32.xlu0 %v3255_v61, %s3111_s20 }
  0xea   : > { %v841_v22 = vpop.permute.xlu1 %840 }
  0xeb   : > { %878 = vst.msk [vmem:[#allocation2 + $0x58] sm:$0xff] %vm866_vm5, %v841_v22  ;;  %v825_v19 = vpop.permute.xlu0 %824 }
  0xec   : > { %870 = vst.msk [vmem:[#allocation2 + $0x18] sm:$0xff] %vm866_vm5, %v825_v19  ;;  %717 = vrot.lane.b32.xlu1 %v3496_v44, %s3112_s21  ;;  %v923_v44 = vpack.c.bf16 %v2902_v41, %v2901_v40 }
  0xed   : > { %701 = vrot.lane.b32.xlu0 %v3500_v45, %s3112_s21 }
  0xee   : > { %v969_v26 = vpop.permute.xlu1 %968 }
  0xef   : > { %1007 = vst.msk [vmem:[#allocation2 + $0x50] sm:$0xff] %vm996_vm6, %v969_v26  ;;  %v953_v27 = vpop.permute.xlu0 %952 }
  0xf0   : > { %999 = vst.msk [vmem:[#allocation2 + $0x10] sm:$0xff] %vm996_vm6, %v953_v27  ;;  %719 = vrot.lane.b32.xlu1 %v672_v24, %s3112_s21 }
  0xf1   : > { %703 = vrot.lane.b32.xlu0 %v664_v25, %s3112_s21 }
  0xf2   : > { %v971_v30 = vpop.permute.xlu1 %970 }
  0xf3   : > { %1008 = vst.msk [vmem:[#allocation2 + $0x58] sm:$0xff] %vm996_vm6, %v971_v30  ;;  %v955_v33 = vpop.permute.xlu0 %954 }
  0xf4   : > { %1000 = vst.msk [vmem:[#allocation2 + $0x18] sm:$0xff] %vm996_vm6, %v955_v33  ;;  %846 = vrot.lane.b32.xlu1 %v3529_v59, %s3113_s22 }
  0xf5   : > { %830 = vrot.lane.b32.xlu0 %v3533_v60, %s3113_s22  ;;  %v2981_v60 = vld [vmem:[%s3155_s17 + $0x19a] sm:$0xff] }
  0xf6   : > { %v1098_v36 = vpop.permute.xlu1 %1097  ;;  %v1189_v5 = vpack.c.bf16 %v2982_v62, %v2981_v60 }
  0xf7   : > { %1136 = vst.msk [vmem:[#allocation2 + $0x50] sm:$0xff] %vm1125_vm7, %v1098_v36  ;;  %v1082_v37 = vpop.permute.xlu0 %1081 }
  0xf8   : > { %1128 = vst.msk [vmem:[#allocation2 + $0x10] sm:$0xff] %vm1125_vm7, %v1082_v37  ;;  %848 = vrot.lane.b32.xlu1 %v801_v34, %s3113_s22 }
  0xf9   : > { %832 = vrot.lane.b32.xlu0 %v793_v35, %s3113_s22 }
  0xfa   : > { %v1100_v6 = vpop.permute.xlu1 %1099 }
  0xfb   : > { %1137 = vst.msk [vmem:[#allocation2 + $0x58] sm:$0xff] %vm1125_vm7, %v1100_v6  ;;  %v1084_v42 = vpop.permute.xlu0 %1083 }
  0xfc   : > { %1129 = vst.msk [vmem:[#allocation2 + $0x18] sm:$0xff] %vm1125_vm7, %v1084_v42  ;;  %976 = vrot.lane.b32.xlu1 %v543_v18, %s3114_s23 }
  0xfd   : > { %960 = vrot.lane.b32.xlu0 %v3255_v61, %s3114_s23 }
  0xfe   : > { %v1227_v45 = vpop.permute.xlu1 %1226 }
  0xff   : > { %1265 = vst.msk [vmem:[#allocation2 + $0x50] sm:$0xff] %vm1254_vm8, %v1227_v45  ;;  %v1211_v48 = vpop.permute.xlu0 %1210 }
 0x100   : > { %1282 = vst.msk [vmem:[#allocation2 + $0x50] sm:$0xff] %vm1271_vm9, %v3117_v39  ;;  %978 = vrot.lane.b32.xlu1 %v931_v43, %s3114_s23 }
 0x101   : > { %1257 = vst.msk [vmem:[#allocation2 + $0x10] sm:$0xff] %vm1254_vm8, %v1211_v48  ;;  %962 = vrot.lane.b32.xlu0 %v923_v44, %s3114_s23 }
 0x102   : > { %1274 = vst.msk [vmem:[#allocation2 + $0x10] sm:$0xff] %vm1271_vm9, %v3117_v39  ;;  %v326_v61 = vpop.permute.xlu1 %325 }
 0x103   : > { %362 = vst.msk [vmem:[#allocation2 + $0x60] sm:$0xff] %vm349_vm1, %v326_v61  ;;  %v310_v51 = vpop.permute.xlu0 %309 }
 0x104   : > { %354 = vst.msk [vmem:[#allocation2 + $0x20] sm:$0xff] %vm349_vm1, %v310_v51  ;;  %1105 = vrot.lane.b32.xlu1 %v672_v24, %s3115_s24 }
 0x105   : > { %1089 = vrot.lane.b32.xlu0 %v664_v25, %s3115_s24 }
 0x106   : > { %v1229_v56 = vpop.permute.xlu1 %1228 }
 0x107   : > { %1266 = vst.msk [vmem:[#allocation2 + $0x58] sm:$0xff] %vm1254_vm8, %v1229_v56  ;;  %v1213_v57 = vpop.permute.xlu0 %1212  ;;  %v1298_v58 = vld [vmem:[#allocation2 + $0x50] sm:$0xff] }
 0x108   : > { %1283 = vst.msk [vmem:[#allocation2 + $0x58] sm:$0xff] %vm1271_vm9, %v3117_v39  ;;  %1107 = vrot.lane.b32.xlu1 %v1060_v54, %s3115_s24  ;;  %3051 = vmatprep.mubr.msk.bf16.mxu1 %vm1327_vm10, %v1298_v58 }
 0x109   : > { %1258 = vst.msk [vmem:[#allocation2 + $0x18] sm:$0xff] %vm1254_vm8, %v1213_v57  ;;  %v1290_v59 = vld [vmem:[#allocation2 + $0x10] sm:$0xff]  ;;  %1091 = vrot.lane.b32.xlu0 %v1052_v55, %s3115_s24 }
 0x10a   : > { %1275 = vst.msk [vmem:[#allocation2 + $0x18] sm:$0xff] %vm1271_vm9, %v3117_v39  ;;  %3035 = vmatprep.mubr.msk.bf16.mxu0 %vm1327_vm10, %v1290_v59  ;;  %v328_v63 = vpop.permute.xlu1 %327 }
 0x10b   : > { %363 = vst.msk [vmem:[#allocation2 + $0x68] sm:$0xff] %vm349_vm1, %v328_v63  ;;  %v312_v2 = vpop.permute.xlu0 %311 }
 0x10c   : > { %355 = vst.msk [vmem:[#allocation2 + $0x28] sm:$0xff] %vm349_vm1, %v312_v2  ;;  %1234 = vrot.lane.b32.xlu1 %v801_v34, %s3116_s25 }
 0x10d   : > { %1218 = vrot.lane.b32.xlu0 %v793_v35, %s3116_s25 }
 0x10e   : > { %v455_v8 = vpop.permute.xlu1 %454 }
 0x10f   : > { %491 = vst.msk [vmem:[#allocation2 + $0x60] sm:$0xff] %vm478_vm2, %v455_v8  ;;  %v439_v9 = vpop.permute.xlu0 %438  ;;  %v1299_v10 = vld [vmem:[#allocation2 + $0x58] sm:$0xff] }
 0x110   : > { %483 = vst.msk [vmem:[#allocation2 + $0x20] sm:$0xff] %vm478_vm2, %v439_v9  ;;  %1236 = vrot.lane.b32.xlu1 %v1189_v5, %s3116_s25  ;;  %3052 = vmatmul.mubr.msk.bf16.gmra.mrb[4].mxu1 %vm1327_vm10, %v1299_v10 }
 0x111   : > { %v1291_v11 = vld [vmem:[#allocation2 + $0x18] sm:$0xff]  ;;  %1220 = vrot.lane.b32.xlu0 %v1181_v7, %s3116_s25 }
 0x112   : > { %3036 = vmatmul.mubr.msk.bf16.gmra.mrb[4].mxu0 %vm1327_vm10, %v1291_v11  ;;  %v457_v12 = vpop.permute.xlu1 %456 }
 0x113   : > { %492 = vst.msk [vmem:[#allocation2 + $0x68] sm:$0xff] %vm478_vm2, %v457_v12  ;;  %v441_v3 = vpop.permute.xlu0 %440 }
 0x114   : > { %484 = vst.msk [vmem:[#allocation2 + $0x28] sm:$0xff] %vm478_vm2, %v441_v3 }
 0x116   : > { %v585_v13 = vpop.permute.xlu1 %584 }
 0x117   : > { %621 = vst.msk [vmem:[#allocation2 + $0x60] sm:$0xff] %vm608_vm3, %v585_v13  ;;  %v569_v14 = vpop.permute.xlu0 %568 }
 0x118   : > { %613 = vst.msk [vmem:[#allocation2 + $0x20] sm:$0xff] %vm608_vm3, %v569_v14  ;;  %v3118_v14 = vmov 1983009808  }
 0x11a   : > { %v587_v15 = vpop.permute.xlu1 %586 }
 0x11b   : > { %622 = vst.msk [vmem:[#allocation2 + $0x68] sm:$0xff] %vm608_vm3, %v587_v15  ;;  %v571_v16 = vpop.permute.xlu0 %570  ;;  %v1636_v15 = vunpack.c.l.s4 %v3118_v14 }
 0x11c   : > { %614 = vst.msk [vmem:[#allocation2 + $0x28] sm:$0xff] %vm608_vm3, %v571_v16  ;;  %v1638_v16 = vlaneseq }
 0x11e   : > { %v714_v18 = vpop.permute.xlu1 %713 }
 0x11f   : > { %750 = vst.msk [vmem:[#allocation2 + $0x60] sm:$0xff] %vm737_vm4, %v714_v18  ;;  %v698_v52 = vpop.permute.xlu0 %697  ;;  %v3741_v18 = vld [vmem:[%s4065_s2] ss:$0 sm:$0xff] }
 0x120   : > { %742 = vst.msk [vmem:[#allocation2 + $0x20] sm:$0xff] %vm737_vm4, %v698_v52  ;;  %v3743_v52 = vshrl.u32 %v1638_v16, 7 }
 0x122   : > { %v716_v20 = vpop.permute.xlu1 %715 }
 0x123   : > { %751 = vst.msk [vmem:[#allocation2 + $0x68] sm:$0xff] %vm737_vm4, %v716_v20  ;;  %v700_v53 = vpop.permute.xlu0 %699 }
 0x124   : > { %743 = vst.msk [vmem:[#allocation2 + $0x28] sm:$0xff] %vm737_vm4, %v700_v53 }
 0x126   : > { %v843_v21 = vpop.permute.xlu1 %842 }
 0x127   : > { %879 = vst.msk [vmem:[#allocation2 + $0x60] sm:$0xff] %vm866_vm5, %v843_v21  ;;  %v827_v22 = vpop.permute.xlu0 %826 }
 0x128   : > { %871 = vst.msk [vmem:[#allocation2 + $0x20] sm:$0xff] %vm866_vm5, %v827_v22 }
 0x12a   : > { %v845_v17 = vpop.permute.xlu1 %844 }
 0x12b   : > { %880 = vst.msk [vmem:[#allocation2 + $0x68] sm:$0xff] %vm866_vm5, %v845_v17  ;;  %v829_v23 = vpop.permute.xlu0 %828 }
 0x12c   : > { %872 = vst.msk [vmem:[#allocation2 + $0x28] sm:$0xff] %vm866_vm5, %v829_v23 }
 0x12e   : > { %v973_v19 = vpop.permute.xlu1 %972 }
 0x12f   : > { %1009 = vst.msk [vmem:[#allocation2 + $0x60] sm:$0xff] %vm996_vm6, %v973_v19  ;;  %v957_v24 = vpop.permute.xlu0 %956 }
 0x130   : > { %1001 = vst.msk [vmem:[#allocation2 + $0x20] sm:$0xff] %vm996_vm6, %v957_v24 }
 0x132   : > { %v975_v25 = vpop.permute.xlu1 %974 }
 0x133   : > { %1010 = vst.msk [vmem:[#allocation2 + $0x68] sm:$0xff] %vm996_vm6, %v975_v25  ;;  %v959_v26 = vpop.permute.xlu0 %958 }
 0x134   : > { %1002 = vst.msk [vmem:[#allocation2 + $0x28] sm:$0xff] %vm996_vm6, %v959_v26 }
 0x136   : > { %v1102_v27 = vpop.permute.xlu1 %1101 }
 0x137   : > { %1138 = vst.msk [vmem:[#allocation2 + $0x60] sm:$0xff] %vm1125_vm7, %v1102_v27  ;;  %v1086_v28 = vpop.permute.xlu0 %1085 }
 0x138   : > { %1130 = vst.msk [vmem:[#allocation2 + $0x20] sm:$0xff] %vm1125_vm7, %v1086_v28 }
 0x13a   : > { %v1104_v29 = vpop.permute.xlu1 %1103 }
 0x13b   : > { %1139 = vst.msk [vmem:[#allocation2 + $0x68] sm:$0xff] %vm1125_vm7, %v1104_v29  ;;  %v1088_v30 = vpop.permute.xlu0 %1087 }
 0x13c   : > { %1131 = vst.msk [vmem:[#allocation2 + $0x28] sm:$0xff] %vm1125_vm7, %v1088_v30 }
 0x13e   : > { %v1231_v31 = vpop.permute.xlu1 %1230 }
 0x13f   : > { %1267 = vst.msk [vmem:[#allocation2 + $0x60] sm:$0xff] %vm1254_vm8, %v1231_v31  ;;  %v1215_v32 = vpop.permute.xlu0 %1214 }
 0x140   : > { %1284 = vst.msk [vmem:[#allocation2 + $0x60] sm:$0xff] %vm1271_vm9, %v3117_v39 }
 0x141   : > { %1259 = vst.msk [vmem:[#allocation2 + $0x20] sm:$0xff] %vm1254_vm8, %v1215_v32 }
 0x142   : > { %1276 = vst.msk [vmem:[#allocation2 + $0x20] sm:$0xff] %vm1271_vm9, %v3117_v39  ;;  %v330_v33 = vpop.permute.xlu1 %329 }
 0x143   : > { %364 = vst.msk [vmem:[#allocation2 + $0x70] sm:$0xff] %vm349_vm1, %v330_v33  ;;  %v314_v34 = vpop.permute.xlu0 %313 }
 0x144   : > { %356 = vst.msk [vmem:[#allocation2 + $0x30] sm:$0xff] %vm349_vm1, %v314_v34 }
 0x146   : > { %v1233_v35 = vpop.permute.xlu1 %1232 }
 0x147   : > { %1268 = vst.msk [vmem:[#allocation2 + $0x68] sm:$0xff] %vm1254_vm8, %v1233_v35  ;;  %v1217_v36 = vpop.permute.xlu0 %1216  ;;  %v1300_v37 = vld [vmem:[#allocation2 + $0x60] sm:$0xff] }
 0x148   : > { %1285 = vst.msk [vmem:[#allocation2 + $0x68] sm:$0xff] %vm1271_vm9, %v3117_v39  ;;  %3055 = vmatprep.mubr.msk.bf16.mxu1 %vm1327_vm10, %v1300_v37 }
 0x149   : > { %1260 = vst.msk [vmem:[#allocation2 + $0x28] sm:$0xff] %vm1254_vm8, %v1217_v36  ;;  %v1292_v38 = vld [vmem:[#allocation2 + $0x20] sm:$0xff] }
 0x14a   : > { %1277 = vst.msk [vmem:[#allocation2 + $0x28] sm:$0xff] %vm1271_vm9, %v3117_v39  ;;  %3039 = vmatprep.mubr.msk.bf16.mxu0 %vm1327_vm10, %v1292_v38  ;;  %v332_v4 = vpop.permute.xlu1 %331 }
 0x14b   : > { %365 = vst.msk [vmem:[#allocation2 + $0x78] sm:$0xff] %vm349_vm1, %v332_v4  ;;  %v316_v6 = vpop.permute.xlu0 %315 }
 0x14c   : > { %357 = vst.msk [vmem:[#allocation2 + $0x38] sm:$0xff] %vm349_vm1, %v316_v6  ;;  %vm2491_vm1 = vcmask 1045509  }
 0x14e   : > { %v459_v40 = vpop.permute.xlu1 %458 }
 0x14f   : > { %493 = vst.msk [vmem:[#allocation2 + $0x70] sm:$0xff] %vm478_vm2, %v459_v40  ;;  %v443_v41 = vpop.permute.xlu0 %442  ;;  %v1301_v42 = vld [vmem:[#allocation2 + $0x68] sm:$0xff] }
 0x150   : > { %485 = vst.msk [vmem:[#allocation2 + $0x30] sm:$0xff] %vm478_vm2, %v443_v41  ;;  %3056 = vmatmul.mubr.msk.bf16.gmra.mrb[8].mxu1 %vm1327_vm10, %v1301_v42 }
 0x151   : > { %v1293_v43 = vld [vmem:[#allocation2 + $0x28] sm:$0xff] }
 0x152   : > { %3040 = vmatmul.mubr.msk.bf16.gmra.mrb[8].mxu0 %vm1327_vm10, %v1293_v43  ;;  %v461_v44 = vpop.permute.xlu1 %460 }
 0x153   : > { %494 = vst.msk [vmem:[#allocation2 + $0x78] sm:$0xff] %vm478_vm2, %v461_v44  ;;  %v445_v45 = vpop.permute.xlu0 %444 }
 0x154   : > { %486 = vst.msk [vmem:[#allocation2 + $0x38] sm:$0xff] %vm478_vm2, %v445_v45  ;;  %vm2493_vm2 = vcmask 1046534  }
 0x156   : > { %v589_v48 = vpop.permute.xlu1 %588 }
 0x157   : > { %623 = vst.msk [vmem:[#allocation2 + $0x70] sm:$0xff] %vm608_vm3, %v589_v48  ;;  %v573_v49 = vpop.permute.xlu0 %572 }
 0x158   : > { %615 = vst.msk [vmem:[#allocation2 + $0x30] sm:$0xff] %vm608_vm3, %v573_v49 }
 0x15a   : > { %v591_v50 = vpop.permute.xlu1 %590 }
 0x15b   : > { %624 = vst.msk [vmem:[#allocation2 + $0x78] sm:$0xff] %vm608_vm3, %v591_v50  ;;  %v575_v61 = vpop.permute.xlu0 %574 }
 0x15c   : > { %616 = vst.msk [vmem:[#allocation2 + $0x38] sm:$0xff] %vm608_vm3, %v575_v61  ;;  %vm2495_vm3 = vcmask 1047559  }
 0x15e   : > { %v718_v46 = vpop.permute.xlu1 %717 }
 0x15f   : > { %752 = vst.msk [vmem:[#allocation2 + $0x70] sm:$0xff] %vm737_vm4, %v718_v46  ;;  %v702_v47 = vpop.permute.xlu0 %701 }
 0x160   : > { %744 = vst.msk [vmem:[#allocation2 + $0x30] sm:$0xff] %vm737_vm4, %v702_v47 }
 0x162   : > { %v720_v51 = vpop.permute.xlu1 %719 }
 0x163   : > { %753 = vst.msk [vmem:[#allocation2 + $0x78] sm:$0xff] %vm737_vm4, %v720_v51  ;;  %v704_v54 = vpop.permute.xlu0 %703 }
 0x164   : > { %745 = vst.msk [vmem:[#allocation2 + $0x38] sm:$0xff] %vm737_vm4, %v704_v54 }
 0x166   : > { %v847_v55 = vpop.permute.xlu1 %846 }
 0x167   : > { %881 = vst.msk [vmem:[#allocation2 + $0x70] sm:$0xff] %vm866_vm5, %v847_v55  ;;  %v831_v56 = vpop.permute.xlu0 %830 }
 0x168   : > { %873 = vst.msk [vmem:[#allocation2 + $0x30] sm:$0xff] %vm866_vm5, %v831_v56 }
 0x16a   : > { %v849_v57 = vpop.permute.xlu1 %848 }
 0x16b   : > { %882 = vst.msk [vmem:[#allocation2 + $0x78] sm:$0xff] %vm866_vm5, %v849_v57  ;;  %v833_v58 = vpop.permute.xlu0 %832 }
 0x16c   : > { %874 = vst.msk [vmem:[#allocation2 + $0x38] sm:$0xff] %vm866_vm5, %v833_v58 }
 0x16e   : > { %v977_v59 = vpop.permute.xlu1 %976 }
 0x16f   : > { %1011 = vst.msk [vmem:[#allocation2 + $0x70] sm:$0xff] %vm996_vm6, %v977_v59  ;;  %v961_v60 = vpop.permute.xlu0 %960 }
 0x170   : > { %1003 = vst.msk [vmem:[#allocation2 + $0x30] sm:$0xff] %vm996_vm6, %v961_v60 }
 0x172   : > { %v979_v62 = vpop.permute.xlu1 %978 }
 0x173   : > { %1012 = vst.msk [vmem:[#allocation2 + $0x78] sm:$0xff] %vm996_vm6, %v979_v62  ;;  %v963_v63 = vpop.permute.xlu0 %962 }
 0x174   : > { %1004 = vst.msk [vmem:[#allocation2 + $0x38] sm:$0xff] %vm996_vm6, %v963_v63 }
 0x176   : > { %v1106_v0 = vpop.permute.xlu1 %1105 }
 0x177   : > { %1140 = vst.msk [vmem:[#allocation2 + $0x70] sm:$0xff] %vm1125_vm7, %v1106_v0  ;;  %v1090_v1 = vpop.permute.xlu0 %1089 }
 0x178   : > { %1132 = vst.msk [vmem:[#allocation2 + $0x30] sm:$0xff] %vm1125_vm7, %v1090_v1 }
 0x17a   : > { %v1108_v2 = vpop.permute.xlu1 %1107 }
 0x17b   : > { %1141 = vst.msk [vmem:[#allocation2 + $0x78] sm:$0xff] %vm1125_vm7, %v1108_v2  ;;  %v1092_v5 = vpop.permute.xlu0 %1091 }
 0x17c   : > { %1133 = vst.msk [vmem:[#allocation2 + $0x38] sm:$0xff] %vm1125_vm7, %v1092_v5 }
 0x17e   : > { %v1235_v7 = vpop.permute.xlu1 %1234 }
 0x17f   : > { %1269 = vst.msk [vmem:[#allocation2 + $0x70] sm:$0xff] %vm1254_vm8, %v1235_v7  ;;  %v1219_v8 = vpop.permute.xlu0 %1218 }
 0x180   : > { %1286 = vst.msk [vmem:[#allocation2 + $0x70] sm:$0xff] %vm1271_vm9, %v3117_v39 }
 0x181   : > { %1261 = vst.msk [vmem:[#allocation2 + $0x30] sm:$0xff] %vm1254_vm8, %v1219_v8 }
 0x182   : > { %1278 = vst.msk [vmem:[#allocation2 + $0x30] sm:$0xff] %vm1271_vm9, %v3117_v39  ;;  %v1237_v9 = vpop.permute.xlu1 %1236 }
 0x183   : > { %1270 = vst.msk [vmem:[#allocation2 + $0x78] sm:$0xff] %vm1254_vm8, %v1237_v9  ;;  %v1221_v10 = vpop.permute.xlu0 %1220 }
 0x184   : > { %1287 = vst.msk [vmem:[#allocation2 + $0x78] sm:$0xff] %vm1271_vm9, %v3117_v39 }
 0x185   : > { %1262 = vst.msk [vmem:[#allocation2 + $0x38] sm:$0xff] %vm1254_vm8, %v1221_v10 }
 0x186   : > { %1279 = vst.msk [vmem:[#allocation2 + $0x38] sm:$0xff] %vm1271_vm9, %v3117_v39  ;;  %v1637_v39 = vunpack.c.0.s8 %v1636_v15 }
 0x187   : > { %v1302_v11 = vld [vmem:[#allocation2 + $0x70] sm:$0xff] }
 0x188   : > { %3059 = vmatprep.mubr.msk.bf16.mxu1 %vm1327_vm10, %v1302_v11  ;;  %v3749_v24 = vsub.s32 %v1637_v39, %v3743_v52 }
 0x189   : > { %v1294_v12 = vld [vmem:[#allocation2 + $0x30] sm:$0xff] }
 0x18a   : > { %3043 = vmatprep.mubr.msk.bf16.mxu0 %vm1327_vm10, %v1294_v12 }
 0x18b   : > { %v1303_v3 = vld [vmem:[#allocation2 + $0x78] sm:$0xff] }
 0x18c   : > { %3060 = vmatmul.mubr.msk.bf16.gmra.mrb[12].mxu1 %vm1327_vm10, %v1303_v3 }
 0x18d   : > { %v1295_v13 = vld [vmem:[#allocation2 + $0x38] sm:$0xff] }
 0x18e   : > { %3044 = vmatmul.mubr.msk.bf16.gmra.mrb[12].mxu0 %vm1327_vm10, %v1295_v13 }
 0x1a3   : > { %v3049_v53 = vpop.f32.mrb[0].mxu1 }
 0x1a4   : > { %v1483_v22 = vadd.f32 %v3049_v53, %v3741_v18  ;;  %v1474_v23 = vpop.f32.mrb[1].mxu1 }
 0x1a5   : > { %v3033_v20 = vpop.f32.mrb[0].mxu0  ;;  %v1475_v25 = vadd.f32 %v3741_v18, %v1474_v23  ;;  %v3050_v27 = vpop.f32.mrb[2].mxu1 }
 0x1a6   : > { %v1419_v21 = vadd.f32 %v3033_v20, %v3741_v18  ;;  %v1410_v17 = vpop.f32.mrb[1].mxu0  ;;  %v1555_v29 = vmax.f32 %v1483_v22, 0.0  ;;  %v1486_v31 = vadd.f32 %v3050_v27, %v3741_v18  ;;  %v1477_v33 = vpop.f32.mrb[3].mxu1 }
 0x1a7   : > { %v1411_v19 = vadd.f32 %v3741_v18, %v1410_v17  ;;  %v3034_v26 = vpop.f32.mrb[2].mxu0  ;;  %v1553_v35 = vmax.f32 %v1475_v25, 0.0  ;;  %v1478_v37 = vadd.f32 %v3741_v18, %v1477_v33 }
 0x1a8   : > { %v1539_v28 = vmax.f32 %v1419_v21, 0.0  ;;  %v1422_v30 = vadd.f32 %v3034_v26, %v3741_v18  ;;  %v1413_v32 = vpop.f32.mrb[3].mxu0  ;;  %v1595_v4 = vsel %vm1569_vm11, %v1555_v29, -inf  ;;  %v1556_v40 = vmax.f32 %v1486_v31, 0.0 }
 0x1a9   : > { %v1537_v34 = vmax.f32 %v1411_v19, 0.0  ;;  %v1414_v36 = vadd.f32 %v3741_v18, %v1413_v32  ;;  %v1594_v42 = vsel %vm1569_vm11, %v1553_v35, -inf  ;;  %v1554_v44 = vmax.f32 %v1478_v37, 0.0 }
 0x1aa   : > { %v1571_v38 = vsel %vm1569_vm11, %v1539_v28, -inf  ;;  %v1540_v6 = vmax.f32 %v1422_v30, 0.0  ;;  %v1596_v48 = vmax.f32 %v1594_v42, %v1595_v4  ;;  %v1598_v50 = vsel %vm1569_vm11, %v1556_v40, -inf }
 0x1ab   : > { %v1570_v41 = vsel %vm1569_vm11, %v1537_v34, -inf  ;;  %v1538_v43 = vmax.f32 %v1414_v36, 0.0  ;;  %v1597_v46 = vsel %vm1569_vm11, %v1554_v44, -inf }
 0x1ac   : > { %v1572_v45 = vmax.f32 %v1570_v41, %v1571_v38  ;;  %v1574_v49 = vsel %vm1569_vm11, %v1540_v6, -inf  ;;  %v1770_v54 = vcombine.high %v1596_v48, %v1596_v48  ;;  %v1777_v55 = vrot.slane %v1596_v48, %v3749_v24 }
 0x1ad   : > { %v1573_v61 = vsel %vm1569_vm11, %v1538_v43, -inf  ;;  %v3766_v57 = vmax.f32 %v1597_v46, %v1598_v50 }
 0x1ae   : > { %v1634_v47 = vcombine.high %v1572_v45, %v1572_v45  ;;  %v1641_v51 = vrot.slane %v1572_v45, %v3749_v24  ;;  %v1575_v56 = vmax.f32 %v1573_v61, %v1574_v49  ;;  %v1784_v62 = vrot.slane %v1770_v54, %v3749_v24 }
 0x1af   : > { %v1785_v0 = vcombine.high %v1777_v55, %v1777_v55  ;;  %v2195_v1 = vsel %vm1970_vm12, %v1777_v55, -inf }
 0x1b0   : > { %v1648_v58 = vrot.slane %v1634_v47, %v3749_v24  ;;  %v1649_v59 = vcombine.high %v1641_v51, %v1641_v51  ;;  %v1971_v60 = vsel %vm1970_vm12, %v1641_v51, -inf  ;;  %v1786_v8 = vcombine.high %v1784_v62, %v1784_v62 }
 0x1b1   : > { %v1972_v63 = vrot.slane %v1971_v60, 4  ;;  %v2196_v12 = vrot.slane %v2195_v1, 4  ;;  %v2202_v13 = vsel %vm1970_vm12, %v1785_v0, -inf  ;;  %v2209_v14 = vsel %vm1970_vm12, %v1784_v62, -inf }
 0x1b2   : > { %v1650_v2 = vcombine.high %v1648_v58, %v1648_v58  ;;  %v1978_v5 = vsel %vm1970_vm12, %v1649_v59, -inf  ;;  %v1985_v7 = vsel %vm1970_vm12, %v1648_v58, -inf  ;;  %v2216_v15 = vsel %vm1970_vm12, %v1786_v8, -inf }
 0x1b3   : > { %v1973_v9 = vmax.f32 %v1971_v60, %v1972_v63  ;;  %v1979_v10 = vrot.slane %v1978_v5, 4  ;;  %v1986_v11 = vrot.slane %v1985_v7, 4  ;;  %v2197_v21 = vmax.f32 %v2195_v1, %v2196_v12 }
 0x1b4   : > { %v1992_v3 = vsel %vm1970_vm12, %v1650_v2, -inf  ;;  %v2203_v22 = vrot.slane %v2202_v13, 4  ;;  %v2210_v17 = vrot.slane %v2209_v14, 4  ;;  %v2217_v23 = vrot.slane %v2216_v15, 4 }
 0x1b5   : > { %v1974_v16 = vrot.slane %v1973_v9, 2  ;;  %v1980_v39 = vmax.f32 %v1978_v5, %v1979_v10  ;;  %v1987_v20 = vmax.f32 %v1985_v7, %v1986_v11  ;;  %v1993_v53 = vrot.slane %v1992_v3, 4 }
 0x1b6   : > { %v2198_v28 = vrot.slane %v2197_v21, 2  ;;  %v2204_v29 = vmax.f32 %v2202_v13, %v2203_v22  ;;  %v2211_v30 = vmax.f32 %v2209_v14, %v2210_v17  ;;  %v2218_v31 = vmax.f32 %v2216_v15, %v2217_v23 }
 0x1b7   : > { %v1975_v19 = vmax.f32 %v1973_v9, %v1974_v16  ;;  %v1981_v25 = vrot.slane %v1980_v39, 2  ;;  %v1988_v26 = vrot.slane %v1987_v20, 2  ;;  %v1994_v27 = vmax.f32 %v1992_v3, %v1993_v53 }
 0x1b8   : > { %v2199_v36 = vmax.f32 %v2197_v21, %v2198_v28  ;;  %v2205_v37 = vrot.slane %v2204_v29, 2  ;;  %v2212_v38 = vrot.slane %v2211_v30, 2  ;;  %v2219_v40 = vrot.slane %v2218_v31, 2 }
 0x1b9   : > { %v1982_v32 = vmax.f32 %v1980_v39, %v1981_v25  ;;  %v1989_v33 = vmax.f32 %v1987_v20, %v1988_v26  ;;  %v1995_v34 = vrot.slane %v1994_v27, 2  ;;  %v1976_v35 = vrot.slane %v1975_v19, 1 }
 0x1ba   : > { %v1651_v41 = vcombine.high %v1575_v56, %v1575_v56  ;;  %v2206_v43 = vmax.f32 %v2204_v29, %v2205_v37  ;;  %v2213_v44 = vmax.f32 %v2211_v30, %v2212_v38  ;;  %v1658_v45 = vrot.slane %v1575_v56, %v3749_v24 }
 0x1bb   : > { %v1983_v4 = vrot.slane %v1982_v32, 1  ;;  %v1996_v6 = vmax.f32 %v1994_v27, %v1995_v34  ;;  %v1990_v42 = vrot.slane %v1989_v33, 1  ;;  %v1977_v48 = vmax.f32 %v1975_v19, %v1976_v35 }
 0x1bc   : > { %v2200_v50 = vrot.slane %v2199_v36, 1  ;;  %v2220_v46 = vmax.f32 %v2218_v31, %v2219_v40  ;;  %v1665_v47 = vrot.slane %v1651_v41, %v3749_v24  ;;  %v1666_v51 = vcombine.high %v1658_v45, %v1658_v45 }
 0x1bd   : > { %v1984_v49 = vmax.f32 %v1982_v32, %v1983_v4  ;;  %v1997_v61 = vrot.slane %v1996_v6, 1  ;;  %v1991_v54 = vmax.f32 %v1989_v33, %v1990_v42  ;;  %v2207_v55 = vrot.slane %v2206_v43, 1 }
 0x1be   : > { %v2214_v58 = vrot.slane %v2213_v44, 1  ;;  %v1999_v59 = vsel %vm1970_vm12, %v1658_v45, -inf  ;;  %v2006_v60 = vsel %vm1970_vm12, %v1666_v51, -inf  ;;  %v2013_v56 = vsel %vm1970_vm12, %v1665_v47, -inf }
 0x1bf   : > { %v2484_v62 = vsel %vm2483_vm13, %v1984_v49, %v1977_v48  ;;  %v2000_v63 = vrot.slane %v1999_v59, 4  ;;  %v2007_v0 = vrot.slane %v2006_v60, 4  ;;  %v2014_v1 = vrot.slane %v2013_v56, 4 }
 0x1c0   : > { %v1998_v2 = vmax.f32 %v1996_v6, %v1997_v61  ;;  %v2201_v5 = vmax.f32 %v2199_v36, %v2200_v50  ;;  %v2221_v7 = vrot.slane %v2220_v46, 1  ;;  %v1787_v8 = vcombine.high %v3766_v57, %v3766_v57 }
 0x1c1   : > { %v2208_v9 = vmax.f32 %v2206_v43, %v2207_v55  ;;  %v2001_v10 = vmax.f32 %v1999_v59, %v2000_v63  ;;  %v2008_v11 = vmax.f32 %v2006_v60, %v2007_v0  ;;  %v2015_v12 = vmax.f32 %v2013_v56, %v2014_v1 }
 0x1c2   : > { %v2486_v3 = vsel %vm2485_vm14, %v1991_v54, %v2484_v62  ;;  %v1667_v13 = vcombine.high %v1665_v47, %v1665_v47  ;;  %v1794_v14 = vrot.slane %v3766_v57, %v3749_v24  ;;  %v1801_v15 = vrot.slane %v1787_v8, %v3749_v24 }
 0x1c3   : > { %v2215_v16 = vmax.f32 %v2213_v44, %v2214_v58  ;;  %v2002_v39 = vrot.slane %v2001_v10, 2  ;;  %v2009_v20 = vrot.slane %v2008_v11, 2  ;;  %v2016_v53 = vrot.slane %v2015_v12, 2 }
 0x1c4   : > { %v1802_v21 = vcombine.high %v1794_v14, %v1794_v14  ;;  %v1803_v22 = vcombine.high %v1801_v15, %v1801_v15  ;;  %v2223_v17 = vsel %vm1970_vm12, %v1794_v14, -inf  ;;  %v2237_v23 = vsel %vm1970_vm12, %v1801_v15, -inf }
 0x1c5   : > { %v2518_v19 = vsel %vm2483_vm13, %v2208_v9, %v2201_v5  ;;  %v2003_v25 = vmax.f32 %v2001_v10, %v2002_v39  ;;  %v2010_v26 = vmax.f32 %v2008_v11, %v2009_v20  ;;  %v2017_v27 = vmax.f32 %v2015_v12, %v2016_v53 }
 0x1c6   : > { %v2020_v28 = vsel %vm1970_vm12, %v1667_v13, -inf  ;;  %v2224_v57 = vrot.slane %v2223_v17, 4  ;;  %v2230_v29 = vsel %vm1970_vm12, %v1802_v21, -inf  ;;  %v2238_v30 = vrot.slane %v2237_v23, 4 }
 0x1c7   : > { %v2004_v31 = vrot.slane %v2003_v25, 1  ;;  %v2011_v32 = vrot.slane %v2010_v26, 1  ;;  %v2018_v33 = vrot.slane %v2017_v27, 1  ;;  %v2488_v34 = vsel %vm2487_vm15, %v1998_v2, %v2486_v3 }
 0x1c8   : > { %v2225_v35 = vmax.f32 %v2223_v17, %v2224_v57  ;;  %v2231_v36 = vrot.slane %v2230_v29, 4  ;;  %v2239_v37 = vmax.f32 %v2237_v23, %v2238_v30  ;;  %v2244_v38 = vsel %vm1970_vm12, %v1803_v22, -inf }
 0x1c9   : > { %v2005_v4 = vmax.f32 %v2003_v25, %v2004_v31  ;;  %v2012_v6 = vmax.f32 %v2010_v26, %v2011_v32  ;;  %v2019_v40 = vmax.f32 %v2017_v27, %v2018_v33  ;;  %v2021_v41 = vrot.slane %v2020_v28, 4 }
 0x1ca   : > { %v2226_v42 = vrot.slane %v2225_v35, 2  ;;  %v2232_v43 = vmax.f32 %v2230_v29, %v2231_v36  ;;  %v2240_v44 = vrot.slane %v2239_v37, 2  ;;  %v2222_v45 = vmax.f32 %v2220_v46, %v2221_v7 }
 0x1cb   : > { %v2519_v48 = vsel %vm2485_vm14, %v2215_v16, %v2518_v19  ;;  %v2490_v49 = vsel %vm2489_vm0, %v2005_v4, %v2488_v34  ;;  %v2245_v50 = vrot.slane %v2244_v38, 4  ;;  %v2022_v58 = vmax.f32 %v2020_v28, %v2021_v41 }
 0x1cc   : > { %v2492_v61 = vsel %vm2491_vm1, %v2012_v6, %v2490_v49  ;;  %v2227_v47 = vmax.f32 %v2225_v35, %v2226_v42  ;;  %v2233_v51 = vrot.slane %v2232_v43, 2  ;;  %v2241_v54 = vmax.f32 %v2239_v37, %v2240_v44 }
 0x1cd   : > { %v3801_v55 = vsel %vm2493_vm2, %v2019_v40, %v2492_v61  ;;  %v2246_v62 = vmax.f32 %v2244_v38, %v2245_v50  ;;  %v2520_v46 = vsel %vm2487_vm15, %v2222_v45, %v2519_v48  ;;  %v2023_v2 = vrot.slane %v2022_v58, 2 }
 0x1ce   : > { %v2228_v59 = vrot.slane %v2227_v47, 1  ;;  %v2234_v60 = vmax.f32 %v2232_v43, %v2233_v51  ;;  %v2242_v56 = vrot.slane %v2241_v54, 1 }
 0x1cf   : > { %v2247_v8 = vrot.slane %v2246_v62, 2  ;;  %v2024_v11 = vmax.f32 %v2022_v58, %v2023_v2 }
 0x1d0   : > { %v2229_v63 = vmax.f32 %v2227_v47, %v2228_v59  ;;  %v2235_v0 = vrot.slane %v2234_v60, 1  ;;  %v2243_v1 = vmax.f32 %v2241_v54, %v2242_v56 }
 0x1d1   : > { %v2248_v12 = vmax.f32 %v2246_v62, %v2247_v8  ;;  %v2025_v16 = vrot.slane %v2024_v11, 1 }
 0x1d2   : > { %v2236_v5 = vmax.f32 %v2234_v60, %v2235_v0  ;;  %v2521_v7 = vsel %vm2489_vm0, %v2229_v63, %v2520_v46 }
 0x1d3   : > { %v2249_v22 = vrot.slane %v2248_v12, 1  ;;  %v3828_v61 = vmax.f32 %v2024_v11, %v2025_v16 }
 0x1d4   : > { %v2522_v9 = vsel %vm2491_vm1, %v2236_v5, %v2521_v7 }
 0x1d5   : > { %v3807_v10 = vsel %vm2493_vm2, %v2243_v1, %v2522_v9  ;;  %v3833_v58 = vmax.f32 %v2248_v12, %v2249_v22 }
 0x1e3   : > { %v3053_v3 = vpop.f32.mrb[4].mxu1 }
 0x1e4   : > { %v1499_v14 = vadd.f32 %v3053_v3, %v3741_v18  ;;  %v1490_v15 = vpop.f32.mrb[5].mxu1 }
 0x1e5   : > { %v3037_v13 = vpop.f32.mrb[4].mxu0  ;;  %v1491_v53 = vadd.f32 %v3741_v18, %v1490_v15  ;;  %v3054_v21 = vpop.f32.mrb[6].mxu1 }
 0x1e6   : > { %v1435_v39 = vadd.f32 %v3037_v13, %v3741_v18  ;;  %v1426_v20 = vpop.f32.mrb[5].mxu0  ;;  %v1559_v17 = vmax.f32 %v1499_v14, 0.0  ;;  %v1502_v25 = vadd.f32 %v3054_v21, %v3741_v18  ;;  %v1493_v26 = vpop.f32.mrb[7].mxu1 }
 0x1e7   : > { %v1427_v23 = vadd.f32 %v3741_v18, %v1426_v20  ;;  %v3038_v19 = vpop.f32.mrb[6].mxu0  ;;  %v1557_v28 = vmax.f32 %v1491_v53, 0.0  ;;  %v1494_v30 = vadd.f32 %v3741_v18, %v1493_v26 }
 0x1e8   : > { %v1543_v27 = vmax.f32 %v1435_v39, 0.0  ;;  %v1438_v57 = vadd.f32 %v3038_v19, %v3741_v18  ;;  %v1429_v29 = vpop.f32.mrb[7].mxu0  ;;  %v1601_v31 = vsel %vm1569_vm11, %v1559_v17, -inf  ;;  %v1560_v33 = vmax.f32 %v1502_v25, 0.0 }
 0x1e9   : > { %v1541_v32 = vmax.f32 %v1427_v23, 0.0  ;;  %v1430_v34 = vadd.f32 %v3741_v18, %v1429_v29  ;;  %v1600_v36 = vsel %vm1569_vm11, %v1557_v28, -inf  ;;  %v1558_v38 = vmax.f32 %v1494_v30, 0.0 }
 0x1ea   : > { %v1577_v35 = vsel %vm1569_vm11, %v1543_v27, -inf  ;;  %v1544_v37 = vmax.f32 %v1438_v57, 0.0  ;;  %v1602_v6 = vmax.f32 %v1600_v36, %v1601_v31  ;;  %v1604_v40 = vsel %vm1569_vm11, %v1560_v33, -inf }
 0x1eb   : > { %v1576_v4 = vsel %vm1569_vm11, %v1541_v32, -inf  ;;  %v1542_v41 = vmax.f32 %v1430_v34, 0.0  ;;  %v1603_v44 = vsel %vm1569_vm11, %v1558_v38, -inf }
 0x1ec   : > { %v1578_v42 = vmax.f32 %v1576_v4, %v1577_v35  ;;  %v1580_v43 = vsel %vm1569_vm11, %v1544_v37, -inf  ;;  %v1804_v45 = vcombine.high %v1602_v6, %v1602_v6  ;;  %v1811_v48 = vrot.slane %v1602_v6, %v3749_v24 }
 0x1ed   : > { %v1579_v49 = vsel %vm1569_vm11, %v1542_v41, -inf  ;;  %v3826_v50 = vmax.f32 %v1603_v44, %v1604_v40 }
 0x1ee   : > { %v1668_v47 = vcombine.high %v1578_v42, %v1578_v42  ;;  %v1675_v51 = vrot.slane %v1578_v42, %v3749_v24  ;;  %v3831_v54 = vmax.f32 %v1579_v49, %v1580_v43  ;;  %v1818_v59 = vrot.slane %v1804_v45, %v3749_v24 }
 0x1ef   : > { %v1819_v60 = vcombine.high %v1811_v48, %v1811_v48  ;;  %v2251_v56 = vsel %vm1970_vm12, %v1811_v48, -inf }
 0x1f0   : > { %v1682_v62 = vrot.slane %v1668_v47, %v3749_v24  ;;  %v1683_v46 = vcombine.high %v1675_v51, %v1675_v51  ;;  %v2027_v63 = vsel %vm1970_vm12, %v1675_v51, -inf  ;;  %v2252_v0 = vrot.slane %v2251_v56, 4 }
 0x1f1   : > { %v2028_v1 = vrot.slane %v2027_v63, 4  ;;  %v1820_v2 = vcombine.high %v1818_v59, %v1818_v59  ;;  %v2258_v5 = vsel %vm1970_vm12, %v1819_v60, -inf  ;;  %v2265_v7 = vsel %vm1970_vm12, %v1818_v59, -inf }
 0x1f2   : > { %v1684_v8 = vcombine.high %v1682_v62, %v1682_v62  ;;  %v2034_v9 = vsel %vm1970_vm12, %v1683_v46, -inf  ;;  %v2041_v11 = vsel %vm1970_vm12, %v1682_v62, -inf  ;;  %v2253_v12 = vmax.f32 %v2251_v56, %v2252_v0 }
 0x1f3   : > { %v2029_v3 = vmax.f32 %v2027_v63, %v2028_v1  ;;  %v2035_v13 = vrot.slane %v2034_v9, 4  ;;  %v2042_v14 = vrot.slane %v2041_v11, 4  ;;  %v2259_v15 = vrot.slane %v2258_v5, 4 }
 0x1f4   : > { %v2048_v16 = vsel %vm1970_vm12, %v1684_v8, -inf  ;;  %v2254_v39 = vrot.slane %v2253_v12, 2  ;;  %v2266_v20 = vrot.slane %v2265_v7, 4  ;;  %v2272_v53 = vsel %vm1970_vm12, %v1820_v2, -inf }
 0x1f5   : > { %v2030_v21 = vrot.slane %v2029_v3, 2  ;;  %v2036_v22 = vmax.f32 %v2034_v9, %v2035_v13  ;;  %v2043_v17 = vmax.f32 %v2041_v11, %v2042_v14  ;;  %v2049_v23 = vrot.slane %v2048_v16, 4 }
 0x1f6   : > { %v2255_v19 = vmax.f32 %v2253_v12, %v2254_v39  ;;  %v2260_v25 = vmax.f32 %v2258_v5, %v2259_v15  ;;  %v2267_v26 = vmax.f32 %v2265_v7, %v2266_v20  ;;  %v2273_v27 = vrot.slane %v2272_v53, 4 }
 0x1f7   : > { %v2031_v28 = vmax.f32 %v2029_v3, %v2030_v21  ;;  %v2037_v57 = vrot.slane %v2036_v22, 2  ;;  %v2044_v29 = vrot.slane %v2043_v17, 2  ;;  %v2050_v30 = vmax.f32 %v2048_v16, %v2049_v23 }
 0x1f8   : > { %v2256_v31 = vrot.slane %v2255_v19, 1  ;;  %v2261_v32 = vrot.slane %v2260_v25, 2  ;;  %v2268_v33 = vrot.slane %v2267_v26, 2  ;;  %v2274_v34 = vmax.f32 %v2272_v53, %v2273_v27 }
 0x1f9   : > { %v2032_v35 = vrot.slane %v2031_v28, 1  ;;  %v2038_v36 = vmax.f32 %v2036_v22, %v2037_v57  ;;  %v2045_v37 = vmax.f32 %v2043_v17, %v2044_v29  ;;  %v2051_v38 = vrot.slane %v2050_v30, 2 }
 0x1fa   : > { %v2257_v4 = vmax.f32 %v2255_v19, %v2256_v31  ;;  %v2262_v6 = vmax.f32 %v2260_v25, %v2261_v32  ;;  %v2269_v40 = vmax.f32 %v2267_v26, %v2268_v33  ;;  %v2275_v41 = vrot.slane %v2274_v34, 2 }
 0x1fb   : > { %v2033_v42 = vmax.f32 %v2031_v28, %v2032_v35  ;;  %v2039_v43 = vrot.slane %v2038_v36, 1  ;;  %v2046_v44 = vrot.slane %v2045_v37, 1  ;;  %v2052_v45 = vmax.f32 %v2050_v30, %v2051_v38 }
 0x1fc   : > { %v2263_v48 = vrot.slane %v2262_v6, 1  ;;  %v2270_v49 = vrot.slane %v2269_v40, 1  ;;  %v2276_v47 = vmax.f32 %v2274_v34, %v2275_v41  ;;  %v1685_v51 = vcombine.high %v3831_v54, %v3831_v54 }
 0x1fd   : > { %v2040_v59 = vmax.f32 %v2038_v36, %v2039_v43  ;;  %v2047_v60 = vmax.f32 %v2045_v37, %v2046_v44  ;;  %v2053_v56 = vrot.slane %v2052_v45, 1  ;;  %v1692_v62 = vrot.slane %v3831_v54, %v3749_v24 }
 0x1fe   : > { %v2264_v46 = vmax.f32 %v2262_v6, %v2263_v48  ;;  %v2271_v63 = vmax.f32 %v2269_v40, %v2270_v49  ;;  %v2277_v0 = vrot.slane %v2276_v47, 1  ;;  %v1699_v1 = vrot.slane %v1685_v51, %v3749_v24 }
 0x1ff   : > { %v2497_v2 = vsel %vm2483_vm13, %v2040_v59, %v2033_v42  ;;  %v1700_v5 = vcombine.high %v1692_v62, %v1692_v62  ;;  %v2055_v7 = vsel %vm1970_vm12, %v1692_v62, -inf  ;;  %v1821_v8 = vcombine.high %v3826_v50, %v3826_v50 }
 0x200   : > { %v2054_v9 = vmax.f32 %v2052_v45, %v2053_v56  ;;  %v2498_v11 = vsel %vm2485_vm14, %v2047_v60, %v2497_v2  ;;  %v2525_v12 = vsel %vm2483_vm13, %v2264_v46, %v2257_v4  ;;  %v1701_v3 = vcombine.high %v1699_v1, %v1699_v1 }
 0x201   : > { %v3856_v54 = vmax.f32 %v2276_v47, %v2277_v0  ;;  %v2056_v13 = vrot.slane %v2055_v7, 4  ;;  %v2062_v14 = vsel %vm1970_vm12, %v1700_v5, -inf  ;;  %v2069_v15 = vsel %vm1970_vm12, %v1699_v1, -inf }
 0x202   : > { %v2526_v16 = vsel %vm2485_vm14, %v2271_v63, %v2525_v12  ;;  %v2063_v39 = vrot.slane %v2062_v14, 4  ;;  %v2070_v20 = vrot.slane %v2069_v15, 4  ;;  %v2076_v53 = vsel %vm1970_vm12, %v1701_v3, -inf }
 0x203   : > { %v2057_v21 = vmax.f32 %v2055_v7, %v2056_v13  ;;  %v2077_v22 = vrot.slane %v2076_v53, 4  ;;  %v1828_v17 = vrot.slane %v3826_v50, %v3749_v24  ;;  %v1835_v23 = vrot.slane %v1821_v8, %v3749_v24 }
 0x204   : > { %v2064_v19 = vmax.f32 %v2062_v14, %v2063_v39  ;;  %v2071_v25 = vmax.f32 %v2069_v15, %v2070_v20  ;;  %v2499_v26 = vsel %vm2487_vm15, %v2054_v9, %v2498_v11  ;;  %v3875_v11 = vsel %vm2495_vm3, %v3828_v61, %v3801_v55 }
 0x205   : > { %v2058_v27 = vrot.slane %v2057_v21, 2  ;;  %v2078_v28 = vmax.f32 %v2076_v53, %v2077_v22  ;;  %v1836_v57 = vcombine.high %v1828_v17, %v1828_v17  ;;  %v1837_v29 = vcombine.high %v1835_v23, %v1835_v23 }
 0x206   : > { %v2065_v30 = vrot.slane %v2064_v19, 2  ;;  %v2072_v31 = vrot.slane %v2071_v25, 2  ;;  %v2279_v32 = vsel %vm1970_vm12, %v1828_v17, -inf  ;;  %v2293_v33 = vsel %vm1970_vm12, %v1835_v23, -inf }
 0x207   : > { %v2059_v34 = vmax.f32 %v2057_v21, %v2058_v27  ;;  %v2079_v35 = vrot.slane %v2078_v28, 2  ;;  %v2280_v50 = vrot.slane %v2279_v32, 4  ;;  %v2286_v36 = vsel %vm1970_vm12, %v1836_v57, -inf }
 0x208   : > { %v2066_v37 = vmax.f32 %v2064_v19, %v2065_v30  ;;  %v2073_v38 = vmax.f32 %v2071_v25, %v2072_v31  ;;  %v2287_v4 = vrot.slane %v2286_v36, 4  ;;  %v2294_v6 = vrot.slane %v2293_v33, 4 }
 0x209   : > { %v2060_v40 = vrot.slane %v2059_v34, 1  ;;  %v2080_v41 = vmax.f32 %v2078_v28, %v2079_v35  ;;  %v2281_v42 = vmax.f32 %v2279_v32, %v2280_v50  ;;  %v2300_v43 = vsel %vm1970_vm12, %v1837_v29, -inf }
 0x20a   : > { %v2067_v44 = vrot.slane %v2066_v37, 1  ;;  %v2074_v45 = vrot.slane %v2073_v38, 1  ;;  %v2288_v48 = vmax.f32 %v2286_v36, %v2287_v4  ;;  %v2295_v49 = vmax.f32 %v2293_v33, %v2294_v6 }
 0x20b   : > { %v2061_v47 = vmax.f32 %v2059_v34, %v2060_v40  ;;  %v2081_v51 = vrot.slane %v2080_v41, 1  ;;  %v2282_v59 = vrot.slane %v2281_v42, 2  ;;  %v2301_v60 = vrot.slane %v2300_v43, 4 }
 0x20c   : > { %v2068_v56 = vmax.f32 %v2066_v37, %v2067_v44  ;;  %v2075_v62 = vmax.f32 %v2073_v38, %v2074_v45  ;;  %v2289_v46 = vrot.slane %v2288_v48, 2  ;;  %v2296_v63 = vrot.slane %v2295_v49, 2 }
 0x20d   : > { %v2082_v0 = vmax.f32 %v2080_v41, %v2081_v51  ;;  %v2500_v1 = vsel %vm2489_vm0, %v2061_v47, %v2499_v26  ;;  %v2283_v2 = vmax.f32 %v2281_v42, %v2282_v59  ;;  %v2302_v5 = vmax.f32 %v2300_v43, %v2301_v60 }
 0x20e   : > { %v2501_v7 = vsel %vm2491_vm1, %v2068_v56, %v2500_v1  ;;  %v2290_v8 = vmax.f32 %v2288_v48, %v2289_v46  ;;  %v2297_v9 = vmax.f32 %v2295_v49, %v2296_v63  ;;  %v3881_v14 = vsel %vm2495_vm3, %v3833_v58, %v3807_v10 }
 0x20f   : > { %v2502_v12 = vsel %vm2493_vm2, %v2075_v62, %v2501_v7  ;;  %v2284_v3 = vrot.slane %v2283_v2, 1  ;;  %v2303_v13 = vrot.slane %v2302_v5, 2  ;;  %v2527_v20 = vsel %vm2487_vm15, %v3856_v54, %v2526_v16 }
 0x210   : > { %v2291_v15 = vrot.slane %v2290_v8, 1  ;;  %v2298_v39 = vrot.slane %v2297_v9, 1  ;;  %v3886_v53 = vsel %vm2495_vm3, %v2082_v0, %v2502_v12 }
 0x211   : > { %v2285_v21 = vmax.f32 %v2283_v2, %v2284_v3  ;;  %v2304_v55 = vmax.f32 %v2302_v5, %v2303_v13 }
 0x212   : > { %v2292_v61 = vmax.f32 %v2290_v8, %v2291_v15  ;;  %v2299_v22 = vmax.f32 %v2297_v9, %v2298_v39 }
 0x213   : > { %v2305_v17 = vrot.slane %v2304_v55, 1  ;;  %v2528_v23 = vsel %vm2489_vm0, %v2285_v21, %v2527_v20 }
 0x214   : > { %v2529_v19 = vsel %vm2491_vm1, %v2292_v61, %v2528_v23 }
 0x215   : > { %v2306_v25 = vmax.f32 %v2304_v55, %v2305_v17  ;;  %v2530_v10 = vsel %vm2493_vm2, %v2299_v22, %v2529_v19 }
 0x217   : > { %v3892_v58 = vsel %vm2495_vm3, %v2306_v25, %v2530_v10 }
 0x223   : > { %v3057_v26 = vpop.f32.mrb[8].mxu1 }
 0x224   : > { %v1515_v16 = vadd.f32 %v3057_v26, %v3741_v18  ;;  %v1506_v27 = vpop.f32.mrb[9].mxu1 }
 0x225   : > { %v3041_v54 = vpop.f32.mrb[8].mxu0  ;;  %v1507_v29 = vadd.f32 %v3741_v18, %v1506_v27  ;;  %v3058_v30 = vpop.f32.mrb[10].mxu1 }
 0x226   : > { %v1451_v28 = vadd.f32 %v3041_v54, %v3741_v18  ;;  %v1442_v57 = vpop.f32.mrb[9].mxu0  ;;  %v1563_v31 = vmax.f32 %v1515_v16, 0.0  ;;  %v1518_v34 = vadd.f32 %v3058_v30, %v3741_v18  ;;  %v1509_v35 = vpop.f32.mrb[11].mxu1 }
 0x227   : > { %v1443_v32 = vadd.f32 %v3741_v18, %v1442_v57  ;;  %v3042_v33 = vpop.f32.mrb[10].mxu0  ;;  %v1561_v36 = vmax.f32 %v1507_v29, 0.0  ;;  %v1510_v4 = vadd.f32 %v3741_v18, %v1509_v35 }
 0x228   : > { %v1547_v50 = vmax.f32 %v1451_v28, 0.0  ;;  %v1454_v37 = vadd.f32 %v3042_v33, %v3741_v18  ;;  %v1445_v38 = vpop.f32.mrb[11].mxu0  ;;  %v1607_v6 = vsel %vm1569_vm11, %v1563_v31, -inf  ;;  %v1564_v41 = vmax.f32 %v1518_v34, 0.0 }
 0x229   : > { %v1545_v40 = vmax.f32 %v1443_v32, 0.0  ;;  %v1446_v42 = vadd.f32 %v3741_v18, %v1445_v38  ;;  %v1606_v44 = vsel %vm1569_vm11, %v1561_v36, -inf  ;;  %v1562_v48 = vmax.f32 %v1510_v4, 0.0 }
 0x22a   : > { %v1583_v43 = vsel %vm1569_vm11, %v1547_v50, -inf  ;;  %v1548_v45 = vmax.f32 %v1454_v37, 0.0  ;;  %v1608_v47 = vmax.f32 %v1606_v44, %v1607_v6  ;;  %v1610_v51 = vsel %vm1569_vm11, %v1564_v41, -inf }
 0x22b   : > { %v1582_v49 = vsel %vm1569_vm11, %v1545_v40, -inf  ;;  %v1546_v59 = vmax.f32 %v1446_v42, 0.0  ;;  %v1609_v62 = vsel %vm1569_vm11, %v1562_v48, -inf }
 0x22c   : > { %v1584_v60 = vmax.f32 %v1582_v49, %v1583_v43  ;;  %v1586_v56 = vsel %vm1569_vm11, %v1548_v45, -inf  ;;  %v1838_v46 = vcombine.high %v1608_v47, %v1608_v47  ;;  %v1845_v18 = vrot.slane %v1608_v47, %v3749_v24 }
 0x22d   : > { %v1585_v63 = vsel %vm1569_vm11, %v1546_v59, -inf  ;;  %v3911_v0 = vmax.f32 %v1609_v62, %v1610_v51 }
 0x22e   : > { %v1702_v1 = vcombine.high %v1584_v60, %v1584_v60  ;;  %v1709_v2 = vrot.slane %v1584_v60, %v3749_v24  ;;  %v3914_v5 = vmax.f32 %v1585_v63, %v1586_v56  ;;  %v1852_v7 = vrot.slane %v1838_v46, %v3749_v24 }
 0x22f   : > { %v1853_v8 = vcombine.high %v1845_v18, %v1845_v18  ;;  %v2307_v9 = vsel %vm1970_vm12, %v1845_v18, -inf }
 0x230   : > { %v1716_v12 = vrot.slane %v1702_v1, %v3749_v24  ;;  %v1717_v3 = vcombine.high %v1709_v2, %v1709_v2  ;;  %v2083_v13 = vsel %vm1970_vm12, %v1709_v2, -inf  ;;  %v2308_v15 = vrot.slane %v2307_v9, 4 }
 0x231   : > { %v2084_v39 = vrot.slane %v2083_v13, 4  ;;  %v1854_v20 = vcombine.high %v1852_v7, %v1852_v7  ;;  %v2314_v21 = vsel %vm1970_vm12, %v1853_v8, -inf  ;;  %v2321_v55 = vsel %vm1970_vm12, %v1852_v7, -inf }
 0x232   : > { %v1718_v61 = vcombine.high %v1716_v12, %v1716_v12  ;;  %v2090_v22 = vsel %vm1970_vm12, %v1717_v3, -inf  ;;  %v2097_v17 = vsel %vm1970_vm12, %v1716_v12, -inf  ;;  %v2309_v23 = vmax.f32 %v2307_v9, %v2308_v15 }
 0x233   : > { %v2085_v19 = vmax.f32 %v2083_v13, %v2084_v39  ;;  %v2091_v25 = vrot.slane %v2090_v22, 4  ;;  %v2098_v10 = vrot.slane %v2097_v17, 4  ;;  %v2315_v26 = vrot.slane %v2314_v21, 4 }
 0x234   : > { %v2104_v54 = vsel %vm1970_vm12, %v1718_v61, -inf  ;;  %v2310_v16 = vrot.slane %v2309_v23, 2  ;;  %v2322_v27 = vrot.slane %v2321_v55, 4  ;;  %v2328_v28 = vsel %vm1970_vm12, %v1854_v20, -inf }
 0x235   : > { %v2086_v57 = vrot.slane %v2085_v19, 2  ;;  %v2092_v29 = vmax.f32 %v2090_v22, %v2091_v25  ;;  %v2099_v30 = vmax.f32 %v2097_v17, %v2098_v10  ;;  %v2105_v31 = vrot.slane %v2104_v54, 4 }
 0x236   : > { %v2311_v32 = vmax.f32 %v2309_v23, %v2310_v16  ;;  %v2316_v33 = vmax.f32 %v2314_v21, %v2315_v26  ;;  %v2323_v34 = vmax.f32 %v2321_v55, %v2322_v27  ;;  %v2329_v35 = vrot.slane %v2328_v28, 4 }
 0x237   : > { %v2087_v50 = vmax.f32 %v2085_v19, %v2086_v57  ;;  %v2093_v36 = vrot.slane %v2092_v29, 2  ;;  %v2100_v37 = vrot.slane %v2099_v30, 2  ;;  %v2106_v38 = vmax.f32 %v2104_v54, %v2105_v31 }
 0x238   : > { %v2312_v4 = vrot.slane %v2311_v32, 1  ;;  %v2317_v6 = vrot.slane %v2316_v33, 2  ;;  %v2324_v40 = vrot.slane %v2323_v34, 2  ;;  %v2330_v41 = vmax.f32 %v2328_v28, %v2329_v35 }
 0x239   : > { %v2088_v42 = vrot.slane %v2087_v50, 1  ;;  %v2094_v43 = vmax.f32 %v2092_v29, %v2093_v36  ;;  %v2101_v44 = vmax.f32 %v2099_v30, %v2100_v37  ;;  %v2107_v45 = vrot.slane %v2106_v38, 2 }
 0x23a   : > { %v2313_v48 = vmax.f32 %v2311_v32, %v2312_v4  ;;  %v2318_v49 = vmax.f32 %v2316_v33, %v2317_v6  ;;  %v2325_v47 = vmax.f32 %v2323_v34, %v2324_v40  ;;  %v2331_v51 = vrot.slane %v2330_v41, 2 }
 0x23b   : > { %v2089_v59 = vmax.f32 %v2087_v50, %v2088_v42  ;;  %v2095_v60 = vrot.slane %v2094_v43, 1  ;;  %v2102_v56 = vrot.slane %v2101_v44, 1  ;;  %v2108_v62 = vmax.f32 %v2106_v38, %v2107_v45 }
 0x23c   : > { %v2319_v46 = vrot.slane %v2318_v49, 1  ;;  %v2326_v18 = vrot.slane %v2325_v47, 1  ;;  %v2332_v63 = vmax.f32 %v2330_v41, %v2331_v51  ;;  %v1719_v1 = vcombine.high %v3914_v5, %v3914_v5 }
 0x23d   : > { %v2096_v2 = vmax.f32 %v2094_v43, %v2095_v60  ;;  %v2103_v7 = vmax.f32 %v2101_v44, %v2102_v56  ;;  %v2109_v8 = vrot.slane %v2108_v62, 1  ;;  %v1726_v9 = vrot.slane %v3914_v5, %v3749_v24 }
 0x23e   : > { %v2320_v12 = vmax.f32 %v2318_v49, %v2319_v46  ;;  %v2333_v3 = vrot.slane %v2332_v63, 1  ;;  %v1733_v13 = vrot.slane %v1719_v1, %v3749_v24  ;;  %v1855_v21 = vcombine.high %v3911_v0, %v3911_v0 }
 0x23f   : > { %v2504_v15 = vsel %vm2483_vm13, %v2096_v2, %v2089_v59  ;;  %v1734_v39 = vcombine.high %v1726_v9, %v1726_v9  ;;  %v2111_v20 = vsel %vm1970_vm12, %v1726_v9, -inf  ;;  %v2110_v55 = vmax.f32 %v2108_v62, %v2109_v8 }
 0x240   : > { %v2505_v61 = vsel %vm2485_vm14, %v2103_v7, %v2504_v15  ;;  %v2327_v22 = vmax.f32 %v2325_v47, %v2326_v18  ;;  %v1735_v17 = vcombine.high %v1733_v13, %v1733_v13  ;;  %v2532_v23 = vsel %vm2483_vm13, %v2320_v12, %v2313_v48 }
 0x241   : > { %v2112_v5 = vrot.slane %v2111_v20, 4  ;;  %v2118_v19 = vsel %vm1970_vm12, %v1734_v39, -inf  ;;  %v2125_v25 = vsel %vm1970_vm12, %v1733_v13, -inf  ;;  %v2334_v10 = vmax.f32 %v2332_v63, %v2333_v3 }
 0x242   : > { %v2119_v26 = vrot.slane %v2118_v19, 4  ;;  %v2126_v54 = vrot.slane %v2125_v25, 4  ;;  %v2132_v16 = vsel %vm1970_vm12, %v1735_v17, -inf  ;;  %v1862_v57 = vrot.slane %v3911_v0, %v3749_v24 }
 0x243   : > { %v2113_v27 = vmax.f32 %v2111_v20, %v2112_v5  ;;  %v2133_v28 = vrot.slane %v2132_v16, 4  ;;  %v1869_v29 = vrot.slane %v1855_v21, %v3749_v24  ;;  %v2533_v30 = vsel %vm2485_vm14, %v2327_v22, %v2532_v23 }
 0x244   : > { %v2120_v31 = vmax.f32 %v2118_v19, %v2119_v26  ;;  %v2127_v32 = vmax.f32 %v2125_v25, %v2126_v54  ;;  %v2506_v33 = vsel %vm2487_vm15, %v2110_v55, %v2505_v61  ;;  %v1870_v50 = vcombine.high %v1862_v57, %v1862_v57 }
 0x245   : > { %v2114_v34 = vrot.slane %v2113_v27, 2  ;;  %v2134_v35 = vmax.f32 %v2132_v16, %v2133_v28  ;;  %v1871_v36 = vcombine.high %v1869_v29, %v1869_v29  ;;  %v2335_v4 = vsel %vm1970_vm12, %v1862_v57, -inf }
 0x246   : > { %v2121_v37 = vrot.slane %v2120_v31, 2  ;;  %v2128_v38 = vrot.slane %v2127_v32, 2  ;;  %v2349_v6 = vsel %vm1970_vm12, %v1869_v29, -inf  ;;  %v2336_v41 = vrot.slane %v2335_v4, 4 }
 0x247   : > { %v2115_v40 = vmax.f32 %v2113_v27, %v2114_v34  ;;  %v2135_v0 = vrot.slane %v2134_v35, 2  ;;  %v2342_v42 = vsel %vm1970_vm12, %v1870_v50, -inf  ;;  %v2350_v48 = vrot.slane %v2349_v6, 4 }
 0x248   : > { %v2122_v43 = vmax.f32 %v2120_v31, %v2121_v37  ;;  %v2129_v44 = vmax.f32 %v2127_v32, %v2128_v38  ;;  %v2343_v45 = vrot.slane %v2342_v42, 4  ;;  %v2337_v51 = vmax.f32 %v2335_v4, %v2336_v41  ;;  %v3100_v37 = vld [vmem:[%s4065_s2] ss:$0 sm:$0xff] }
 0x249   : > { %v2116_v49 = vrot.slane %v2115_v40, 1  ;;  %v2136_v47 = vmax.f32 %v2134_v35, %v2135_v0  ;;  %v2356_v59 = vsel %vm1970_vm12, %v1871_v36, -inf  ;;  %v2351_v46 = vmax.f32 %v2349_v6, %v2350_v48 }
 0x24a   : > { %v2123_v60 = vrot.slane %v2122_v43, 1  ;;  %v2130_v56 = vrot.slane %v2129_v44, 1  ;;  %v2344_v62 = vmax.f32 %v2342_v42, %v2343_v45  ;;  %v2338_v1 = vrot.slane %v2337_v51, 2 }
 0x24b   : > { %v2117_v18 = vmax.f32 %v2115_v40, %v2116_v49  ;;  %v2137_v63 = vrot.slane %v2136_v47, 1  ;;  %v2357_v2 = vrot.slane %v2356_v59, 4  ;;  %v2352_v12 = vrot.slane %v2351_v46, 2 }
 0x24c   : > { %v2124_v7 = vmax.f32 %v2122_v43, %v2123_v60  ;;  %v2131_v8 = vmax.f32 %v2129_v44, %v2130_v56  ;;  %v2345_v9 = vrot.slane %v2344_v62, 2  ;;  %v2339_v15 = vmax.f32 %v2337_v51, %v2338_v1 }
 0x24d   : > { %v2138_v3 = vmax.f32 %v2136_v47, %v2137_v63  ;;  %v2507_v13 = vsel %vm2489_vm0, %v2117_v18, %v2506_v33  ;;  %v2358_v39 = vmax.f32 %v2356_v59, %v2357_v2  ;;  %v2353_v55 = vmax.f32 %v2351_v46, %v2352_v12 }
 0x24e   : > { %v2508_v20 = vsel %vm2491_vm1, %v2124_v7, %v2507_v13  ;;  %v2346_v21 = vmax.f32 %v2344_v62, %v2345_v9  ;;  %v2340_v22 = vrot.slane %v2339_v15, 1  ;;  %v2534_v19 = vsel %vm2487_vm15, %v2334_v10, %v2533_v30 }
 0x24f   : > { %v2509_v61 = vsel %vm2493_vm2, %v2131_v8, %v2508_v20  ;;  %v2359_v17 = vrot.slane %v2358_v39, 2  ;;  %v2354_v5 = vrot.slane %v2353_v55, 1 }
 0x250   : > { %v2347_v23 = vrot.slane %v2346_v21, 1  ;;  %v3954_v25 = vsel %vm2495_vm3, %v2138_v3, %v2509_v61  ;;  %v2341_v26 = vmax.f32 %v2339_v15, %v2340_v22 }
 0x251   : > { %v2360_v54 = vmax.f32 %v2358_v39, %v2359_v17  ;;  %v2555_v16 = vcombine.high %v3875_v11, %v3954_v25  ;;  %v2554_v27 = vcombine.low %v3875_v11, %v3954_v25  ;;  %v2355_v57 = vmax.f32 %v2353_v55, %v2354_v5 }
 0x252   : > { %v2348_v28 = vmax.f32 %v2346_v21, %v2347_v23  ;;  %v2535_v31 = vsel %vm2489_vm0, %v2341_v26, %v2534_v19 }
 0x253   : > { %v2361_v29 = vrot.slane %v2360_v54, 1 }
 0x254   : > { %v2536_v32 = vsel %vm2491_vm1, %v2348_v28, %v2535_v31 }
 0x255   : > { %v2362_v33 = vmax.f32 %v2360_v54, %v2361_v29  ;;  %v2537_v10 = vsel %vm2493_vm2, %v2355_v57, %v2536_v32 }
 0x257   : > { %v3964_v30 = vsel %vm2495_vm3, %v2362_v33, %v2537_v10 }
 0x258   : > { %v2587_v34 = vcombine.high %v3881_v14, %v3964_v30  ;;  %v2586_v35 = vcombine.low %v3881_v14, %v3964_v30 }
 0x25a   : > { %v2601_v11 = vrot.slane %v2587_v34, %v3749_v24 }
 0x25f   : > { %v3061_v50 = vpop.f32.mrb[12].mxu1 }
 0x260   : > { %v1531_v38 = vadd.f32 %v3100_v37, %v3061_v50  ;;  %v1522_v4 = vpop.f32.mrb[13].mxu1 }
 0x261   : > { %v3045_v36 = vpop.f32.mrb[12].mxu0  ;;  %v1523_v0 = vadd.f32 %v3100_v37, %v1522_v4  ;;  %v3062_v41 = vpop.f32.mrb[14].mxu1 }
 0x262   : > { %v1467_v6 = vadd.f32 %v3100_v37, %v3045_v36  ;;  %v1458_v40 = vpop.f32.mrb[13].mxu0  ;;  %v1567_v42 = vmax.f32 %v1531_v38, 0.0  ;;  %v1534_v45 = vadd.f32 %v3100_v37, %v3062_v41  ;;  %v1525_v48 = vpop.f32.mrb[15].mxu1 }
 0x263   : > { %v1459_v43 = vadd.f32 %v3100_v37, %v1458_v40  ;;  %v3046_v44 = vpop.f32.mrb[14].mxu0  ;;  %v1565_v47 = vmax.f32 %v1523_v0, 0.0  ;;  %v1526_v60 = vadd.f32 %v3100_v37, %v1525_v48 }
 0x264   : > { %v1551_v49 = vmax.f32 %v1467_v6, 0.0  ;;  %v1470_v51 = vadd.f32 %v3100_v37, %v3046_v44  ;;  %v1461_v59 = vpop.f32.mrb[15].mxu0  ;;  %v1613_v56 = vsel %vm1569_vm11, %v1567_v42, -inf  ;;  %v1568_v46 = vmax.f32 %v1534_v45, 0.0 }
 0x265   : > { %v1549_v62 = vmax.f32 %v1459_v43, 0.0  ;;  %v1462_v18 = vadd.f32 %v3100_v37, %v1461_v59  ;;  %v1612_v1 = vsel %vm1569_vm11, %v1565_v47, -inf  ;;  %v1566_v7 = vmax.f32 %v1526_v60, 0.0 }
 0x266   : > { %v1589_v63 = vsel %vm1569_vm11, %v1551_v49, -inf  ;;  %v1552_v2 = vmax.f32 %v1470_v51, 0.0  ;;  %v1614_v9 = vmax.f32 %v1612_v1, %v1613_v56  ;;  %v1616_v12 = vsel %vm1569_vm11, %v1568_v46, -inf }
 0x267   : > { %v1588_v8 = vsel %vm1569_vm11, %v1549_v62, -inf  ;;  %v1550_v3 = vmax.f32 %v1462_v18, 0.0  ;;  %v1615_v39 = vsel %vm1569_vm11, %v1566_v7, -inf }
 0x268   : > { %v1590_v13 = vmax.f32 %v1588_v8, %v1589_v63  ;;  %v1592_v15 = vsel %vm1569_vm11, %v1552_v2, -inf  ;;  %v1872_v20 = vcombine.high %v1614_v9, %v1614_v9  ;;  %v1879_v21 = vrot.slane %v1614_v9, %v3749_v24 }
 0x269   : > { %v1591_v55 = vsel %vm1569_vm11, %v1550_v3, -inf  ;;  %v3982_v61 = vmax.f32 %v1615_v39, %v1616_v12 }
 0x26a   : > { %v1736_v22 = vcombine.high %v1590_v13, %v1590_v13  ;;  %v1743_v17 = vrot.slane %v1590_v13, %v3749_v24  ;;  %v1593_v23 = vmax.f32 %v1591_v55, %v1592_v15  ;;  %v1886_v5 = vrot.slane %v1872_v20, %v3749_v24 }
 0x26b   : > { %v1887_v19 = vcombine.high %v1879_v21, %v1879_v21  ;;  %v2363_v26 = vsel %vm1970_vm12, %v1879_v21, -inf }
 0x26c   : > { %v1750_v54 = vrot.slane %v1736_v22, %v3749_v24  ;;  %v1751_v28 = vcombine.high %v1743_v17, %v1743_v17  ;;  %v2139_v57 = vsel %vm1970_vm12, %v1743_v17, -inf  ;;  %v2364_v29 = vrot.slane %v2363_v26, 4 }
 0x26d   : > { %v2140_v31 = vrot.slane %v2139_v57, 4  ;;  %v1888_v32 = vcombine.high %v1886_v5, %v1886_v5  ;;  %v2370_v33 = vsel %vm1970_vm12, %v1887_v19, -inf  ;;  %v2377_v10 = vsel %vm1970_vm12, %v1886_v5, -inf }
 0x26e   : > { %v1752_v50 = vcombine.high %v1750_v54, %v1750_v54  ;;  %v2146_v36 = vsel %vm1970_vm12, %v1751_v28, -inf  ;;  %v2153_v37 = vsel %vm1970_vm12, %v1750_v54, -inf  ;;  %v2365_v38 = vmax.f32 %v2363_v26, %v2364_v29 }
 0x26f   : > { %v2141_v4 = vmax.f32 %v2139_v57, %v2140_v31  ;;  %v2147_v6 = vrot.slane %v2146_v36, 4  ;;  %v2154_v40 = vrot.slane %v2153_v37, 4  ;;  %v2371_v0 = vrot.slane %v2370_v33, 4 }
 0x270   : > { %v2160_v41 = vsel %vm1970_vm12, %v1752_v50, -inf  ;;  %v2366_v42 = vrot.slane %v2365_v38, 2  ;;  %v2378_v43 = vrot.slane %v2377_v10, 4  ;;  %v2384_v44 = vsel %vm1970_vm12, %v1888_v32, -inf }
 0x271   : > { %v2142_v45 = vrot.slane %v2141_v4, 2  ;;  %v2148_v48 = vmax.f32 %v2146_v36, %v2147_v6  ;;  %v2155_v49 = vmax.f32 %v2153_v37, %v2154_v40  ;;  %v2161_v47 = vrot.slane %v2160_v41, 4 }
 0x272   : > { %v2367_v51 = vmax.f32 %v2365_v38, %v2366_v42  ;;  %v2372_v59 = vmax.f32 %v2370_v33, %v2371_v0  ;;  %v2379_v60 = vmax.f32 %v2377_v10, %v2378_v43  ;;  %v2385_v56 = vrot.slane %v2384_v44, 4 }
 0x273   : > { %v2143_v62 = vmax.f32 %v2141_v4, %v2142_v45  ;;  %v2149_v46 = vrot.slane %v2148_v48, 2  ;;  %v2156_v18 = vrot.slane %v2155_v49, 2  ;;  %v2162_v63 = vmax.f32 %v2160_v41, %v2161_v47 }
 0x274   : > { %v2373_v1 = vrot.slane %v2372_v59, 2  ;;  %v2380_v2 = vrot.slane %v2379_v60, 2  ;;  %v2386_v7 = vmax.f32 %v2384_v44, %v2385_v56  ;;  %v2368_v13 = vrot.slane %v2367_v51, 1 }
 0x275   : > { %v2144_v8 = vrot.slane %v2143_v62, 1  ;;  %v2150_v9 = vmax.f32 %v2148_v48, %v2149_v46  ;;  %v2157_v12 = vmax.f32 %v2155_v49, %v2156_v18  ;;  %v2163_v3 = vrot.slane %v2162_v63, 2 }
 0x276   : > { %v2374_v15 = vmax.f32 %v2372_v59, %v2373_v1  ;;  %v2381_v39 = vmax.f32 %v2379_v60, %v2380_v2  ;;  %v2387_v20 = vrot.slane %v2386_v7, 2  ;;  %v1753_v54 = vcombine.high %v1593_v23, %v1593_v23 }
 0x277   : > { %v2145_v21 = vmax.f32 %v2143_v62, %v2144_v8  ;;  %v2151_v55 = vrot.slane %v2150_v9, 1  ;;  %v2158_v22 = vrot.slane %v2157_v12, 1  ;;  %v2164_v17 = vmax.f32 %v2162_v63, %v2163_v3 }
 0x278   : > { %v2375_v5 = vrot.slane %v2374_v15, 1  ;;  %v2382_v19 = vrot.slane %v2381_v39, 1  ;;  %v2388_v26 = vmax.f32 %v2386_v7, %v2387_v20  ;;  %v1760_v31 = vrot.slane %v1593_v23, %v3749_v24 }
 0x279   : > { %v2152_v28 = vmax.f32 %v2150_v9, %v2151_v55  ;;  %v2159_v57 = vmax.f32 %v2157_v12, %v2158_v22  ;;  %v2165_v29 = vrot.slane %v2164_v17, 1  ;;  %v1767_v33 = vrot.slane %v1753_v54, %v3749_v24 }
 0x27a   : > { %v2389_v32 = vrot.slane %v2388_v26, 1  ;;  %v1889_v10 = vcombine.high %v3982_v61, %v3982_v61  ;;  %v3119_v50 = vmov 1934713408   ;;  %v2369_v38 = vmax.f32 %v2367_v51, %v2368_v13 }
 0x27b   : > { %v3999_v36 = vunpack.c.l.s4 %v3119_v50  ;;  %v2511_v37 = vsel %vm2483_vm13, %v2152_v28, %v2145_v21  ;;  %v1768_v4 = vcombine.high %v1760_v31, %v1760_v31  ;;  %v2167_v6 = vsel %vm1970_vm12, %v1760_v31, -inf }
 0x27c   : > { %v2166_v40 = vmax.f32 %v2164_v17, %v2165_v29  ;;  %v2376_v0 = vmax.f32 %v2374_v15, %v2375_v5  ;;  %v2383_v41 = vmax.f32 %v2381_v39, %v2382_v19  ;;  %v1769_v42 = vcombine.high %v1767_v33, %v1767_v33 }
 0x27d   : > { %v2512_v23 = vsel %vm2485_vm14, %v2159_v57, %v2511_v37  ;;  %v2168_v43 = vrot.slane %v2167_v6, 4  ;;  %v2174_v44 = vsel %vm1970_vm12, %v1768_v4, -inf  ;;  %v2181_v45 = vsel %vm1970_vm12, %v1767_v33, -inf }
 0x27e   : > { %v2390_v48 = vmax.f32 %v2388_v26, %v2389_v32  ;;  %v2175_v49 = vrot.slane %v2174_v44, 4  ;;  %v2182_v47 = vrot.slane %v2181_v45, 4  ;;  %v2188_v59 = vsel %vm1970_vm12, %v1769_v42, -inf }
 0x27f   : > { %v2169_v51 = vmax.f32 %v2167_v6, %v2168_v43  ;;  %v2189_v60 = vrot.slane %v2188_v59, 4  ;;  %v1896_v56 = vrot.slane %v3982_v61, %v3749_v24  ;;  %v1903_v62 = vrot.slane %v1889_v10, %v3749_v24 }
 0x280   : > { %v2539_v46 = vsel %vm2483_vm13, %v2376_v0, %v2369_v38  ;;  %v2176_v18 = vmax.f32 %v2174_v44, %v2175_v49  ;;  %v2183_v63 = vmax.f32 %v2181_v45, %v2182_v47  ;;  %v2513_v1 = vsel %vm2487_vm15, %v2166_v40, %v2512_v23 }
 0x281   : > { %v2170_v2 = vrot.slane %v2169_v51, 2  ;;  %v2190_v7 = vmax.f32 %v2188_v59, %v2189_v60  ;;  %v1904_v8 = vcombine.high %v1896_v56, %v1896_v56  ;;  %v1905_v9 = vcombine.high %v1903_v62, %v1903_v62 }
 0x282   : > { %v2177_v12 = vrot.slane %v2176_v18, 2  ;;  %v2184_v3 = vrot.slane %v2183_v63, 2  ;;  %v2391_v13 = vsel %vm1970_vm12, %v1896_v56, -inf  ;;  %v2405_v15 = vsel %vm1970_vm12, %v1903_v62, -inf }
 0x283   : > { %v2171_v39 = vmax.f32 %v2169_v51, %v2170_v2  ;;  %v2191_v61 = vrot.slane %v2190_v7, 2  ;;  %v2392_v20 = vrot.slane %v2391_v13, 4  ;;  %v2398_v21 = vsel %vm1970_vm12, %v1904_v8, -inf }
 0x284   : > { %v2178_v55 = vmax.f32 %v2176_v18, %v2177_v12  ;;  %v2185_v22 = vmax.f32 %v2183_v63, %v2184_v3  ;;  %v2399_v17 = vrot.slane %v2398_v21, 4  ;;  %v2406_v5 = vrot.slane %v2405_v15, 4 }
 0x285   : > { %v2172_v19 = vrot.slane %v2171_v39, 1  ;;  %v2192_v26 = vmax.f32 %v2190_v7, %v2191_v61  ;;  %v2393_v54 = vmax.f32 %v2391_v13, %v2392_v20  ;;  %v2412_v28 = vsel %vm1970_vm12, %v1905_v9, -inf }
 0x286   : > { %v2179_v57 = vrot.slane %v2178_v55, 1  ;;  %v2186_v29 = vrot.slane %v2185_v22, 1  ;;  %v2400_v31 = vmax.f32 %v2398_v21, %v2399_v17  ;;  %v2407_v32 = vmax.f32 %v2405_v15, %v2406_v5 }
 0x287   : > { %v2173_v33 = vmax.f32 %v2171_v39, %v2172_v19  ;;  %v2193_v10 = vrot.slane %v2192_v26, 1  ;;  %v2394_v50 = vrot.slane %v2393_v54, 2  ;;  %v2413_v37 = vrot.slane %v2412_v28, 4 }
 0x288   : > { %v2540_v38 = vsel %vm2485_vm14, %v2383_v41, %v2539_v46  ;;  %v2180_v4 = vmax.f32 %v2178_v55, %v2179_v57  ;;  %v2401_v6 = vrot.slane %v2400_v31, 2  ;;  %v2408_v40 = vrot.slane %v2407_v32, 2 }
 0x289   : > { %v2187_v0 = vmax.f32 %v2185_v22, %v2186_v29  ;;  %v2514_v42 = vsel %vm2489_vm0, %v2173_v33, %v2513_v1  ;;  %v2395_v23 = vmax.f32 %v2393_v54, %v2394_v50  ;;  %v2414_v43 = vmax.f32 %v2412_v28, %v2413_v37 }
 0x28a   : > { %v2194_v44 = vmax.f32 %v2192_v26, %v2193_v10  ;;  %v2515_v45 = vsel %vm2491_vm1, %v2180_v4, %v2514_v42  ;;  %v2402_v49 = vmax.f32 %v2400_v31, %v2401_v6  ;;  %v2409_v47 = vmax.f32 %v2407_v32, %v2408_v40 }
 0x28b   : > { %v2516_v59 = vsel %vm2493_vm2, %v2187_v0, %v2515_v45  ;;  %v2396_v51 = vrot.slane %v2395_v23, 1  ;;  %v2415_v60 = vrot.slane %v2414_v43, 2  ;;  %v2541_v41 = vsel %vm2487_vm15, %v2390_v48, %v2540_v38 }
 0x28c   : > { %v2403_v56 = vrot.slane %v2402_v49, 1  ;;  %v2410_v62 = vrot.slane %v2409_v47, 1  ;;  %v2517_v46 = vsel %vm2495_vm3, %v2194_v44, %v2516_v59  ;;  %v2569_v9 = vrot.slane %v2555_v16, %v3749_v24 }
 0x28d   : > { %v2397_v18 = vmax.f32 %v2395_v23, %v2396_v51  ;;  %v2416_v63 = vmax.f32 %v2414_v43, %v2415_v60  ;;  %v2571_v1 = vcombine.high %v3886_v53, %v2517_v46  ;;  %v2570_v2 = vcombine.low %v3886_v53, %v2517_v46 }
 0x28e   : > { %v2404_v7 = vmax.f32 %v2402_v49, %v2403_v56  ;;  %v2411_v8 = vmax.f32 %v2409_v47, %v2410_v62  ;;  %v2622_v12 = vunpack.c.0.s8 %v3999_v36  ;;  %v2562_v53 = vrot.slane %v2554_v27, %v3749_v24 }
 0x28f   : > { %v2417_v3 = vrot.slane %v2416_v63, 1  ;;  %v2542_v48 = vsel %vm2489_vm0, %v2397_v18, %v2541_v41  ;;  %v2585_v13 = vrot.slane %v2571_v1, %v3749_v24  ;;  %v2578_v15 = vrot.slane %v2570_v2, %v3749_v24 }
 0x290   : > { %v2543_v39 = vsel %vm2491_vm1, %v2404_v7, %v2542_v48  ;;  %v2625_v17 = vsub.s32 %v2622_v12, %v3743_v52  ;;  %v2594_v27 = vrot.slane %v2586_v35, %v3749_v24 }
 0x291   : > { %v2418_v61 = vmax.f32 %v2416_v63, %v2417_v3  ;;  %v2544_v20 = vsel %vm2493_vm2, %v2411_v8, %v2543_v39  ;;  %v2634_v16 = vcombine.low %v2569_v9, %v2585_v13  ;;  %v2635_v21 = vcombine.high %v2569_v9, %v2585_v13 }
 0x292   : > { %v2618_v36 = vcombine.low %v2562_v53, %v2578_v15  ;;  %v2619_v55 = vcombine.high %v2562_v53, %v2578_v15 }
 0x293   : > { %v2545_v22 = vsel %vm2495_vm3, %v2418_v61, %v2544_v20  ;;  %v2642_v54 = vrot.slane %v2634_v16, %v2625_v17  ;;  %v2649_v52 = vrot.slane %v2635_v21, %v2625_v17 }
 0x294   : > { %v2603_v5 = vcombine.high %v3892_v58, %v2545_v22  ;;  %v2602_v19 = vcombine.low %v3892_v58, %v2545_v22  ;;  %v2626_v28 = vrot.slane %v2618_v36, %v2625_v17  ;;  %v2633_v57 = vrot.slane %v2619_v55, %v2625_v17 }
 0x296   : > { %v2617_v25 = vrot.slane %v2603_v5, %v3749_v24  ;;  %v2610_v26 = vrot.slane %v2602_v19, %v3749_v24 }
 0x298   : > { %v2666_v29 = vcombine.low %v2601_v11, %v2617_v25  ;;  %v2667_v58 = vcombine.high %v2601_v11, %v2617_v25  ;;  %v2650_v31 = vcombine.low %v2594_v27, %v2610_v26  ;;  %v2651_v32 = vcombine.high %v2594_v27, %v2610_v26 }
 0x29a   : > { %v2674_v33 = vrot.slane %v2666_v29, %v2625_v17  ;;  %v2681_v10 = vrot.slane %v2667_v58, %v2625_v17  ;;  %v2658_v34 = vrot.slane %v2650_v31, %v2625_v17  ;;  %v2665_v50 = vrot.slane %v2651_v32, %v2625_v17 }
 0x29c   : > { %v2687_v37 = vcombine.high %v2642_v54, %v2674_v33  ;;  %v2689_v38 = vcombine.high %v2649_v52, %v2681_v10  ;;  %v2683_v4 = vcombine.high %v2626_v28, %v2658_v34  ;;  %v2685_v14 = vcombine.high %v2633_v57, %v2665_v50 }
 0x29d   : > { %v2688_v30 = vcombine.low %v2649_v52, %v2681_v10  ;;  %v2686_v35 = vcombine.low %v2642_v54, %v2674_v33  ;;  %v2684_v24 = vcombine.low %v2633_v57, %v2665_v50  ;;  %v2682_v6 = vcombine.low %v2626_v28, %v2658_v34 }
 0x29e   : > { %v3093_v40 = vpack.i.bf16 %v2689_v38, %v2687_v37  ;;  %v3088_v0 = vpack.i.bf16 %v2685_v14, %v2683_v4 }
 0x2a0   : > { %3094 = vrot.lane.b32.xlu1 %v3093_v40, %s3120_s7  ;;  %3089 = vrot.lane.b32.xlu0 %v3088_v0, %s3120_s7 }
 0x312   : > { %v3095_v42 = vpop.permute.xlu1 %3094  ;;  %v3090_v23 = vpop.permute.xlu0 %3089 }
 0x313   : > { %v3097_v43 = vunpack.i.h.bf16 %v3095_v42  ;;  %v3096_v44 = vunpack.i.l.bf16 %v3095_v42  ;;  %v3092_v45 = vunpack.i.h.bf16 %v3090_v23  ;;  %v3091_v49 = vunpack.i.l.bf16 %v3090_v23 }
 0x315   : > { %v2709_v47 = vsel %vm1569_vm11, %v2688_v30, %v3097_v43  ;;  %v2708_v59 = vsel %vm1569_vm11, %v2686_v35, %v3096_v44  ;;  %v2707_v51 = vsel %vm1569_vm11, %v2684_v24, %v3092_v45  ;;  %v2706_v60 = vsel %vm1569_vm11, %v2682_v6, %v3091_v49 }
 0x316   : > { %v3008_v56 = vpack.c.bf16 %v2709_v47, %v2708_v59  ;;  %v3007_v62 = vpack.c.bf16 %v2707_v51, %v2706_v60 }
 0x318   : > { %2727 = vst [vmem:[%s170_s11 + $0x8] sm:$0xff] %v3008_v56  ;;  %2726 = vst [vmem:[%s170_s11] sm:$0xff] %v3007_v62 }
 0x319 PF: > { %s13_s12 = sadd.s32 1, %s3107_s12  }
 0x31a   : > { %p10_p4 = scmp.ge.s32.totalorder %s13_s12, 4  }
 0x31c   :  { %12 = sbr.rel (!%p10_p4) target bundleno = 1 (0x1), region = 64 }

</bundles_post_ra>
